<compile_context>
chip_gen: v6e
topology: v6e:2x2x1
jax: 0.10.0
libtpu: 0.0.40
codegen_flags: <defaults>
</compile_context>

<pallas_src>
import functools

import jax
import jax.numpy as jnp
from jax import lax
from jax.experimental import pallas as pl
from jax.experimental.pallas import tpu as pltpu


def _spatial_attention_kernel(w_ref, x_ref, o_ref, *, ks):
    # w_ref: (2*ks*ks,) f32 in SMEM  [avg-channel taps..., max-channel taps...]
    # x_ref: (TB, C, H, W) input block (native dtype)
    # o_ref: (TB, H, W) output block
    TB, C, H, W = x_ref.shape
    p = ks // 2

    # ---- channel pooling (C is small; per-channel reads keep the f32 working
    #      set to two planes instead of a full f32 copy of x) ----------------
    x0 = x_ref[:, 0].astype(jnp.float32)
    s = x0
    m = x0
    for c in range(1, C):
        xc = x_ref[:, c].astype(jnp.float32)
        s = s + xc
        m = jnp.maximum(m, xc)
    avg = s * (1.0 / C)          # (TB, H, W)
    mx = m                       # (TB, H, W)

    # ---- hoisted validity masks (zero-padding semantics) -------------------
    row = lax.broadcasted_iota(jnp.int32, (1, H, W), 1)
    col = lax.broadcasted_iota(jnp.int32, (1, H, W), 2)
    col_ok = [None] * ks
    for kx in range(ks):
        dx = kx - p
        if dx != 0:
            col_ok[kx] = (col + dx >= 0) & (col + dx < W)

    # ---- ks x ks conv with zero padding ks//2, via per-tap roll ------------
    acc = jnp.zeros((TB, H, W), jnp.float32)
    for ky in range(ks):
        dy = ky - p
        sr = (-dy) % H
        # shifted_row[b, y, x] = plane[b, y + dy, x]   (wraps per plane)
        a_r = pltpu.roll(avg, sr, axis=1) if sr else avg
        m_r = pltpu.roll(mx, sr, axis=1) if sr else mx
        if dy != 0:
            # Zero the wrapped rows ONCE per ky; every tap in the inner loop
            # then only needs the column mask.
            row_ok = (row + dy >= 0) & (row + dy < H)
            a_r = jnp.where(row_ok, a_r, 0.0)
            m_r = jnp.where(row_ok, m_r, 0.0)
        for kx in range(ks):
            dx = kx - p
            sc = (-dx) % W
            # shifted[b, y, x] = plane[b, y + dy, x + dx]
            a_s = pltpu.roll(a_r, sc, axis=2) if sc else a_r
            m_s = pltpu.roll(m_r, sc, axis=2) if sc else m_r
            w_a = w_ref[ky * ks + kx]              # weight on avg-pool channel
            w_m = w_ref[ks * ks + ky * ks + kx]    # weight on max-pool channel
            contrib = w_a * a_s + w_m * m_s
            if dx != 0:
                acc = acc + jnp.where(col_ok[kx], contrib, 0.0)
            else:
                acc = acc + contrib

    # ---- sigmoid (exp on the EUP slot) --------------------------------------
    o_ref[...] = (1.0 / (1.0 + jnp.exp(-acc))).astype(o_ref.dtype)


def _pick_batch_tile(N, C, H, W, itemsize, budget_bytes=8 * 1024 * 1024):
    # Rough per-image VMEM footprint: double-buffered in/out blocks plus the
    # f32 working set (pooled planes, accumulator, roll temporaries, masks).
    per_img = 2 * (C + 1) * H * W * itemsize + 12 * H * W * 4
    tb = max(1, budget_bytes // per_img)
    tb = min(int(tb), N)
    if N > 1:
        tb = min(tb, (N + 1) // 2)   # keep >= 2 grid steps (v7x megacore)
    while N % tb:                    # avoid a ragged final block
        tb -= 1
    return int(tb)


def spatial_attention(x_nchw, weight, *, kernel_size=7):
    """Pallas-TPU SpatialAttention forward.

    x_nchw: (N, C, H, W) input feature map (float dtype)
    weight: (1, 2, ks, ks) conv weight; in-channel 0 = avg-pool, 1 = max-pool
    returns (N, 1, H, W) attention map, dtype == x_nchw.dtype
    """
    assert kernel_size in (3, 7), "kernel size must be 3 or 7"
    ks = kernel_size
    N, C, H, W = x_nchw.shape
    assert weight.shape == (1, 2, ks, ks)

    w_flat = weight.astype(jnp.float32).reshape(2 * ks * ks)   # tiny; goes to SMEM
    tb = _pick_batch_tile(N, C, H, W, jnp.dtype(x_nchw.dtype).itemsize)
    grid = (pl.cdiv(N, tb),)

    out = pl.pallas_call(
        functools.partial(_spatial_attention_kernel, ks=ks),
        out_shape=jax.ShapeDtypeStruct((N, H, W), x_nchw.dtype),
        grid=grid,
        in_specs=[
            pl.BlockSpec(memory_space=pltpu.MemorySpace.SMEM),        # conv weight
            pl.BlockSpec((tb, C, H, W), lambda n: (n, 0, 0, 0)),      # x
        ],
        out_specs=pl.BlockSpec((tb, H, W), lambda n: (n, 0, 0)),
        compiler_params=pltpu.CompilerParams(
            dimension_semantics=("parallel",)),
    )(w_flat, x_nchw)
    return out.reshape(N, 1, H, W)


def _reference(x, weight, kernel_size=7):
    """Plain-JAX reference identical to the PyTorch module."""
    p = kernel_size // 2
    avg = jnp.mean(x.astype(jnp.float32), axis=1, keepdims=True)
    mx = jnp.max(x.astype(jnp.float32), axis=1, keepdims=True)
    xc = jnp.concatenate([avg, mx], axis=1)
    y = lax.conv_general_dilated(
        xc, weight.astype(jnp.float32),
        window_strides=(1, 1), padding=[(p, p), (p, p)],
        dimension_numbers=("NCHW", "OIHW", "NCHW"))
    return jax.nn.sigmoid(y).astype(x.dtype)


if __name__ == "__main__":
    key = jax.random.PRNGKey(0)
    k1, k2 = jax.random.split(key)

    N, C, H, W = 2, 4, 16, 16
    ks = 7
    x = jax.random.normal(k1, (N, C, H, W), dtype=jnp.float32)
    w = jax.random.normal(k2, (1, 2, ks, ks), dtype=jnp.float32) * 0.1

    out = spatial_attention(x, w, kernel_size=ks)
    jax.block_until_ready(out)

    ref = _reference(x, w, kernel_size=ks)
    assert out.shape == (N, 1, H, W)
    assert jnp.allclose(out, ref, atol=1e-5, rtol=1e-5), "mismatch vs reference"

    print("KERNEL_OK")
</pallas_src>

<mosaic_0001>
module attributes {stable_mosaic.version = 11 : i64} {
  func.func @_spatial_attention_kernel(%arg0: i32, %arg1: memref<98xf32, #tpu.memory_space<smem>>, %arg2: memref<1x4x16x16xf32, #tpu.memory_space<vmem>>, %arg3: memref<1x16x16xf32, #tpu.memory_space<vmem>>) attributes {dimension_semantics = [#tpu.dimension_semantics<parallel>], iteration_bounds = array<i64: 2>, scalar_prefetch = 0 : i64, scratch_operands = 0 : i64, tpu.core_type = #tpu.core_type<tc>, window_params = [{transform_indices = @transform_0, window_bounds = array<i64: 98>}, {transform_indices = @transform_1, window_bounds = array<i64: 1, 4, 16, 16>}, {transform_indices = @transform_2, window_bounds = array<i64: 1, 16, 16>}]} {
    %c0 = arith.constant 0 : index
    %c0_0 = arith.constant 0 : index
    %c0_1 = arith.constant 0 : index
    %c0_2 = arith.constant 0 : index
    %0 = vector.load %arg2[%c0, %c0_0, %c0_1, %c0_2] : memref<1x4x16x16xf32, #tpu.memory_space<vmem>>, vector<1x1x16x16xf32>
    %1 = vector.shape_cast %0 : vector<1x1x16x16xf32> to vector<1x16x16xf32>
    %c0_3 = arith.constant 0 : index
    %c1 = arith.constant 1 : index
    %c0_4 = arith.constant 0 : index
    %c0_5 = arith.constant 0 : index
    %2 = vector.load %arg2[%c0_3, %c1, %c0_4, %c0_5] : memref<1x4x16x16xf32, #tpu.memory_space<vmem>>, vector<1x1x16x16xf32>
    %3 = vector.shape_cast %2 : vector<1x1x16x16xf32> to vector<1x16x16xf32>
    %4 = arith.addf %1, %3 : vector<1x16x16xf32>
    %5 = arith.maximumf %1, %3 : vector<1x16x16xf32>
    %c0_6 = arith.constant 0 : index
    %c2 = arith.constant 2 : index
    %c0_7 = arith.constant 0 : index
    %c0_8 = arith.constant 0 : index
    %6 = vector.load %arg2[%c0_6, %c2, %c0_7, %c0_8] : memref<1x4x16x16xf32, #tpu.memory_space<vmem>>, vector<1x1x16x16xf32>
    %7 = vector.shape_cast %6 : vector<1x1x16x16xf32> to vector<1x16x16xf32>
    %8 = arith.addf %4, %7 : vector<1x16x16xf32>
    %9 = arith.maximumf %5, %7 : vector<1x16x16xf32>
    %c0_9 = arith.constant 0 : index
    %c3 = arith.constant 3 : index
    %c0_10 = arith.constant 0 : index
    %c0_11 = arith.constant 0 : index
    %10 = vector.load %arg2[%c0_9, %c3, %c0_10, %c0_11] : memref<1x4x16x16xf32, #tpu.memory_space<vmem>>, vector<1x1x16x16xf32>
    %11 = vector.shape_cast %10 : vector<1x1x16x16xf32> to vector<1x16x16xf32>
    %12 = arith.addf %8, %11 : vector<1x16x16xf32>
    %13 = arith.maximumf %9, %11 : vector<1x16x16xf32>
    %cst = arith.constant 2.500000e-01 : f32
    %14 = vector.broadcast %cst : f32 to vector<1x16x16xf32>
    %15 = arith.mulf %12, %14 : vector<1x16x16xf32>
    %16 = tpu.iota {dimensions = array<i32: 1>} : vector<1x16x16xi32>
    %17 = tpu.iota {dimensions = array<i32: 2>} : vector<1x16x16xi32>
    %c-3_i32 = arith.constant -3 : i32
    %18 = vector.broadcast %c-3_i32 : i32 to vector<1x16x16xi32>
    %19 = arith.addi %17, %18 : vector<1x16x16xi32>
    %c0_i32 = arith.constant 0 : i32
    %20 = vector.broadcast %c0_i32 : i32 to vector<1x16x16xi32>
    %21 = arith.cmpi sge, %19, %20 : vector<1x16x16xi32>
    %c-3_i32_12 = arith.constant -3 : i32
    %22 = vector.broadcast %c-3_i32_12 : i32 to vector<1x16x16xi32>
    %23 = arith.addi %17, %22 : vector<1x16x16xi32>
    %c16_i32 = arith.constant 16 : i32
    %24 = vector.broadcast %c16_i32 : i32 to vector<1x16x16xi32>
    %25 = arith.cmpi slt, %23, %24 : vector<1x16x16xi32>
    %26 = arith.andi %21, %25 : vector<1x16x16xi1>
    %c-2_i32 = arith.constant -2 : i32
    %27 = vector.broadcast %c-2_i32 : i32 to vector<1x16x16xi32>
    %28 = arith.addi %17, %27 : vector<1x16x16xi32>
    %c0_i32_13 = arith.constant 0 : i32
    %29 = vector.broadcast %c0_i32_13 : i32 to vector<1x16x16xi32>
    %30 = arith.cmpi sge, %28, %29 : vector<1x16x16xi32>
    %c-2_i32_14 = arith.constant -2 : i32
    %31 = vector.broadcast %c-2_i32_14 : i32 to vector<1x16x16xi32>
    %32 = arith.addi %17, %31 : vector<1x16x16xi32>
    %c16_i32_15 = arith.constant 16 : i32
    %33 = vector.broadcast %c16_i32_15 : i32 to vector<1x16x16xi32>
    %34 = arith.cmpi slt, %32, %33 : vector<1x16x16xi32>
    %35 = arith.andi %30, %34 : vector<1x16x16xi1>
    %c-1_i32 = arith.constant -1 : i32
    %36 = vector.broadcast %c-1_i32 : i32 to vector<1x16x16xi32>
    %37 = arith.addi %17, %36 : vector<1x16x16xi32>
    %c0_i32_16 = arith.constant 0 : i32
    %38 = vector.broadcast %c0_i32_16 : i32 to vector<1x16x16xi32>
    %39 = arith.cmpi sge, %37, %38 : vector<1x16x16xi32>
    %c-1_i32_17 = arith.constant -1 : i32
    %40 = vector.broadcast %c-1_i32_17 : i32 to vector<1x16x16xi32>
    %41 = arith.addi %17, %40 : vector<1x16x16xi32>
    %c16_i32_18 = arith.constant 16 : i32
    %42 = vector.broadcast %c16_i32_18 : i32 to vector<1x16x16xi32>
    %43 = arith.cmpi slt, %41, %42 : vector<1x16x16xi32>
    %44 = arith.andi %39, %43 : vector<1x16x16xi1>
    %c1_i32 = arith.constant 1 : i32
    %45 = vector.broadcast %c1_i32 : i32 to vector<1x16x16xi32>
    %46 = arith.addi %17, %45 : vector<1x16x16xi32>
    %c0_i32_19 = arith.constant 0 : i32
    %47 = vector.broadcast %c0_i32_19 : i32 to vector<1x16x16xi32>
    %48 = arith.cmpi sge, %46, %47 : vector<1x16x16xi32>
    %c1_i32_20 = arith.constant 1 : i32
    %49 = vector.broadcast %c1_i32_20 : i32 to vector<1x16x16xi32>
    %50 = arith.addi %17, %49 : vector<1x16x16xi32>
    %c16_i32_21 = arith.constant 16 : i32
    %51 = vector.broadcast %c16_i32_21 : i32 to vector<1x16x16xi32>
    %52 = arith.cmpi slt, %50, %51 : vector<1x16x16xi32>
    %53 = arith.andi %48, %52 : vector<1x16x16xi1>
    %c2_i32 = arith.constant 2 : i32
    %54 = vector.broadcast %c2_i32 : i32 to vector<1x16x16xi32>
    %55 = arith.addi %17, %54 : vector<1x16x16xi32>
    %c0_i32_22 = arith.constant 0 : i32
    %56 = vector.broadcast %c0_i32_22 : i32 to vector<1x16x16xi32>
    %57 = arith.cmpi sge, %55, %56 : vector<1x16x16xi32>
    %c2_i32_23 = arith.constant 2 : i32
    %58 = vector.broadcast %c2_i32_23 : i32 to vector<1x16x16xi32>
    %59 = arith.addi %17, %58 : vector<1x16x16xi32>
    %c16_i32_24 = arith.constant 16 : i32
    %60 = vector.broadcast %c16_i32_24 : i32 to vector<1x16x16xi32>
    %61 = arith.cmpi slt, %59, %60 : vector<1x16x16xi32>
    %62 = arith.andi %57, %61 : vector<1x16x16xi1>
    %c3_i32 = arith.constant 3 : i32
    %63 = vector.broadcast %c3_i32 : i32 to vector<1x16x16xi32>
    %64 = arith.addi %17, %63 : vector<1x16x16xi32>
    %c0_i32_25 = arith.constant 0 : i32
    %65 = vector.broadcast %c0_i32_25 : i32 to vector<1x16x16xi32>
    %66 = arith.cmpi sge, %64, %65 : vector<1x16x16xi32>
    %c3_i32_26 = arith.constant 3 : i32
    %67 = vector.broadcast %c3_i32_26 : i32 to vector<1x16x16xi32>
    %68 = arith.addi %17, %67 : vector<1x16x16xi32>
    %c16_i32_27 = arith.constant 16 : i32
    %69 = vector.broadcast %c16_i32_27 : i32 to vector<1x16x16xi32>
    %70 = arith.cmpi slt, %68, %69 : vector<1x16x16xi32>
    %71 = arith.andi %66, %70 : vector<1x16x16xi1>
    %cst_28 = arith.constant 0.000000e+00 : f32
    %72 = vector.broadcast %cst_28 : f32 to vector<1x16x16xf32>
    %c3_i32_29 = arith.constant 3 : i32
    %73 = tpu.dynamic_rotate %15 by %c3_i32_29 dim 1 : vector<1x16x16xf32>, i32 -> vector<1x16x16xf32>
    %c3_i32_30 = arith.constant 3 : i32
    %74 = tpu.dynamic_rotate %13 by %c3_i32_30 dim 1 : vector<1x16x16xf32>, i32 -> vector<1x16x16xf32>
    %c-3_i32_31 = arith.constant -3 : i32
    %75 = vector.broadcast %c-3_i32_31 : i32 to vector<1x16x16xi32>
    %76 = arith.addi %16, %75 : vector<1x16x16xi32>
    %c0_i32_32 = arith.constant 0 : i32
    %77 = vector.broadcast %c0_i32_32 : i32 to vector<1x16x16xi32>
    %78 = arith.cmpi sge, %76, %77 : vector<1x16x16xi32>
    %c-3_i32_33 = arith.constant -3 : i32
    %79 = vector.broadcast %c-3_i32_33 : i32 to vector<1x16x16xi32>
    %80 = arith.addi %16, %79 : vector<1x16x16xi32>
    %c16_i32_34 = arith.constant 16 : i32
    %81 = vector.broadcast %c16_i32_34 : i32 to vector<1x16x16xi32>
    %82 = arith.cmpi slt, %80, %81 : vector<1x16x16xi32>
    %83 = arith.andi %78, %82 : vector<1x16x16xi1>
    %cst_35 = arith.constant 0.000000e+00 : f32
    %84 = vector.broadcast %cst_35 : f32 to vector<1x16x16xf32>
    %85 = arith.select %83, %73, %84 : vector<1x16x16xi1>, vector<1x16x16xf32>
    %cst_36 = arith.constant 0.000000e+00 : f32
    %86 = vector.broadcast %cst_36 : f32 to vector<1x16x16xf32>
    %87 = arith.select %83, %74, %86 : vector<1x16x16xi1>, vector<1x16x16xf32>
    %c3_i32_37 = arith.constant 3 : i32
    %88 = tpu.dynamic_rotate %85 by %c3_i32_37 dim 2 : vector<1x16x16xf32>, i32 -> vector<1x16x16xf32>
    %c3_i32_38 = arith.constant 3 : i32
    %89 = tpu.dynamic_rotate %87 by %c3_i32_38 dim 2 : vector<1x16x16xf32>, i32 -> vector<1x16x16xf32>
    %c0_39 = arith.constant 0 : index
    %90 = memref.load %arg1[%c0_39] : memref<98xf32, #tpu.memory_space<smem>>
    %c49 = arith.constant 49 : index
    %91 = memref.load %arg1[%c49] : memref<98xf32, #tpu.memory_space<smem>>
    %92 = vector.broadcast %90 : f32 to vector<1x16x16xf32>
    %93 = arith.mulf %92, %88 : vector<1x16x16xf32>
    %94 = vector.broadcast %91 : f32 to vector<1x16x16xf32>
    %95 = arith.mulf %94, %89 : vector<1x16x16xf32>
    %96 = arith.addf %93, %95 : vector<1x16x16xf32>
    %cst_40 = arith.constant 0.000000e+00 : f32
    %97 = vector.broadcast %cst_40 : f32 to vector<1x16x16xf32>
    %98 = arith.select %26, %96, %97 : vector<1x16x16xi1>, vector<1x16x16xf32>
    %99 = arith.addf %72, %98 : vector<1x16x16xf32>
    %c2_i32_41 = arith.constant 2 : i32
    %100 = tpu.dynamic_rotate %85 by %c2_i32_41 dim 2 : vector<1x16x16xf32>, i32 -> vector<1x16x16xf32>
    %c2_i32_42 = arith.constant 2 : i32
    %101 = tpu.dynamic_rotate %87 by %c2_i32_42 dim 2 : vector<1x16x16xf32>, i32 -> vector<1x16x16xf32>
    %c1_43 = arith.constant 1 : index
    %102 = memref.load %arg1[%c1_43] : memref<98xf32, #tpu.memory_space<smem>>
    %c50 = arith.constant 50 : index
    %103 = memref.load %arg1[%c50] : memref<98xf32, #tpu.memory_space<smem>>
    %104 = vector.broadcast %102 : f32 to vector<1x16x16xf32>
    %105 = arith.mulf %104, %100 : vector<1x16x16xf32>
    %106 = vector.broadcast %103 : f32 to vector<1x16x16xf32>
    %107 = arith.mulf %106, %101 : vector<1x16x16xf32>
    %108 = arith.addf %105, %107 : vector<1x16x16xf32>
    %cst_44 = arith.constant 0.000000e+00 : f32
    %109 = vector.broadcast %cst_44 : f32 to vector<1x16x16xf32>
    %110 = arith.select %35, %108, %109 : vector<1x16x16xi1>, vector<1x16x16xf32>
    %111 = arith.addf %99, %110 : vector<1x16x16xf32>
    %c1_i32_45 = arith.constant 1 : i32
    %112 = tpu.dynamic_rotate %85 by %c1_i32_45 dim 2 : vector<1x16x16xf32>, i32 -> vector<1x16x16xf32>
    %c1_i32_46 = arith.constant 1 : i32
    %113 = tpu.dynamic_rotate %87 by %c1_i32_46 dim 2 : vector<1x16x16xf32>, i32 -> vector<1x16x16xf32>
    %c2_47 = arith.constant 2 : index
    %114 = memref.load %arg1[%c2_47] : memref<98xf32, #tpu.memory_space<smem>>
    %c51 = arith.constant 51 : index
    %115 = memref.load %arg1[%c51] : memref<98xf32, #tpu.memory_space<smem>>
    %116 = vector.broadcast %114 : f32 to vector<1x16x16xf32>
    %117 = arith.mulf %116, %112 : vector<1x16x16xf32>
    %118 = vector.broadcast %115 : f32 to vector<1x16x16xf32>
    %119 = arith.mulf %118, %113 : vector<1x16x16xf32>
    %120 = arith.addf %117, %119 : vector<1x16x16xf32>
    %cst_48 = arith.constant 0.000000e+00 : f32
    %121 = vector.broadcast %cst_48 : f32 to vector<1x16x16xf32>
    %122 = arith.select %44, %120, %121 : vector<1x16x16xi1>, vector<1x16x16xf32>
    %123 = arith.addf %111, %122 : vector<1x16x16xf32>
    %c3_49 = arith.constant 3 : index
    %124 = memref.load %arg1[%c3_49] : memref<98xf32, #tpu.memory_space<smem>>
    %c52 = arith.constant 52 : index
    %125 = memref.load %arg1[%c52] : memref<98xf32, #tpu.memory_space<smem>>
    %126 = vector.broadcast %124 : f32 to vector<1x16x16xf32>
    %127 = arith.mulf %126, %85 : vector<1x16x16xf32>
    %128 = vector.broadcast %125 : f32 to vector<1x16x16xf32>
    %129 = arith.mulf %128, %87 : vector<1x16x16xf32>
    %130 = arith.addf %127, %129 : vector<1x16x16xf32>
    %131 = arith.addf %123, %130 : vector<1x16x16xf32>
    %c15_i32 = arith.constant 15 : i32
    %132 = tpu.dynamic_rotate %85 by %c15_i32 dim 2 : vector<1x16x16xf32>, i32 -> vector<1x16x16xf32>
    %c15_i32_50 = arith.constant 15 : i32
    %133 = tpu.dynamic_rotate %87 by %c15_i32_50 dim 2 : vector<1x16x16xf32>, i32 -> vector<1x16x16xf32>
    %c4 = arith.constant 4 : index
    %134 = memref.load %arg1[%c4] : memref<98xf32, #tpu.memory_space<smem>>
    %c53 = arith.constant 53 : index
    %135 = memref.load %arg1[%c53] : memref<98xf32, #tpu.memory_space<smem>>
    %136 = vector.broadcast %134 : f32 to vector<1x16x16xf32>
    %137 = arith.mulf %136, %132 : vector<1x16x16xf32>
    %138 = vector.broadcast %135 : f32 to vector<1x16x16xf32>
    %139 = arith.mulf %138, %133 : vector<1x16x16xf32>
    %140 = arith.addf %137, %139 : vector<1x16x16xf32>
    %cst_51 = arith.constant 0.000000e+00 : f32
    %141 = vector.broadcast %cst_51 : f32 to vector<1x16x16xf32>
    %142 = arith.select %53, %140, %141 : vector<1x16x16xi1>, vector<1x16x16xf32>
    %143 = arith.addf %131, %142 : vector<1x16x16xf32>
    %c14_i32 = arith.constant 14 : i32
    %144 = tpu.dynamic_rotate %85 by %c14_i32 dim 2 : vector<1x16x16xf32>, i32 -> vector<1x16x16xf32>
    %c14_i32_52 = arith.constant 14 : i32
    %145 = tpu.dynamic_rotate %87 by %c14_i32_52 dim 2 : vector<1x16x16xf32>, i32 -> vector<1x16x16xf32>
    %c5 = arith.constant 5 : index
    %146 = memref.load %arg1[%c5] : memref<98xf32, #tpu.memory_space<smem>>
    %c54 = arith.constant 54 : index
    %147 = memref.load %arg1[%c54] : memref<98xf32, #tpu.memory_space<smem>>
    %148 = vector.broadcast %146 : f32 to vector<1x16x16xf32>
    %149 = arith.mulf %148, %144 : vector<1x16x16xf32>
    %150 = vector.broadcast %147 : f32 to vector<1x16x16xf32>
    %151 = arith.mulf %150, %145 : vector<1x16x16xf32>
    %152 = arith.addf %149, %151 : vector<1x16x16xf32>
    %cst_53 = arith.constant 0.000000e+00 : f32
    %153 = vector.broadcast %cst_53 : f32 to vector<1x16x16xf32>
    %154 = arith.select %62, %152, %153 : vector<1x16x16xi1>, vector<1x16x16xf32>
    %155 = arith.addf %143, %154 : vector<1x16x16xf32>
    %c13_i32 = arith.constant 13 : i32
    %156 = tpu.dynamic_rotate %85 by %c13_i32 dim 2 : vector<1x16x16xf32>, i32 -> vector<1x16x16xf32>
    %c13_i32_54 = arith.constant 13 : i32
    %157 = tpu.dynamic_rotate %87 by %c13_i32_54 dim 2 : vector<1x16x16xf32>, i32 -> vector<1x16x16xf32>
    %c6 = arith.constant 6 : index
    %158 = memref.load %arg1[%c6] : memref<98xf32, #tpu.memory_space<smem>>
    %c55 = arith.constant 55 : index
    %159 = memref.load %arg1[%c55] : memref<98xf32, #tpu.memory_space<smem>>
    %160 = vector.broadcast %158 : f32 to vector<1x16x16xf32>
    %161 = arith.mulf %160, %156 : vector<1x16x16xf32>
    %162 = vector.broadcast %159 : f32 to vector<1x16x16xf32>
    %163 = arith.mulf %162, %157 : vector<1x16x16xf32>
    %164 = arith.addf %161, %163 : vector<1x16x16xf32>
    %cst_55 = arith.constant 0.000000e+00 : f32
    %165 = vector.broadcast %cst_55 : f32 to vector<1x16x16xf32>
    %166 = arith.select %71, %164, %165 : vector<1x16x16xi1>, vector<1x16x16xf32>
    %167 = arith.addf %155, %166 : vector<1x16x16xf32>
    %c2_i32_56 = arith.constant 2 : i32
    %168 = tpu.dynamic_rotate %15 by %c2_i32_56 dim 1 : vector<1x16x16xf32>, i32 -> vector<1x16x16xf32>
    %c2_i32_57 = arith.constant 2 : i32
    %169 = tpu.dynamic_rotate %13 by %c2_i32_57 dim 1 : vector<1x16x16xf32>, i32 -> vector<1x16x16xf32>
    %c-2_i32_58 = arith.constant -2 : i32
    %170 = vector.broadcast %c-2_i32_58 : i32 to vector<1x16x16xi32>
    %171 = arith.addi %16, %170 : vector<1x16x16xi32>
    %c0_i32_59 = arith.constant 0 : i32
    %172 = vector.broadcast %c0_i32_59 : i32 to vector<1x16x16xi32>
    %173 = arith.cmpi sge, %171, %172 : vector<1x16x16xi32>
    %c-2_i32_60 = arith.constant -2 : i32
    %174 = vector.broadcast %c-2_i32_60 : i32 to vector<1x16x16xi32>
    %175 = arith.addi %16, %174 : vector<1x16x16xi32>
    %c16_i32_61 = arith.constant 16 : i32
    %176 = vector.broadcast %c16_i32_61 : i32 to vector<1x16x16xi32>
    %177 = arith.cmpi slt, %175, %176 : vector<1x16x16xi32>
    %178 = arith.andi %173, %177 : vector<1x16x16xi1>
    %cst_62 = arith.constant 0.000000e+00 : f32
    %179 = vector.broadcast %cst_62 : f32 to vector<1x16x16xf32>
    %180 = arith.select %178, %168, %179 : vector<1x16x16xi1>, vector<1x16x16xf32>
    %cst_63 = arith.constant 0.000000e+00 : f32
    %181 = vector.broadcast %cst_63 : f32 to vector<1x16x16xf32>
    %182 = arith.select %178, %169, %181 : vector<1x16x16xi1>, vector<1x16x16xf32>
    %c3_i32_64 = arith.constant 3 : i32
    %183 = tpu.dynamic_rotate %180 by %c3_i32_64 dim 2 : vector<1x16x16xf32>, i32 -> vector<1x16x16xf32>
    %c3_i32_65 = arith.constant 3 : i32
    %184 = tpu.dynamic_rotate %182 by %c3_i32_65 dim 2 : vector<1x16x16xf32>, i32 -> vector<1x16x16xf32>
    %c7 = arith.constant 7 : index
    %185 = memref.load %arg1[%c7] : memref<98xf32, #tpu.memory_space<smem>>
    %c56 = arith.constant 56 : index
    %186 = memref.load %arg1[%c56] : memref<98xf32, #tpu.memory_space<smem>>
    %187 = vector.broadcast %185 : f32 to vector<1x16x16xf32>
    %188 = arith.mulf %187, %183 : vector<1x16x16xf32>
    %189 = vector.broadcast %186 : f32 to vector<1x16x16xf32>
    %190 = arith.mulf %189, %184 : vector<1x16x16xf32>
    %191 = arith.addf %188, %190 : vector<1x16x16xf32>
    %cst_66 = arith.constant 0.000000e+00 : f32
    %192 = vector.broadcast %cst_66 : f32 to vector<1x16x16xf32>
    %193 = arith.select %26, %191, %192 : vector<1x16x16xi1>, vector<1x16x16xf32>
    %194 = arith.addf %167, %193 : vector<1x16x16xf32>
    %c2_i32_67 = arith.constant 2 : i32
    %195 = tpu.dynamic_rotate %180 by %c2_i32_67 dim 2 : vector<1x16x16xf32>, i32 -> vector<1x16x16xf32>
    %c2_i32_68 = arith.constant 2 : i32
    %196 = tpu.dynamic_rotate %182 by %c2_i32_68 dim 2 : vector<1x16x16xf32>, i32 -> vector<1x16x16xf32>
    %c8 = arith.constant 8 : index
    %197 = memref.load %arg1[%c8] : memref<98xf32, #tpu.memory_space<smem>>
    %c57 = arith.constant 57 : index
    %198 = memref.load %arg1[%c57] : memref<98xf32, #tpu.memory_space<smem>>
    %199 = vector.broadcast %197 : f32 to vector<1x16x16xf32>
    %200 = arith.mulf %199, %195 : vector<1x16x16xf32>
    %201 = vector.broadcast %198 : f32 to vector<1x16x16xf32>
    %202 = arith.mulf %201, %196 : vector<1x16x16xf32>
    %203 = arith.addf %200, %202 : vector<1x16x16xf32>
    %cst_69 = arith.constant 0.000000e+00 : f32
    %204 = vector.broadcast %cst_69 : f32 to vector<1x16x16xf32>
    %205 = arith.select %35, %203, %204 : vector<1x16x16xi1>, vector<1x16x16xf32>
    %206 = arith.addf %194, %205 : vector<1x16x16xf32>
    %c1_i32_70 = arith.constant 1 : i32
    %207 = tpu.dynamic_rotate %180 by %c1_i32_70 dim 2 : vector<1x16x16xf32>, i32 -> vector<1x16x16xf32>
    %c1_i32_71 = arith.constant 1 : i32
    %208 = tpu.dynamic_rotate %182 by %c1_i32_71 dim 2 : vector<1x16x16xf32>, i32 -> vector<1x16x16xf32>
    %c9 = arith.constant 9 : index
    %209 = memref.load %arg1[%c9] : memref<98xf32, #tpu.memory_space<smem>>
    %c58 = arith.constant 58 : index
    %210 = memref.load %arg1[%c58] : memref<98xf32, #tpu.memory_space<smem>>
    %211 = vector.broadcast %209 : f32 to vector<1x16x16xf32>
    %212 = arith.mulf %211, %207 : vector<1x16x16xf32>
    %213 = vector.broadcast %210 : f32 to vector<1x16x16xf32>
    %214 = arith.mulf %213, %208 : vector<1x16x16xf32>
    %215 = arith.addf %212, %214 : vector<1x16x16xf32>
    %cst_72 = arith.constant 0.000000e+00 : f32
    %216 = vector.broadcast %cst_72 : f32 to vector<1x16x16xf32>
    %217 = arith.select %44, %215, %216 : vector<1x16x16xi1>, vector<1x16x16xf32>
    %218 = arith.addf %206, %217 : vector<1x16x16xf32>
    %c10 = arith.constant 10 : index
    %219 = memref.load %arg1[%c10] : memref<98xf32, #tpu.memory_space<smem>>
    %c59 = arith.constant 59 : index
    %220 = memref.load %arg1[%c59] : memref<98xf32, #tpu.memory_space<smem>>
    %221 = vector.broadcast %219 : f32 to vector<1x16x16xf32>
    %222 = arith.mulf %221, %180 : vector<1x16x16xf32>
    %223 = vector.broadcast %220 : f32 to vector<1x16x16xf32>
    %224 = arith.mulf %223, %182 : vector<1x16x16xf32>
    %225 = arith.addf %222, %224 : vector<1x16x16xf32>
    %226 = arith.addf %218, %225 : vector<1x16x16xf32>
    %c15_i32_73 = arith.constant 15 : i32
    %227 = tpu.dynamic_rotate %180 by %c15_i32_73 dim 2 : vector<1x16x16xf32>, i32 -> vector<1x16x16xf32>
    %c15_i32_74 = arith.constant 15 : i32
    %228 = tpu.dynamic_rotate %182 by %c15_i32_74 dim 2 : vector<1x16x16xf32>, i32 -> vector<1x16x16xf32>
    %c11 = arith.constant 11 : index
    %229 = memref.load %arg1[%c11] : memref<98xf32, #tpu.memory_space<smem>>
    %c60 = arith.constant 60 : index
    %230 = memref.load %arg1[%c60] : memref<98xf32, #tpu.memory_space<smem>>
    %231 = vector.broadcast %229 : f32 to vector<1x16x16xf32>
    %232 = arith.mulf %231, %227 : vector<1x16x16xf32>
    %233 = vector.broadcast %230 : f32 to vector<1x16x16xf32>
    %234 = arith.mulf %233, %228 : vector<1x16x16xf32>
    %235 = arith.addf %232, %234 : vector<1x16x16xf32>
    %cst_75 = arith.constant 0.000000e+00 : f32
    %236 = vector.broadcast %cst_75 : f32 to vector<1x16x16xf32>
    %237 = arith.select %53, %235, %236 : vector<1x16x16xi1>, vector<1x16x16xf32>
    %238 = arith.addf %226, %237 : vector<1x16x16xf32>
    %c14_i32_76 = arith.constant 14 : i32
    %239 = tpu.dynamic_rotate %180 by %c14_i32_76 dim 2 : vector<1x16x16xf32>, i32 -> vector<1x16x16xf32>
    %c14_i32_77 = arith.constant 14 : i32
    %240 = tpu.dynamic_rotate %182 by %c14_i32_77 dim 2 : vector<1x16x16xf32>, i32 -> vector<1x16x16xf32>
    %c12 = arith.constant 12 : index
    %241 = memref.load %arg1[%c12] : memref<98xf32, #tpu.memory_space<smem>>
    %c61 = arith.constant 61 : index
    %242 = memref.load %arg1[%c61] : memref<98xf32, #tpu.memory_space<smem>>
    %243 = vector.broadcast %241 : f32 to vector<1x16x16xf32>
    %244 = arith.mulf %243, %239 : vector<1x16x16xf32>
    %245 = vector.broadcast %242 : f32 to vector<1x16x16xf32>
    %246 = arith.mulf %245, %240 : vector<1x16x16xf32>
    %247 = arith.addf %244, %246 : vector<1x16x16xf32>
    %cst_78 = arith.constant 0.000000e+00 : f32
    %248 = vector.broadcast %cst_78 : f32 to vector<1x16x16xf32>
    %249 = arith.select %62, %247, %248 : vector<1x16x16xi1>, vector<1x16x16xf32>
    %250 = arith.addf %238, %249 : vector<1x16x16xf32>
    %c13_i32_79 = arith.constant 13 : i32
    %251 = tpu.dynamic_rotate %180 by %c13_i32_79 dim 2 : vector<1x16x16xf32>, i32 -> vector<1x16x16xf32>
    %c13_i32_80 = arith.constant 13 : i32
    %252 = tpu.dynamic_rotate %182 by %c13_i32_80 dim 2 : vector<1x16x16xf32>, i32 -> vector<1x16x16xf32>
    %c13 = arith.constant 13 : index
    %253 = memref.load %arg1[%c13] : memref<98xf32, #tpu.memory_space<smem>>
    %c62 = arith.constant 62 : index
    %254 = memref.load %arg1[%c62] : memref<98xf32, #tpu.memory_space<smem>>
    %255 = vector.broadcast %253 : f32 to vector<1x16x16xf32>
    %256 = arith.mulf %255, %251 : vector<1x16x16xf32>
    %257 = vector.broadcast %254 : f32 to vector<1x16x16xf32>
    %258 = arith.mulf %257, %252 : vector<1x16x16xf32>
    %259 = arith.addf %256, %258 : vector<1x16x16xf32>
    %cst_81 = arith.constant 0.000000e+00 : f32
    %260 = vector.broadcast %cst_81 : f32 to vector<1x16x16xf32>
    %261 = arith.select %71, %259, %260 : vector<1x16x16xi1>, vector<1x16x16xf32>
    %262 = arith.addf %250, %261 : vector<1x16x16xf32>
    %c1_i32_82 = arith.constant 1 : i32
    %263 = tpu.dynamic_rotate %15 by %c1_i32_82 dim 1 : vector<1x16x16xf32>, i32 -> vector<1x16x16xf32>
    %c1_i32_83 = arith.constant 1 : i32
    %264 = tpu.dynamic_rotate %13 by %c1_i32_83 dim 1 : vector<1x16x16xf32>, i32 -> vector<1x16x16xf32>
    %c-1_i32_84 = arith.constant -1 : i32
    %265 = vector.broadcast %c-1_i32_84 : i32 to vector<1x16x16xi32>
    %266 = arith.addi %16, %265 : vector<1x16x16xi32>
    %c0_i32_85 = arith.constant 0 : i32
    %267 = vector.broadcast %c0_i32_85 : i32 to vector<1x16x16xi32>
    %268 = arith.cmpi sge, %266, %267 : vector<1x16x16xi32>
    %c-1_i32_86 = arith.constant -1 : i32
    %269 = vector.broadcast %c-1_i32_86 : i32 to vector<1x16x16xi32>
    %270 = arith.addi %16, %269 : vector<1x16x16xi32>
    %c16_i32_87 = arith.constant 16 : i32
    %271 = vector.broadcast %c16_i32_87 : i32 to vector<1x16x16xi32>
    %272 = arith.cmpi slt, %270, %271 : vector<1x16x16xi32>
    %273 = arith.andi %268, %272 : vector<1x16x16xi1>
    %cst_88 = arith.constant 0.000000e+00 : f32
    %274 = vector.broadcast %cst_88 : f32 to vector<1x16x16xf32>
    %275 = arith.select %273, %263, %274 : vector<1x16x16xi1>, vector<1x16x16xf32>
    %cst_89 = arith.constant 0.000000e+00 : f32
    %276 = vector.broadcast %cst_89 : f32 to vector<1x16x16xf32>
    %277 = arith.select %273, %264, %276 : vector<1x16x16xi1>, vector<1x16x16xf32>
    %c3_i32_90 = arith.constant 3 : i32
    %278 = tpu.dynamic_rotate %275 by %c3_i32_90 dim 2 : vector<1x16x16xf32>, i32 -> vector<1x16x16xf32>
    %c3_i32_91 = arith.constant 3 : i32
    %279 = tpu.dynamic_rotate %277 by %c3_i32_91 dim 2 : vector<1x16x16xf32>, i32 -> vector<1x16x16xf32>
    %c14 = arith.constant 14 : index
    %280 = memref.load %arg1[%c14] : memref<98xf32, #tpu.memory_space<smem>>
    %c63 = arith.constant 63 : index
    %281 = memref.load %arg1[%c63] : memref<98xf32, #tpu.memory_space<smem>>
    %282 = vector.broadcast %280 : f32 to vector<1x16x16xf32>
    %283 = arith.mulf %282, %278 : vector<1x16x16xf32>
    %284 = vector.broadcast %281 : f32 to vector<1x16x16xf32>
    %285 = arith.mulf %284, %279 : vector<1x16x16xf32>
    %286 = arith.addf %283, %285 : vector<1x16x16xf32>
    %cst_92 = arith.constant 0.000000e+00 : f32
    %287 = vector.broadcast %cst_92 : f32 to vector<1x16x16xf32>
    %288 = arith.select %26, %286, %287 : vector<1x16x16xi1>, vector<1x16x16xf32>
    %289 = arith.addf %262, %288 : vector<1x16x16xf32>
    %c2_i32_93 = arith.constant 2 : i32
    %290 = tpu.dynamic_rotate %275 by %c2_i32_93 dim 2 : vector<1x16x16xf32>, i32 -> vector<1x16x16xf32>
    %c2_i32_94 = arith.constant 2 : i32
    %291 = tpu.dynamic_rotate %277 by %c2_i32_94 dim 2 : vector<1x16x16xf32>, i32 -> vector<1x16x16xf32>
    %c15 = arith.constant 15 : index
    %292 = memref.load %arg1[%c15] : memref<98xf32, #tpu.memory_space<smem>>
    %c64 = arith.constant 64 : index
    %293 = memref.load %arg1[%c64] : memref<98xf32, #tpu.memory_space<smem>>
    %294 = vector.broadcast %292 : f32 to vector<1x16x16xf32>
    %295 = arith.mulf %294, %290 : vector<1x16x16xf32>
    %296 = vector.broadcast %293 : f32 to vector<1x16x16xf32>
    %297 = arith.mulf %296, %291 : vector<1x16x16xf32>
    %298 = arith.addf %295, %297 : vector<1x16x16xf32>
    %cst_95 = arith.constant 0.000000e+00 : f32
    %299 = vector.broadcast %cst_95 : f32 to vector<1x16x16xf32>
    %300 = arith.select %35, %298, %299 : vector<1x16x16xi1>, vector<1x16x16xf32>
    %301 = arith.addf %289, %300 : vector<1x16x16xf32>
    %c1_i32_96 = arith.constant 1 : i32
    %302 = tpu.dynamic_rotate %275 by %c1_i32_96 dim 2 : vector<1x16x16xf32>, i32 -> vector<1x16x16xf32>
    %c1_i32_97 = arith.constant 1 : i32
    %303 = tpu.dynamic_rotate %277 by %c1_i32_97 dim 2 : vector<1x16x16xf32>, i32 -> vector<1x16x16xf32>
    %c16 = arith.constant 16 : index
    %304 = memref.load %arg1[%c16] : memref<98xf32, #tpu.memory_space<smem>>
    %c65 = arith.constant 65 : index
    %305 = memref.load %arg1[%c65] : memref<98xf32, #tpu.memory_space<smem>>
    %306 = vector.broadcast %304 : f32 to vector<1x16x16xf32>
    %307 = arith.mulf %306, %302 : vector<1x16x16xf32>
    %308 = vector.broadcast %305 : f32 to vector<1x16x16xf32>
    %309 = arith.mulf %308, %303 : vector<1x16x16xf32>
    %310 = arith.addf %307, %309 : vector<1x16x16xf32>
    %cst_98 = arith.constant 0.000000e+00 : f32
    %311 = vector.broadcast %cst_98 : f32 to vector<1x16x16xf32>
    %312 = arith.select %44, %310, %311 : vector<1x16x16xi1>, vector<1x16x16xf32>
    %313 = arith.addf %301, %312 : vector<1x16x16xf32>
    %c17 = arith.constant 17 : index
    %314 = memref.load %arg1[%c17] : memref<98xf32, #tpu.memory_space<smem>>
    %c66 = arith.constant 66 : index
    %315 = memref.load %arg1[%c66] : memref<98xf32, #tpu.memory_space<smem>>
    %316 = vector.broadcast %314 : f32 to vector<1x16x16xf32>
    %317 = arith.mulf %316, %275 : vector<1x16x16xf32>
    %318 = vector.broadcast %315 : f32 to vector<1x16x16xf32>
    %319 = arith.mulf %318, %277 : vector<1x16x16xf32>
    %320 = arith.addf %317, %319 : vector<1x16x16xf32>
    %321 = arith.addf %313, %320 : vector<1x16x16xf32>
    %c15_i32_99 = arith.constant 15 : i32
    %322 = tpu.dynamic_rotate %275 by %c15_i32_99 dim 2 : vector<1x16x16xf32>, i32 -> vector<1x16x16xf32>
    %c15_i32_100 = arith.constant 15 : i32
    %323 = tpu.dynamic_rotate %277 by %c15_i32_100 dim 2 : vector<1x16x16xf32>, i32 -> vector<1x16x16xf32>
    %c18 = arith.constant 18 : index
    %324 = memref.load %arg1[%c18] : memref<98xf32, #tpu.memory_space<smem>>
    %c67 = arith.constant 67 : index
    %325 = memref.load %arg1[%c67] : memref<98xf32, #tpu.memory_space<smem>>
    %326 = vector.broadcast %324 : f32 to vector<1x16x16xf32>
    %327 = arith.mulf %326, %322 : vector<1x16x16xf32>
    %328 = vector.broadcast %325 : f32 to vector<1x16x16xf32>
    %329 = arith.mulf %328, %323 : vector<1x16x16xf32>
    %330 = arith.addf %327, %329 : vector<1x16x16xf32>
    %cst_101 = arith.constant 0.000000e+00 : f32
    %331 = vector.broadcast %cst_101 : f32 to vector<1x16x16xf32>
    %332 = arith.select %53, %330, %331 : vector<1x16x16xi1>, vector<1x16x16xf32>
    %333 = arith.addf %321, %332 : vector<1x16x16xf32>
    %c14_i32_102 = arith.constant 14 : i32
    %334 = tpu.dynamic_rotate %275 by %c14_i32_102 dim 2 : vector<1x16x16xf32>, i32 -> vector<1x16x16xf32>
    %c14_i32_103 = arith.constant 14 : i32
    %335 = tpu.dynamic_rotate %277 by %c14_i32_103 dim 2 : vector<1x16x16xf32>, i32 -> vector<1x16x16xf32>
    %c19 = arith.constant 19 : index
    %336 = memref.load %arg1[%c19] : memref<98xf32, #tpu.memory_space<smem>>
    %c68 = arith.constant 68 : index
    %337 = memref.load %arg1[%c68] : memref<98xf32, #tpu.memory_space<smem>>
    %338 = vector.broadcast %336 : f32 to vector<1x16x16xf32>
    %339 = arith.mulf %338, %334 : vector<1x16x16xf32>
    %340 = vector.broadcast %337 : f32 to vector<1x16x16xf32>
    %341 = arith.mulf %340, %335 : vector<1x16x16xf32>
    %342 = arith.addf %339, %341 : vector<1x16x16xf32>
    %cst_104 = arith.constant 0.000000e+00 : f32
    %343 = vector.broadcast %cst_104 : f32 to vector<1x16x16xf32>
    %344 = arith.select %62, %342, %343 : vector<1x16x16xi1>, vector<1x16x16xf32>
    %345 = arith.addf %333, %344 : vector<1x16x16xf32>
    %c13_i32_105 = arith.constant 13 : i32
    %346 = tpu.dynamic_rotate %275 by %c13_i32_105 dim 2 : vector<1x16x16xf32>, i32 -> vector<1x16x16xf32>
    %c13_i32_106 = arith.constant 13 : i32
    %347 = tpu.dynamic_rotate %277 by %c13_i32_106 dim 2 : vector<1x16x16xf32>, i32 -> vector<1x16x16xf32>
    %c20 = arith.constant 20 : index
    %348 = memref.load %arg1[%c20] : memref<98xf32, #tpu.memory_space<smem>>
    %c69 = arith.constant 69 : index
    %349 = memref.load %arg1[%c69] : memref<98xf32, #tpu.memory_space<smem>>
    %350 = vector.broadcast %348 : f32 to vector<1x16x16xf32>
    %351 = arith.mulf %350, %346 : vector<1x16x16xf32>
    %352 = vector.broadcast %349 : f32 to vector<1x16x16xf32>
    %353 = arith.mulf %352, %347 : vector<1x16x16xf32>
    %354 = arith.addf %351, %353 : vector<1x16x16xf32>
    %cst_107 = arith.constant 0.000000e+00 : f32
    %355 = vector.broadcast %cst_107 : f32 to vector<1x16x16xf32>
    %356 = arith.select %71, %354, %355 : vector<1x16x16xi1>, vector<1x16x16xf32>
    %357 = arith.addf %345, %356 : vector<1x16x16xf32>
    %c3_i32_108 = arith.constant 3 : i32
    %358 = tpu.dynamic_rotate %15 by %c3_i32_108 dim 2 : vector<1x16x16xf32>, i32 -> vector<1x16x16xf32>
    %c3_i32_109 = arith.constant 3 : i32
    %359 = tpu.dynamic_rotate %13 by %c3_i32_109 dim 2 : vector<1x16x16xf32>, i32 -> vector<1x16x16xf32>
    %c21 = arith.constant 21 : index
    %360 = memref.load %arg1[%c21] : memref<98xf32, #tpu.memory_space<smem>>
    %c70 = arith.constant 70 : index
    %361 = memref.load %arg1[%c70] : memref<98xf32, #tpu.memory_space<smem>>
    %362 = vector.broadcast %360 : f32 to vector<1x16x16xf32>
    %363 = arith.mulf %362, %358 : vector<1x16x16xf32>
    %364 = vector.broadcast %361 : f32 to vector<1x16x16xf32>
    %365 = arith.mulf %364, %359 : vector<1x16x16xf32>
    %366 = arith.addf %363, %365 : vector<1x16x16xf32>
    %cst_110 = arith.constant 0.000000e+00 : f32
    %367 = vector.broadcast %cst_110 : f32 to vector<1x16x16xf32>
    %368 = arith.select %26, %366, %367 : vector<1x16x16xi1>, vector<1x16x16xf32>
    %369 = arith.addf %357, %368 : vector<1x16x16xf32>
    %c2_i32_111 = arith.constant 2 : i32
    %370 = tpu.dynamic_rotate %15 by %c2_i32_111 dim 2 : vector<1x16x16xf32>, i32 -> vector<1x16x16xf32>
    %c2_i32_112 = arith.constant 2 : i32
    %371 = tpu.dynamic_rotate %13 by %c2_i32_112 dim 2 : vector<1x16x16xf32>, i32 -> vector<1x16x16xf32>
    %c22 = arith.constant 22 : index
    %372 = memref.load %arg1[%c22] : memref<98xf32, #tpu.memory_space<smem>>
    %c71 = arith.constant 71 : index
    %373 = memref.load %arg1[%c71] : memref<98xf32, #tpu.memory_space<smem>>
    %374 = vector.broadcast %372 : f32 to vector<1x16x16xf32>
    %375 = arith.mulf %374, %370 : vector<1x16x16xf32>
    %376 = vector.broadcast %373 : f32 to vector<1x16x16xf32>
    %377 = arith.mulf %376, %371 : vector<1x16x16xf32>
    %378 = arith.addf %375, %377 : vector<1x16x16xf32>
    %cst_113 = arith.constant 0.000000e+00 : f32
    %379 = vector.broadcast %cst_113 : f32 to vector<1x16x16xf32>
    %380 = arith.select %35, %378, %379 : vector<1x16x16xi1>, vector<1x16x16xf32>
    %381 = arith.addf %369, %380 : vector<1x16x16xf32>
    %c1_i32_114 = arith.constant 1 : i32
    %382 = tpu.dynamic_rotate %15 by %c1_i32_114 dim 2 : vector<1x16x16xf32>, i32 -> vector<1x16x16xf32>
    %c1_i32_115 = arith.constant 1 : i32
    %383 = tpu.dynamic_rotate %13 by %c1_i32_115 dim 2 : vector<1x16x16xf32>, i32 -> vector<1x16x16xf32>
    %c23 = arith.constant 23 : index
    %384 = memref.load %arg1[%c23] : memref<98xf32, #tpu.memory_space<smem>>
    %c72 = arith.constant 72 : index
    %385 = memref.load %arg1[%c72] : memref<98xf32, #tpu.memory_space<smem>>
    %386 = vector.broadcast %384 : f32 to vector<1x16x16xf32>
    %387 = arith.mulf %386, %382 : vector<1x16x16xf32>
    %388 = vector.broadcast %385 : f32 to vector<1x16x16xf32>
    %389 = arith.mulf %388, %383 : vector<1x16x16xf32>
    %390 = arith.addf %387, %389 : vector<1x16x16xf32>
    %cst_116 = arith.constant 0.000000e+00 : f32
    %391 = vector.broadcast %cst_116 : f32 to vector<1x16x16xf32>
    %392 = arith.select %44, %390, %391 : vector<1x16x16xi1>, vector<1x16x16xf32>
    %393 = arith.addf %381, %392 : vector<1x16x16xf32>
    %c24 = arith.constant 24 : index
    %394 = memref.load %arg1[%c24] : memref<98xf32, #tpu.memory_space<smem>>
    %c73 = arith.constant 73 : index
    %395 = memref.load %arg1[%c73] : memref<98xf32, #tpu.memory_space<smem>>
    %396 = vector.broadcast %394 : f32 to vector<1x16x16xf32>
    %397 = arith.mulf %396, %15 : vector<1x16x16xf32>
    %398 = vector.broadcast %395 : f32 to vector<1x16x16xf32>
    %399 = arith.mulf %398, %13 : vector<1x16x16xf32>
    %400 = arith.addf %397, %399 : vector<1x16x16xf32>
    %401 = arith.addf %393, %400 : vector<1x16x16xf32>
    %c15_i32_117 = arith.constant 15 : i32
    %402 = tpu.dynamic_rotate %15 by %c15_i32_117 dim 2 : vector<1x16x16xf32>, i32 -> vector<1x16x16xf32>
    %c15_i32_118 = arith.constant 15 : i32
    %403 = tpu.dynamic_rotate %13 by %c15_i32_118 dim 2 : vector<1x16x16xf32>, i32 -> vector<1x16x16xf32>
    %c25 = arith.constant 25 : index
    %404 = memref.load %arg1[%c25] : memref<98xf32, #tpu.memory_space<smem>>
    %c74 = arith.constant 74 : index
    %405 = memref.load %arg1[%c74] : memref<98xf32, #tpu.memory_space<smem>>
    %406 = vector.broadcast %404 : f32 to vector<1x16x16xf32>
    %407 = arith.mulf %406, %402 : vector<1x16x16xf32>
    %408 = vector.broadcast %405 : f32 to vector<1x16x16xf32>
    %409 = arith.mulf %408, %403 : vector<1x16x16xf32>
    %410 = arith.addf %407, %409 : vector<1x16x16xf32>
    %cst_119 = arith.constant 0.000000e+00 : f32
    %411 = vector.broadcast %cst_119 : f32 to vector<1x16x16xf32>
    %412 = arith.select %53, %410, %411 : vector<1x16x16xi1>, vector<1x16x16xf32>
    %413 = arith.addf %401, %412 : vector<1x16x16xf32>
    %c14_i32_120 = arith.constant 14 : i32
    %414 = tpu.dynamic_rotate %15 by %c14_i32_120 dim 2 : vector<1x16x16xf32>, i32 -> vector<1x16x16xf32>
    %c14_i32_121 = arith.constant 14 : i32
    %415 = tpu.dynamic_rotate %13 by %c14_i32_121 dim 2 : vector<1x16x16xf32>, i32 -> vector<1x16x16xf32>
    %c26 = arith.constant 26 : index
    %416 = memref.load %arg1[%c26] : memref<98xf32, #tpu.memory_space<smem>>
    %c75 = arith.constant 75 : index
    %417 = memref.load %arg1[%c75] : memref<98xf32, #tpu.memory_space<smem>>
    %418 = vector.broadcast %416 : f32 to vector<1x16x16xf32>
    %419 = arith.mulf %418, %414 : vector<1x16x16xf32>
    %420 = vector.broadcast %417 : f32 to vector<1x16x16xf32>
    %421 = arith.mulf %420, %415 : vector<1x16x16xf32>
    %422 = arith.addf %419, %421 : vector<1x16x16xf32>
    %cst_122 = arith.constant 0.000000e+00 : f32
    %423 = vector.broadcast %cst_122 : f32 to vector<1x16x16xf32>
    %424 = arith.select %62, %422, %423 : vector<1x16x16xi1>, vector<1x16x16xf32>
    %425 = arith.addf %413, %424 : vector<1x16x16xf32>
    %c13_i32_123 = arith.constant 13 : i32
    %426 = tpu.dynamic_rotate %15 by %c13_i32_123 dim 2 : vector<1x16x16xf32>, i32 -> vector<1x16x16xf32>
    %c13_i32_124 = arith.constant 13 : i32
    %427 = tpu.dynamic_rotate %13 by %c13_i32_124 dim 2 : vector<1x16x16xf32>, i32 -> vector<1x16x16xf32>
    %c27 = arith.constant 27 : index
    %428 = memref.load %arg1[%c27] : memref<98xf32, #tpu.memory_space<smem>>
    %c76 = arith.constant 76 : index
    %429 = memref.load %arg1[%c76] : memref<98xf32, #tpu.memory_space<smem>>
    %430 = vector.broadcast %428 : f32 to vector<1x16x16xf32>
    %431 = arith.mulf %430, %426 : vector<1x16x16xf32>
    %432 = vector.broadcast %429 : f32 to vector<1x16x16xf32>
    %433 = arith.mulf %432, %427 : vector<1x16x16xf32>
    %434 = arith.addf %431, %433 : vector<1x16x16xf32>
    %cst_125 = arith.constant 0.000000e+00 : f32
    %435 = vector.broadcast %cst_125 : f32 to vector<1x16x16xf32>
    %436 = arith.select %71, %434, %435 : vector<1x16x16xi1>, vector<1x16x16xf32>
    %437 = arith.addf %425, %436 : vector<1x16x16xf32>
    %c15_i32_126 = arith.constant 15 : i32
    %438 = tpu.dynamic_rotate %15 by %c15_i32_126 dim 1 : vector<1x16x16xf32>, i32 -> vector<1x16x16xf32>
    %c15_i32_127 = arith.constant 15 : i32
    %439 = tpu.dynamic_rotate %13 by %c15_i32_127 dim 1 : vector<1x16x16xf32>, i32 -> vector<1x16x16xf32>
    %c1_i32_128 = arith.constant 1 : i32
    %440 = vector.broadcast %c1_i32_128 : i32 to vector<1x16x16xi32>
    %441 = arith.addi %16, %440 : vector<1x16x16xi32>
    %c0_i32_129 = arith.constant 0 : i32
    %442 = vector.broadcast %c0_i32_129 : i32 to vector<1x16x16xi32>
    %443 = arith.cmpi sge, %441, %442 : vector<1x16x16xi32>
    %c1_i32_130 = arith.constant 1 : i32
    %444 = vector.broadcast %c1_i32_130 : i32 to vector<1x16x16xi32>
    %445 = arith.addi %16, %444 : vector<1x16x16xi32>
    %c16_i32_131 = arith.constant 16 : i32
    %446 = vector.broadcast %c16_i32_131 : i32 to vector<1x16x16xi32>
    %447 = arith.cmpi slt, %445, %446 : vector<1x16x16xi32>
    %448 = arith.andi %443, %447 : vector<1x16x16xi1>
    %cst_132 = arith.constant 0.000000e+00 : f32
    %449 = vector.broadcast %cst_132 : f32 to vector<1x16x16xf32>
    %450 = arith.select %448, %438, %449 : vector<1x16x16xi1>, vector<1x16x16xf32>
    %cst_133 = arith.constant 0.000000e+00 : f32
    %451 = vector.broadcast %cst_133 : f32 to vector<1x16x16xf32>
    %452 = arith.select %448, %439, %451 : vector<1x16x16xi1>, vector<1x16x16xf32>
    %c3_i32_134 = arith.constant 3 : i32
    %453 = tpu.dynamic_rotate %450 by %c3_i32_134 dim 2 : vector<1x16x16xf32>, i32 -> vector<1x16x16xf32>
    %c3_i32_135 = arith.constant 3 : i32
    %454 = tpu.dynamic_rotate %452 by %c3_i32_135 dim 2 : vector<1x16x16xf32>, i32 -> vector<1x16x16xf32>
    %c28 = arith.constant 28 : index
    %455 = memref.load %arg1[%c28] : memref<98xf32, #tpu.memory_space<smem>>
    %c77 = arith.constant 77 : index
    %456 = memref.load %arg1[%c77] : memref<98xf32, #tpu.memory_space<smem>>
    %457 = vector.broadcast %455 : f32 to vector<1x16x16xf32>
    %458 = arith.mulf %457, %453 : vector<1x16x16xf32>
    %459 = vector.broadcast %456 : f32 to vector<1x16x16xf32>
    %460 = arith.mulf %459, %454 : vector<1x16x16xf32>
    %461 = arith.addf %458, %460 : vector<1x16x16xf32>
    %cst_136 = arith.constant 0.000000e+00 : f32
    %462 = vector.broadcast %cst_136 : f32 to vector<1x16x16xf32>
    %463 = arith.select %26, %461, %462 : vector<1x16x16xi1>, vector<1x16x16xf32>
    %464 = arith.addf %437, %463 : vector<1x16x16xf32>
    %c2_i32_137 = arith.constant 2 : i32
    %465 = tpu.dynamic_rotate %450 by %c2_i32_137 dim 2 : vector<1x16x16xf32>, i32 -> vector<1x16x16xf32>
    %c2_i32_138 = arith.constant 2 : i32
    %466 = tpu.dynamic_rotate %452 by %c2_i32_138 dim 2 : vector<1x16x16xf32>, i32 -> vector<1x16x16xf32>
    %c29 = arith.constant 29 : index
    %467 = memref.load %arg1[%c29] : memref<98xf32, #tpu.memory_space<smem>>
    %c78 = arith.constant 78 : index
    %468 = memref.load %arg1[%c78] : memref<98xf32, #tpu.memory_space<smem>>
    %469 = vector.broadcast %467 : f32 to vector<1x16x16xf32>
    %470 = arith.mulf %469, %465 : vector<1x16x16xf32>
    %471 = vector.broadcast %468 : f32 to vector<1x16x16xf32>
    %472 = arith.mulf %471, %466 : vector<1x16x16xf32>
    %473 = arith.addf %470, %472 : vector<1x16x16xf32>
    %cst_139 = arith.constant 0.000000e+00 : f32
    %474 = vector.broadcast %cst_139 : f32 to vector<1x16x16xf32>
    %475 = arith.select %35, %473, %474 : vector<1x16x16xi1>, vector<1x16x16xf32>
    %476 = arith.addf %464, %475 : vector<1x16x16xf32>
    %c1_i32_140 = arith.constant 1 : i32
    %477 = tpu.dynamic_rotate %450 by %c1_i32_140 dim 2 : vector<1x16x16xf32>, i32 -> vector<1x16x16xf32>
    %c1_i32_141 = arith.constant 1 : i32
    %478 = tpu.dynamic_rotate %452 by %c1_i32_141 dim 2 : vector<1x16x16xf32>, i32 -> vector<1x16x16xf32>
    %c30 = arith.constant 30 : index
    %479 = memref.load %arg1[%c30] : memref<98xf32, #tpu.memory_space<smem>>
    %c79 = arith.constant 79 : index
    %480 = memref.load %arg1[%c79] : memref<98xf32, #tpu.memory_space<smem>>
    %481 = vector.broadcast %479 : f32 to vector<1x16x16xf32>
    %482 = arith.mulf %481, %477 : vector<1x16x16xf32>
    %483 = vector.broadcast %480 : f32 to vector<1x16x16xf32>
    %484 = arith.mulf %483, %478 : vector<1x16x16xf32>
    %485 = arith.addf %482, %484 : vector<1x16x16xf32>
    %cst_142 = arith.constant 0.000000e+00 : f32
    %486 = vector.broadcast %cst_142 : f32 to vector<1x16x16xf32>
    %487 = arith.select %44, %485, %486 : vector<1x16x16xi1>, vector<1x16x16xf32>
    %488 = arith.addf %476, %487 : vector<1x16x16xf32>
    %c31 = arith.constant 31 : index
    %489 = memref.load %arg1[%c31] : memref<98xf32, #tpu.memory_space<smem>>
    %c80 = arith.constant 80 : index
    %490 = memref.load %arg1[%c80] : memref<98xf32, #tpu.memory_space<smem>>
    %491 = vector.broadcast %489 : f32 to vector<1x16x16xf32>
    %492 = arith.mulf %491, %450 : vector<1x16x16xf32>
    %493 = vector.broadcast %490 : f32 to vector<1x16x16xf32>
    %494 = arith.mulf %493, %452 : vector<1x16x16xf32>
    %495 = arith.addf %492, %494 : vector<1x16x16xf32>
    %496 = arith.addf %488, %495 : vector<1x16x16xf32>
    %c15_i32_143 = arith.constant 15 : i32
    %497 = tpu.dynamic_rotate %450 by %c15_i32_143 dim 2 : vector<1x16x16xf32>, i32 -> vector<1x16x16xf32>
    %c15_i32_144 = arith.constant 15 : i32
    %498 = tpu.dynamic_rotate %452 by %c15_i32_144 dim 2 : vector<1x16x16xf32>, i32 -> vector<1x16x16xf32>
    %c32 = arith.constant 32 : index
    %499 = memref.load %arg1[%c32] : memref<98xf32, #tpu.memory_space<smem>>
    %c81 = arith.constant 81 : index
    %500 = memref.load %arg1[%c81] : memref<98xf32, #tpu.memory_space<smem>>
    %501 = vector.broadcast %499 : f32 to vector<1x16x16xf32>
    %502 = arith.mulf %501, %497 : vector<1x16x16xf32>
    %503 = vector.broadcast %500 : f32 to vector<1x16x16xf32>
    %504 = arith.mulf %503, %498 : vector<1x16x16xf32>
    %505 = arith.addf %502, %504 : vector<1x16x16xf32>
    %cst_145 = arith.constant 0.000000e+00 : f32
    %506 = vector.broadcast %cst_145 : f32 to vector<1x16x16xf32>
    %507 = arith.select %53, %505, %506 : vector<1x16x16xi1>, vector<1x16x16xf32>
    %508 = arith.addf %496, %507 : vector<1x16x16xf32>
    %c14_i32_146 = arith.constant 14 : i32
    %509 = tpu.dynamic_rotate %450 by %c14_i32_146 dim 2 : vector<1x16x16xf32>, i32 -> vector<1x16x16xf32>
    %c14_i32_147 = arith.constant 14 : i32
    %510 = tpu.dynamic_rotate %452 by %c14_i32_147 dim 2 : vector<1x16x16xf32>, i32 -> vector<1x16x16xf32>
    %c33 = arith.constant 33 : index
    %511 = memref.load %arg1[%c33] : memref<98xf32, #tpu.memory_space<smem>>
    %c82 = arith.constant 82 : index
    %512 = memref.load %arg1[%c82] : memref<98xf32, #tpu.memory_space<smem>>
    %513 = vector.broadcast %511 : f32 to vector<1x16x16xf32>
    %514 = arith.mulf %513, %509 : vector<1x16x16xf32>
    %515 = vector.broadcast %512 : f32 to vector<1x16x16xf32>
    %516 = arith.mulf %515, %510 : vector<1x16x16xf32>
    %517 = arith.addf %514, %516 : vector<1x16x16xf32>
    %cst_148 = arith.constant 0.000000e+00 : f32
    %518 = vector.broadcast %cst_148 : f32 to vector<1x16x16xf32>
    %519 = arith.select %62, %517, %518 : vector<1x16x16xi1>, vector<1x16x16xf32>
    %520 = arith.addf %508, %519 : vector<1x16x16xf32>
    %c13_i32_149 = arith.constant 13 : i32
    %521 = tpu.dynamic_rotate %450 by %c13_i32_149 dim 2 : vector<1x16x16xf32>, i32 -> vector<1x16x16xf32>
    %c13_i32_150 = arith.constant 13 : i32
    %522 = tpu.dynamic_rotate %452 by %c13_i32_150 dim 2 : vector<1x16x16xf32>, i32 -> vector<1x16x16xf32>
    %c34 = arith.constant 34 : index
    %523 = memref.load %arg1[%c34] : memref<98xf32, #tpu.memory_space<smem>>
    %c83 = arith.constant 83 : index
    %524 = memref.load %arg1[%c83] : memref<98xf32, #tpu.memory_space<smem>>
    %525 = vector.broadcast %523 : f32 to vector<1x16x16xf32>
    %526 = arith.mulf %525, %521 : vector<1x16x16xf32>
    %527 = vector.broadcast %524 : f32 to vector<1x16x16xf32>
    %528 = arith.mulf %527, %522 : vector<1x16x16xf32>
    %529 = arith.addf %526, %528 : vector<1x16x16xf32>
    %cst_151 = arith.constant 0.000000e+00 : f32
    %530 = vector.broadcast %cst_151 : f32 to vector<1x16x16xf32>
    %531 = arith.select %71, %529, %530 : vector<1x16x16xi1>, vector<1x16x16xf32>
    %532 = arith.addf %520, %531 : vector<1x16x16xf32>
    %c14_i32_152 = arith.constant 14 : i32
    %533 = tpu.dynamic_rotate %15 by %c14_i32_152 dim 1 : vector<1x16x16xf32>, i32 -> vector<1x16x16xf32>
    %c14_i32_153 = arith.constant 14 : i32
    %534 = tpu.dynamic_rotate %13 by %c14_i32_153 dim 1 : vector<1x16x16xf32>, i32 -> vector<1x16x16xf32>
    %c2_i32_154 = arith.constant 2 : i32
    %535 = vector.broadcast %c2_i32_154 : i32 to vector<1x16x16xi32>
    %536 = arith.addi %16, %535 : vector<1x16x16xi32>
    %c0_i32_155 = arith.constant 0 : i32
    %537 = vector.broadcast %c0_i32_155 : i32 to vector<1x16x16xi32>
    %538 = arith.cmpi sge, %536, %537 : vector<1x16x16xi32>
    %c2_i32_156 = arith.constant 2 : i32
    %539 = vector.broadcast %c2_i32_156 : i32 to vector<1x16x16xi32>
    %540 = arith.addi %16, %539 : vector<1x16x16xi32>
    %c16_i32_157 = arith.constant 16 : i32
    %541 = vector.broadcast %c16_i32_157 : i32 to vector<1x16x16xi32>
    %542 = arith.cmpi slt, %540, %541 : vector<1x16x16xi32>
    %543 = arith.andi %538, %542 : vector<1x16x16xi1>
    %cst_158 = arith.constant 0.000000e+00 : f32
    %544 = vector.broadcast %cst_158 : f32 to vector<1x16x16xf32>
    %545 = arith.select %543, %533, %544 : vector<1x16x16xi1>, vector<1x16x16xf32>
    %cst_159 = arith.constant 0.000000e+00 : f32
    %546 = vector.broadcast %cst_159 : f32 to vector<1x16x16xf32>
    %547 = arith.select %543, %534, %546 : vector<1x16x16xi1>, vector<1x16x16xf32>
    %c3_i32_160 = arith.constant 3 : i32
    %548 = tpu.dynamic_rotate %545 by %c3_i32_160 dim 2 : vector<1x16x16xf32>, i32 -> vector<1x16x16xf32>
    %c3_i32_161 = arith.constant 3 : i32
    %549 = tpu.dynamic_rotate %547 by %c3_i32_161 dim 2 : vector<1x16x16xf32>, i32 -> vector<1x16x16xf32>
    %c35 = arith.constant 35 : index
    %550 = memref.load %arg1[%c35] : memref<98xf32, #tpu.memory_space<smem>>
    %c84 = arith.constant 84 : index
    %551 = memref.load %arg1[%c84] : memref<98xf32, #tpu.memory_space<smem>>
    %552 = vector.broadcast %550 : f32 to vector<1x16x16xf32>
    %553 = arith.mulf %552, %548 : vector<1x16x16xf32>
    %554 = vector.broadcast %551 : f32 to vector<1x16x16xf32>
    %555 = arith.mulf %554, %549 : vector<1x16x16xf32>
    %556 = arith.addf %553, %555 : vector<1x16x16xf32>
    %cst_162 = arith.constant 0.000000e+00 : f32
    %557 = vector.broadcast %cst_162 : f32 to vector<1x16x16xf32>
    %558 = arith.select %26, %556, %557 : vector<1x16x16xi1>, vector<1x16x16xf32>
    %559 = arith.addf %532, %558 : vector<1x16x16xf32>
    %c2_i32_163 = arith.constant 2 : i32
    %560 = tpu.dynamic_rotate %545 by %c2_i32_163 dim 2 : vector<1x16x16xf32>, i32 -> vector<1x16x16xf32>
    %c2_i32_164 = arith.constant 2 : i32
    %561 = tpu.dynamic_rotate %547 by %c2_i32_164 dim 2 : vector<1x16x16xf32>, i32 -> vector<1x16x16xf32>
    %c36 = arith.constant 36 : index
    %562 = memref.load %arg1[%c36] : memref<98xf32, #tpu.memory_space<smem>>
    %c85 = arith.constant 85 : index
    %563 = memref.load %arg1[%c85] : memref<98xf32, #tpu.memory_space<smem>>
    %564 = vector.broadcast %562 : f32 to vector<1x16x16xf32>
    %565 = arith.mulf %564, %560 : vector<1x16x16xf32>
    %566 = vector.broadcast %563 : f32 to vector<1x16x16xf32>
    %567 = arith.mulf %566, %561 : vector<1x16x16xf32>
    %568 = arith.addf %565, %567 : vector<1x16x16xf32>
    %cst_165 = arith.constant 0.000000e+00 : f32
    %569 = vector.broadcast %cst_165 : f32 to vector<1x16x16xf32>
    %570 = arith.select %35, %568, %569 : vector<1x16x16xi1>, vector<1x16x16xf32>
    %571 = arith.addf %559, %570 : vector<1x16x16xf32>
    %c1_i32_166 = arith.constant 1 : i32
    %572 = tpu.dynamic_rotate %545 by %c1_i32_166 dim 2 : vector<1x16x16xf32>, i32 -> vector<1x16x16xf32>
    %c1_i32_167 = arith.constant 1 : i32
    %573 = tpu.dynamic_rotate %547 by %c1_i32_167 dim 2 : vector<1x16x16xf32>, i32 -> vector<1x16x16xf32>
    %c37 = arith.constant 37 : index
    %574 = memref.load %arg1[%c37] : memref<98xf32, #tpu.memory_space<smem>>
    %c86 = arith.constant 86 : index
    %575 = memref.load %arg1[%c86] : memref<98xf32, #tpu.memory_space<smem>>
    %576 = vector.broadcast %574 : f32 to vector<1x16x16xf32>
    %577 = arith.mulf %576, %572 : vector<1x16x16xf32>
    %578 = vector.broadcast %575 : f32 to vector<1x16x16xf32>
    %579 = arith.mulf %578, %573 : vector<1x16x16xf32>
    %580 = arith.addf %577, %579 : vector<1x16x16xf32>
    %cst_168 = arith.constant 0.000000e+00 : f32
    %581 = vector.broadcast %cst_168 : f32 to vector<1x16x16xf32>
    %582 = arith.select %44, %580, %581 : vector<1x16x16xi1>, vector<1x16x16xf32>
    %583 = arith.addf %571, %582 : vector<1x16x16xf32>
    %c38 = arith.constant 38 : index
    %584 = memref.load %arg1[%c38] : memref<98xf32, #tpu.memory_space<smem>>
    %c87 = arith.constant 87 : index
    %585 = memref.load %arg1[%c87] : memref<98xf32, #tpu.memory_space<smem>>
    %586 = vector.broadcast %584 : f32 to vector<1x16x16xf32>
    %587 = arith.mulf %586, %545 : vector<1x16x16xf32>
    %588 = vector.broadcast %585 : f32 to vector<1x16x16xf32>
    %589 = arith.mulf %588, %547 : vector<1x16x16xf32>
    %590 = arith.addf %587, %589 : vector<1x16x16xf32>
    %591 = arith.addf %583, %590 : vector<1x16x16xf32>
    %c15_i32_169 = arith.constant 15 : i32
    %592 = tpu.dynamic_rotate %545 by %c15_i32_169 dim 2 : vector<1x16x16xf32>, i32 -> vector<1x16x16xf32>
    %c15_i32_170 = arith.constant 15 : i32
    %593 = tpu.dynamic_rotate %547 by %c15_i32_170 dim 2 : vector<1x16x16xf32>, i32 -> vector<1x16x16xf32>
    %c39 = arith.constant 39 : index
    %594 = memref.load %arg1[%c39] : memref<98xf32, #tpu.memory_space<smem>>
    %c88 = arith.constant 88 : index
    %595 = memref.load %arg1[%c88] : memref<98xf32, #tpu.memory_space<smem>>
    %596 = vector.broadcast %594 : f32 to vector<1x16x16xf32>
    %597 = arith.mulf %596, %592 : vector<1x16x16xf32>
    %598 = vector.broadcast %595 : f32 to vector<1x16x16xf32>
    %599 = arith.mulf %598, %593 : vector<1x16x16xf32>
    %600 = arith.addf %597, %599 : vector<1x16x16xf32>
    %cst_171 = arith.constant 0.000000e+00 : f32
    %601 = vector.broadcast %cst_171 : f32 to vector<1x16x16xf32>
    %602 = arith.select %53, %600, %601 : vector<1x16x16xi1>, vector<1x16x16xf32>
    %603 = arith.addf %591, %602 : vector<1x16x16xf32>
    %c14_i32_172 = arith.constant 14 : i32
    %604 = tpu.dynamic_rotate %545 by %c14_i32_172 dim 2 : vector<1x16x16xf32>, i32 -> vector<1x16x16xf32>
    %c14_i32_173 = arith.constant 14 : i32
    %605 = tpu.dynamic_rotate %547 by %c14_i32_173 dim 2 : vector<1x16x16xf32>, i32 -> vector<1x16x16xf32>
    %c40 = arith.constant 40 : index
    %606 = memref.load %arg1[%c40] : memref<98xf32, #tpu.memory_space<smem>>
    %c89 = arith.constant 89 : index
    %607 = memref.load %arg1[%c89] : memref<98xf32, #tpu.memory_space<smem>>
    %608 = vector.broadcast %606 : f32 to vector<1x16x16xf32>
    %609 = arith.mulf %608, %604 : vector<1x16x16xf32>
    %610 = vector.broadcast %607 : f32 to vector<1x16x16xf32>
    %611 = arith.mulf %610, %605 : vector<1x16x16xf32>
    %612 = arith.addf %609, %611 : vector<1x16x16xf32>
    %cst_174 = arith.constant 0.000000e+00 : f32
    %613 = vector.broadcast %cst_174 : f32 to vector<1x16x16xf32>
    %614 = arith.select %62, %612, %613 : vector<1x16x16xi1>, vector<1x16x16xf32>
    %615 = arith.addf %603, %614 : vector<1x16x16xf32>
    %c13_i32_175 = arith.constant 13 : i32
    %616 = tpu.dynamic_rotate %545 by %c13_i32_175 dim 2 : vector<1x16x16xf32>, i32 -> vector<1x16x16xf32>
    %c13_i32_176 = arith.constant 13 : i32
    %617 = tpu.dynamic_rotate %547 by %c13_i32_176 dim 2 : vector<1x16x16xf32>, i32 -> vector<1x16x16xf32>
    %c41 = arith.constant 41 : index
    %618 = memref.load %arg1[%c41] : memref<98xf32, #tpu.memory_space<smem>>
    %c90 = arith.constant 90 : index
    %619 = memref.load %arg1[%c90] : memref<98xf32, #tpu.memory_space<smem>>
    %620 = vector.broadcast %618 : f32 to vector<1x16x16xf32>
    %621 = arith.mulf %620, %616 : vector<1x16x16xf32>
    %622 = vector.broadcast %619 : f32 to vector<1x16x16xf32>
    %623 = arith.mulf %622, %617 : vector<1x16x16xf32>
    %624 = arith.addf %621, %623 : vector<1x16x16xf32>
    %cst_177 = arith.constant 0.000000e+00 : f32
    %625 = vector.broadcast %cst_177 : f32 to vector<1x16x16xf32>
    %626 = arith.select %71, %624, %625 : vector<1x16x16xi1>, vector<1x16x16xf32>
    %627 = arith.addf %615, %626 : vector<1x16x16xf32>
    %c13_i32_178 = arith.constant 13 : i32
    %628 = tpu.dynamic_rotate %15 by %c13_i32_178 dim 1 : vector<1x16x16xf32>, i32 -> vector<1x16x16xf32>
    %c13_i32_179 = arith.constant 13 : i32
    %629 = tpu.dynamic_rotate %13 by %c13_i32_179 dim 1 : vector<1x16x16xf32>, i32 -> vector<1x16x16xf32>
    %c3_i32_180 = arith.constant 3 : i32
    %630 = vector.broadcast %c3_i32_180 : i32 to vector<1x16x16xi32>
    %631 = arith.addi %16, %630 : vector<1x16x16xi32>
    %c0_i32_181 = arith.constant 0 : i32
    %632 = vector.broadcast %c0_i32_181 : i32 to vector<1x16x16xi32>
    %633 = arith.cmpi sge, %631, %632 : vector<1x16x16xi32>
    %c3_i32_182 = arith.constant 3 : i32
    %634 = vector.broadcast %c3_i32_182 : i32 to vector<1x16x16xi32>
    %635 = arith.addi %16, %634 : vector<1x16x16xi32>
    %c16_i32_183 = arith.constant 16 : i32
    %636 = vector.broadcast %c16_i32_183 : i32 to vector<1x16x16xi32>
    %637 = arith.cmpi slt, %635, %636 : vector<1x16x16xi32>
    %638 = arith.andi %633, %637 : vector<1x16x16xi1>
    %cst_184 = arith.constant 0.000000e+00 : f32
    %639 = vector.broadcast %cst_184 : f32 to vector<1x16x16xf32>
    %640 = arith.select %638, %628, %639 : vector<1x16x16xi1>, vector<1x16x16xf32>
    %cst_185 = arith.constant 0.000000e+00 : f32
    %641 = vector.broadcast %cst_185 : f32 to vector<1x16x16xf32>
    %642 = arith.select %638, %629, %641 : vector<1x16x16xi1>, vector<1x16x16xf32>
    %c3_i32_186 = arith.constant 3 : i32
    %643 = tpu.dynamic_rotate %640 by %c3_i32_186 dim 2 : vector<1x16x16xf32>, i32 -> vector<1x16x16xf32>
    %c3_i32_187 = arith.constant 3 : i32
    %644 = tpu.dynamic_rotate %642 by %c3_i32_187 dim 2 : vector<1x16x16xf32>, i32 -> vector<1x16x16xf32>
    %c42 = arith.constant 42 : index
    %645 = memref.load %arg1[%c42] : memref<98xf32, #tpu.memory_space<smem>>
    %c91 = arith.constant 91 : index
    %646 = memref.load %arg1[%c91] : memref<98xf32, #tpu.memory_space<smem>>
    %647 = vector.broadcast %645 : f32 to vector<1x16x16xf32>
    %648 = arith.mulf %647, %643 : vector<1x16x16xf32>
    %649 = vector.broadcast %646 : f32 to vector<1x16x16xf32>
    %650 = arith.mulf %649, %644 : vector<1x16x16xf32>
    %651 = arith.addf %648, %650 : vector<1x16x16xf32>
    %cst_188 = arith.constant 0.000000e+00 : f32
    %652 = vector.broadcast %cst_188 : f32 to vector<1x16x16xf32>
    %653 = arith.select %26, %651, %652 : vector<1x16x16xi1>, vector<1x16x16xf32>
    %654 = arith.addf %627, %653 : vector<1x16x16xf32>
    %c2_i32_189 = arith.constant 2 : i32
    %655 = tpu.dynamic_rotate %640 by %c2_i32_189 dim 2 : vector<1x16x16xf32>, i32 -> vector<1x16x16xf32>
    %c2_i32_190 = arith.constant 2 : i32
    %656 = tpu.dynamic_rotate %642 by %c2_i32_190 dim 2 : vector<1x16x16xf32>, i32 -> vector<1x16x16xf32>
    %c43 = arith.constant 43 : index
    %657 = memref.load %arg1[%c43] : memref<98xf32, #tpu.memory_space<smem>>
    %c92 = arith.constant 92 : index
    %658 = memref.load %arg1[%c92] : memref<98xf32, #tpu.memory_space<smem>>
    %659 = vector.broadcast %657 : f32 to vector<1x16x16xf32>
    %660 = arith.mulf %659, %655 : vector<1x16x16xf32>
    %661 = vector.broadcast %658 : f32 to vector<1x16x16xf32>
    %662 = arith.mulf %661, %656 : vector<1x16x16xf32>
    %663 = arith.addf %660, %662 : vector<1x16x16xf32>
    %cst_191 = arith.constant 0.000000e+00 : f32
    %664 = vector.broadcast %cst_191 : f32 to vector<1x16x16xf32>
    %665 = arith.select %35, %663, %664 : vector<1x16x16xi1>, vector<1x16x16xf32>
    %666 = arith.addf %654, %665 : vector<1x16x16xf32>
    %c1_i32_192 = arith.constant 1 : i32
    %667 = tpu.dynamic_rotate %640 by %c1_i32_192 dim 2 : vector<1x16x16xf32>, i32 -> vector<1x16x16xf32>
    %c1_i32_193 = arith.constant 1 : i32
    %668 = tpu.dynamic_rotate %642 by %c1_i32_193 dim 2 : vector<1x16x16xf32>, i32 -> vector<1x16x16xf32>
    %c44 = arith.constant 44 : index
    %669 = memref.load %arg1[%c44] : memref<98xf32, #tpu.memory_space<smem>>
    %c93 = arith.constant 93 : index
    %670 = memref.load %arg1[%c93] : memref<98xf32, #tpu.memory_space<smem>>
    %671 = vector.broadcast %669 : f32 to vector<1x16x16xf32>
    %672 = arith.mulf %671, %667 : vector<1x16x16xf32>
    %673 = vector.broadcast %670 : f32 to vector<1x16x16xf32>
    %674 = arith.mulf %673, %668 : vector<1x16x16xf32>
    %675 = arith.addf %672, %674 : vector<1x16x16xf32>
    %cst_194 = arith.constant 0.000000e+00 : f32
    %676 = vector.broadcast %cst_194 : f32 to vector<1x16x16xf32>
    %677 = arith.select %44, %675, %676 : vector<1x16x16xi1>, vector<1x16x16xf32>
    %678 = arith.addf %666, %677 : vector<1x16x16xf32>
    %c45 = arith.constant 45 : index
    %679 = memref.load %arg1[%c45] : memref<98xf32, #tpu.memory_space<smem>>
    %c94 = arith.constant 94 : index
    %680 = memref.load %arg1[%c94] : memref<98xf32, #tpu.memory_space<smem>>
    %681 = vector.broadcast %679 : f32 to vector<1x16x16xf32>
    %682 = arith.mulf %681, %640 : vector<1x16x16xf32>
    %683 = vector.broadcast %680 : f32 to vector<1x16x16xf32>
    %684 = arith.mulf %683, %642 : vector<1x16x16xf32>
    %685 = arith.addf %682, %684 : vector<1x16x16xf32>
    %686 = arith.addf %678, %685 : vector<1x16x16xf32>
    %c15_i32_195 = arith.constant 15 : i32
    %687 = tpu.dynamic_rotate %640 by %c15_i32_195 dim 2 : vector<1x16x16xf32>, i32 -> vector<1x16x16xf32>
    %c15_i32_196 = arith.constant 15 : i32
    %688 = tpu.dynamic_rotate %642 by %c15_i32_196 dim 2 : vector<1x16x16xf32>, i32 -> vector<1x16x16xf32>
    %c46 = arith.constant 46 : index
    %689 = memref.load %arg1[%c46] : memref<98xf32, #tpu.memory_space<smem>>
    %c95 = arith.constant 95 : index
    %690 = memref.load %arg1[%c95] : memref<98xf32, #tpu.memory_space<smem>>
    %691 = vector.broadcast %689 : f32 to vector<1x16x16xf32>
    %692 = arith.mulf %691, %687 : vector<1x16x16xf32>
    %693 = vector.broadcast %690 : f32 to vector<1x16x16xf32>
    %694 = arith.mulf %693, %688 : vector<1x16x16xf32>
    %695 = arith.addf %692, %694 : vector<1x16x16xf32>
    %cst_197 = arith.constant 0.000000e+00 : f32
    %696 = vector.broadcast %cst_197 : f32 to vector<1x16x16xf32>
    %697 = arith.select %53, %695, %696 : vector<1x16x16xi1>, vector<1x16x16xf32>
    %698 = arith.addf %686, %697 : vector<1x16x16xf32>
    %c14_i32_198 = arith.constant 14 : i32
    %699 = tpu.dynamic_rotate %640 by %c14_i32_198 dim 2 : vector<1x16x16xf32>, i32 -> vector<1x16x16xf32>
    %c14_i32_199 = arith.constant 14 : i32
    %700 = tpu.dynamic_rotate %642 by %c14_i32_199 dim 2 : vector<1x16x16xf32>, i32 -> vector<1x16x16xf32>
    %c47 = arith.constant 47 : index
    %701 = memref.load %arg1[%c47] : memref<98xf32, #tpu.memory_space<smem>>
    %c96 = arith.constant 96 : index
    %702 = memref.load %arg1[%c96] : memref<98xf32, #tpu.memory_space<smem>>
    %703 = vector.broadcast %701 : f32 to vector<1x16x16xf32>
    %704 = arith.mulf %703, %699 : vector<1x16x16xf32>
    %705 = vector.broadcast %702 : f32 to vector<1x16x16xf32>
    %706 = arith.mulf %705, %700 : vector<1x16x16xf32>
    %707 = arith.addf %704, %706 : vector<1x16x16xf32>
    %cst_200 = arith.constant 0.000000e+00 : f32
    %708 = vector.broadcast %cst_200 : f32 to vector<1x16x16xf32>
    %709 = arith.select %62, %707, %708 : vector<1x16x16xi1>, vector<1x16x16xf32>
    %710 = arith.addf %698, %709 : vector<1x16x16xf32>
    %c13_i32_201 = arith.constant 13 : i32
    %711 = tpu.dynamic_rotate %640 by %c13_i32_201 dim 2 : vector<1x16x16xf32>, i32 -> vector<1x16x16xf32>
    %c13_i32_202 = arith.constant 13 : i32
    %712 = tpu.dynamic_rotate %642 by %c13_i32_202 dim 2 : vector<1x16x16xf32>, i32 -> vector<1x16x16xf32>
    %c48 = arith.constant 48 : index
    %713 = memref.load %arg1[%c48] : memref<98xf32, #tpu.memory_space<smem>>
    %c97 = arith.constant 97 : index
    %714 = memref.load %arg1[%c97] : memref<98xf32, #tpu.memory_space<smem>>
    %715 = vector.broadcast %713 : f32 to vector<1x16x16xf32>
    %716 = arith.mulf %715, %711 : vector<1x16x16xf32>
    %717 = vector.broadcast %714 : f32 to vector<1x16x16xf32>
    %718 = arith.mulf %717, %712 : vector<1x16x16xf32>
    %719 = arith.addf %716, %718 : vector<1x16x16xf32>
    %cst_203 = arith.constant 0.000000e+00 : f32
    %720 = vector.broadcast %cst_203 : f32 to vector<1x16x16xf32>
    %721 = arith.select %71, %719, %720 : vector<1x16x16xi1>, vector<1x16x16xf32>
    %722 = arith.addf %710, %721 : vector<1x16x16xf32>
    %cst_204 = arith.constant 0.000000e+00 : f32
    %723 = vector.broadcast %cst_204 : f32 to vector<1x16x16xf32>
    %724 = arith.subf %723, %722 : vector<1x16x16xf32>
    %725 = math.exp %724 : vector<1x16x16xf32>
    %cst_205 = arith.constant 1.000000e+00 : f32
    %726 = vector.broadcast %cst_205 : f32 to vector<1x16x16xf32>
    %727 = arith.addf %726, %725 : vector<1x16x16xf32>
    %cst_206 = arith.constant 1.000000e+00 : f32
    %728 = vector.broadcast %cst_206 : f32 to vector<1x16x16xf32>
    %729 = arith.divf %728, %727 : vector<1x16x16xf32>
    %c0_207 = arith.constant 0 : index
    %c0_208 = arith.constant 0 : index
    %c0_209 = arith.constant 0 : index
    %730 = vector.load %arg3[%c0_207, %c0_208, %c0_209] : memref<1x16x16xf32, #tpu.memory_space<vmem>>, vector<1x16x16xf32>
    tpu.vector_store %arg3[%c0_207, %c0_208, %c0_209], %729 {strides = array<i32>} : memref<1x16x16xf32, #tpu.memory_space<vmem>>, vector<1x16x16xf32>,
    return
  }
  func.func @transform_0(%arg0: i32) -> i32 {
    %c0_i32 = arith.constant 0 : i32
    %c0_i32_0 = arith.constant 0 : i32
    return %c0_i32 : i32
  }
  func.func @transform_1(%arg0: i32) -> (i32, i32, i32, i32) {
    %c0_i32 = arith.constant 0 : i32
    %c0_i32_0 = arith.constant 0 : i32
    %c0_i32_1 = arith.constant 0 : i32
    %c0_i32_2 = arith.constant 0 : i32
    return %arg0, %c0_i32, %c0_i32_0, %c0_i32_1 : i32, i32, i32, i32
  }
  func.func @transform_2(%arg0: i32) -> (i32, i32, i32) {
    %c0_i32 = arith.constant 0 : i32
    %c0_i32_0 = arith.constant 0 : i32
    %c0_i32_1 = arith.constant 0 : i32
    return %arg0, %c0_i32, %c0_i32_0 : i32, i32, i32
  }
}

</mosaic_0001>

<bundles_post_ra>
// kernel: tpu_custom_call.1
= control target key start
LH: loop header
LB: loop body
LE: loop exit
PB: predicated region body
PF: predicated region fallthrough
CT: control target
= control target key end

     0   :  { %s3612_s0 = inlined_call_operand.hbm [shape: f32[98], index: 0, kind: input, shape index: {}]   ;;  %s3613_s1 = inlined_call_operand.hbm [shape: f32[2,4,16,16], index: 1, kind: input, shape index: {}]   ;;  %s3614_s2 = inlined_call_operand.hbm [shape: f32[2,16,16], index: 2, kind: output, shape index: {}]  }
   0x1   :  { %3695 = sst [smem:[#allocation42_spill]] %s3612_s0 }
   0x2   :  { %3696 = sst [smem:[#allocation43_spill]] %s3613_s1 }
   0x3   :  { %3697 = sst [smem:[#allocation44_spill]] %s3614_s2 }
   0x4   :  { %7 = vsyncpa [#allocation5], 0 }
   0x5   :  { %8 = vsyncpa [#allocation3], 0 }
   0x6   :  { %10 = vsyncpa [#allocation3 + $0x1], 0 }
   0x7   :  { %11 = vsyncpa [#allocation4], 0 }
   0x8   :  { %13 = vsyncpa [#allocation4 + $0x1], 0  ;;  %s1980_s9 = smov 0   ;;  %s1982_s10 = smov 0  }
   0x9   :  { %s1984_s11 = smov 0   ;;  %s1986_s12 = smov 0  }
   0xa LB: > { %3698 = sst [smem:[#allocation11_spill]] %s1937_s9  ;;  %s2001_s13 = sadd.s32 4294967295, %s1949_s12   ;;  %s1949_s12 = sphi %s1986_s12, %s3823_s12   ;;  %s1945_s11 = sphi %s1984_s11, %s3826_s11   ;;  %s1941_s10 = sphi %s1982_s10, %s3825_s10   ;;  %s1937_s9 = sphi %s1980_s9, %s3824_s9  }
   0xb   : > { %3699 = sst [smem:[#allocation12_spill]] %s1941_s10  ;;  %s1645_s14 = sadd.s32 4294967294, %s1949_s12  }
   0xc   : > { %3700 = sst [smem:[#allocation13_spill]] %s1945_s11  ;;  %s2005_s15 = sadd.s32 1, %s1949_s12  }
   0xd   : > { %3701 = sst [smem:[#allocation14_spill]] %s1949_s12  ;;  %s47_s16 = sadd.s32 1, %s1945_s11 }
   0xe   : > { %3702 = sst [smem:[#allocation15_spill]] %s2001_s13  ;;  %s44_s17 = ssub.s32 %s1949_s12, %s2005_s15 }
   0xf   : > { %3703 = sst [smem:[#allocation16_spill]] %s2005_s15  ;;  %p54_p0 = scmp.ne.s32.totalorder %s1945_s11, %s1941_s10 }
  0x10   : > { %p45_p1 = scmp.eq.s32.totalorder %s44_s17, 0  ;;  %p55_p2 = scmp.eq.s32.totalorder %s1949_s12, 0 }
  0x11   : > { %p60_p3 = scmp.ne.s32.totalorder %s1941_s10, %s1937_s9  ;;  %p3615_p4 = scmp.eq.s32.totalorder %s2001_s13, 0 }
  0x12   : > { %s2017_s18 = scalar_select %p45_p1, %s1945_s11, %s47_s16  }
  0x13   : > { %p2019_p5 = por %p55_p2, %p54_p0  ;;  %p2025_p6 = por %p3615_p4, %p60_p3 }
  0x14   : > { %3704 = sst [smem:[#allocation17_spill]] %s2017_s18  ;;  %p84_p7 = scmp.eq.s32.totalorder %s2001_s13, 1 }
  0x15   : > { %s3706_s20 = scalar_select %p2025_p6, 1, 0 }
  0x16   : > { %p90_p8 = scmp.eq.s32.totalorder %s1645_s14, 1  ;;  %p1646_p9 = scmp.ge.s32.totalorder %s1949_s12, 1 }
  0x17   : > { %p97_p10 = scmp.lt.s32.totalorder %s1949_s12, 3  ;;  %p2032_p11 = por %p84_p7, %p54_p0 }
  0x18   : > { %p2036_p12 = por %p90_p8, %p60_p3  ;;  %p1787_p4 = scmp.lt.s32.totalorder %s1949_s12, 2 }
  0x19   : > { %s3707_s21 = scalar_select %p2032_p11, 1, 0 }
  0x1a   : > { %s3709_s22 = scalar_select %p2036_p12, 1, 0 }
  0x1b   : > { %3708 = sst [smem:[#allocation18_spill]] %s3707_s21  ;;  %p2040_p13 = pnand %p1646_p9, %p97_p10 }
  0x1c   : > { %3710 = sst [smem:[#allocation19_spill]] %s3709_s22  ;;  %s119_s24 = sand.u32 1, %s1945_s11  }
  0x1d   : > { %s3711_s23 = scalar_select %p2040_p13, 1, 0 }
  0x1e   : > { %p1774_p2 = pneg %p2040_p13  ;;  %s1764_s25 = sshll.u32 %s1949_s12, 10 }
  0x1f   : > { %p3712_p6 = scmp.eq.s32.totalorder %s2001_s13, 0  ;;  %p2054_p7 = pnand %p1787_p4, %p2019_p5 }
  0x20   : > { %s1649_s27 = sshll.u32 %s119_s24, 6  ;;  %s1951_s28 = smov [#allocation2]  }
  0x21   : > { %p1775_p0 = pnand %p1774_p2, %p3712_p6  ;;  %s3714_s0 = sld [smem:[#allocation42_spill]] }
  0x22   : > { %s3715_s1 = sld [smem:[#allocation43_spill]]  ;;  %s123_s6 = scalar_lea.vmem [#allocation6], %s1649_s27 }
  0x23   : > { %s130_s7 = sshll.u32 %s123_s6, 4  ;;  %s2068_s8 = scalar_lea.sflag [#allocation3], %s119_s24  ;;  %s2066_s7 = int_to_ptr.vmem [resolvable:$true] %s130_s7 }
  0x24   : > { %p1855_p4 = pneg %p2054_p7 }
  0x27   : > { %1777 = dma.hbm_to_smem (!%p1775_p0), %s3714_s0, 16, %s1951_s28, [#allocation5]  }
  0x28   : > { %s2064_s5 = scalar_lea.hbm %s3715_s1, %s1764_s25  ;;  %s1858_s19 = scalar_lea.hbm %s3715_s1, 2048 }
  0x29   : > { %s1853_s14 = scalar_lea.hbm %s2064_s5, 1024  ;;  %p1859_p8 = scmp.lt.s32.totalorder %s2064_s5, %s3715_s1 }
  0x2a   : > { %p1854_p3 = scmp.ne.s32.totalorder %s2064_s5, %s1853_s14  ;;  %p1860_p9 = scmp.lt.s32.totalorder %s1858_s19, %s1853_s14 }
  0x2c   : > { %p1856_p5 = pnand %p1855_p4, %p1854_p3  ;;  %p1861_p10 = por %p1860_p9, %p1859_p8 }
  0x2e   : > { %p1857_p6 = pneg %p1856_p5 }
  0x30   : > { %p1862_p2 = pnand %p1861_p10, %p1857_p6 }
  0x32   : > { %1865 = shalt.err (!%p1862_p2)
}
  0x33   : > { %s1866_s24 = scalar_lea.vmem %s2066_s7, 1024  ;;  %s1952_s27 = smov [#allocation6]  }
  0x34   : > { %p1867_p0 = scmp.ne.s32.totalorder %s2066_s7, %s1866_s24  ;;  %s1871_s29 = sshll.u32 %s1952_s27, 4  ;;  %s1872_s29 = int_to_ptr.vmem [resolvable:$false] %s1871_s29 }
  0x35   : > { %s1873_s30 = scalar_lea.vmem %s1872_s29, 2048  ;;  %p1874_p5 = scmp.lt.s32.totalorder %s2066_s7, %s1872_s29 }
  0x36   : > { %p1869_p1 = pnand %p1867_p0, %p1855_p4  ;;  %p1875_p12 = scmp.lt.s32.totalorder %s1873_s30, %s1866_s24 }
  0x38   : > { %p1870_p3 = pneg %p1869_p1  ;;  %p1876_p11 = por %p1875_p12, %p1874_p5 }
  0x3a   : > { %p1877_p13 = pnand %p1876_p11, %p1870_p3 }
  0x3c   : > { %1880 = shalt.err (!%p1877_p13)
}
  0x3d   : > { %s1953_s3 = smov 128   ;;  %s1954_s4 = smov 8  }
  0x3e   : > { %1781 = dma.hbm_to_vmem [thread:$0]  (!%p2054_p7), %s2064_s5, 1024, %s2066_s7, %s2068_s8, %s1953_s3, %s1953_s3, %s1954_s4  }
  0x3f   : > { %p3716_p4 = scmp.ne.s32.totalorder %s3711_s23, 0 }
  0x41   : > { %142 = sbr.rel (%p3716_p4) target bundleno = 701 (0x2bd), region = 28 }
  0x46   : > { %p3717_p1 = scmp.eq.s32.totalorder %s2001_s13, 0 }
  0x48   : > { %1924 = dma.done.wait (%p3717_p1), [#allocation5], 16   ;;  %p3718_p6 = pmov %p3717_p1 }
  0x49   : > { %s2096_s6 = sand.u32 1, %s1941_s10   ;;  %p3720_p11 = scmp.ne.s32.totalorder %s3706_s20, 0 }
  0x4a   : > { %1926 = vsyncadd (%p3718_p6), [#allocation5], 4294967280  ;;  %3719 = sst [smem:[#allocation20_spill]] %s2096_s6  ;;  %s1654_s14 = sshll.u32 %s2096_s6, 6 }
  0x4b   : > { %s149_s16 = scalar_lea.sflag [#allocation3], %s2096_s6  ;;  %s152_s17 = scalar_lea.vmem [#allocation6], %s1654_s14 }
  0x4c   : > { %1928 = dma.done.wait (%p3720_p11), %s149_s16, 1024  }
  0x4d   : > { %1930 = vsyncadd (%p3720_p11), %s149_s16, 4294966272 }
  0x4e   : > { %157 = sfence }
  0x4f   : > { %v174_v0 = vld [vmem:[%s152_s17] sm:$0xff]  ;;  %v175_v1 = vld [vmem:[%s152_s17 + $0x8] sm:$0xff]  ;;  %v1656_v2 = vld [vmem:[%s152_s17 + $0x10] sm:$0xff]  ;;  %v3638_v3 = vlaneseq  ;;  %s1955_s20 = smov 16   ;;  %vm249_vm12 = vcmask 1047680   ;;  %s1704_s23 = sld [smem:[#allocation2 + $0x46]] }
  0x50   : > { %v1657_v4 = vld [vmem:[%s152_s17 + $0x18] sm:$0xff]  ;;  %v181_v5 = vmax.f32 %v174_v0, %v1656_v2  ;;  %v1658_v6 = vld [vmem:[%s152_s17 + $0x20] sm:$0xff]  ;;  %v1659_v7 = vld [vmem:[%s152_s17 + $0x28] sm:$0xff]  ;;  %v179_v8 = vadd.f32 %v1656_v2, %v174_v0  ;;  %s1703_s26 = sld [smem:[#allocation2 + $0x15]]  ;;  %s3629_s27 = smov 115  }
  0x51   : > { %v182_v9 = vmax.f32 %v175_v1, %v1657_v4  ;;  %v1660_v10 = vld [vmem:[%s152_s17 + $0x30] sm:$0xff]  ;;  %v2105_v11 = vshrl.u32 %v3638_v3, 7  ;;  %v180_v12 = vadd.f32 %v1657_v4, %v175_v1  ;;  %v1661_v14 = vld [vmem:[%s152_s17 + $0x38] sm:$0xff]  ;;  %s1705_s5 = sld [smem:[#allocation2 + $0x16]]  ;;  %s3627_s3 = smov 114  }
  0x52   : > { %v188_v13 = vmax.f32 %v181_v5, %v1658_v6  ;;  %v186_v15 = vadd.f32 %v1658_v6, %v179_v8  ;;  %s2380_s7 = sld [smem:[#allocation2 + $0x47]]  ;;  %s3625_s14 = smov 113  }
  0x53   : > { %v189_v16 = vmax.f32 %v182_v9, %v1659_v7  ;;  %v427_v17 = vadd.s32 4294967294, %v2105_v11  ;;  %v187_v19 = vadd.f32 %v1659_v7, %v180_v12  ;;  %vm230_vm0 = vcmp.lt.s32.totalorder %v2105_v11, 3  ;;  %s2386_s8 = sld [smem:[#allocation2 + $0x17]]  ;;  %s3734_s0 = smov 115  }
  0x54   : > { %v2108_v18 = vmax.f32 %v188_v13, %v1660_v10  ;;  %v193_v20 = vadd.f32 %v1660_v10, %v186_v15  ;;  %vm420_vm1 = vcmp.lt.s32.totalorder %v2105_v11, 2  ;;  %v237_v30 = vadd.s32 4294967293, %v2105_v11  ;;  %s2388_s19 = sld [smem:[#allocation2 + $0x48]]  ;;  %s3736_s15 = smov 114  }
  0x55   : > { %v2110_v21 = vmax.f32 %v189_v16, %v1661_v14  ;;  %v194_v24 = vadd.f32 %v1661_v14, %v187_v19  ;;  %vm429_vm2 = vcmp.ge.s32.totalorder %v427_v17, 0  ;;  %v616_v46 = vadd.s32 4294967295, %v2105_v11  ;;  %s2399_s25 = sld [smem:[#allocation2 + $0x19]]  ;;  %s3740_s2 = smov 113  }
  0x56   : > { %v233_v22 = vrot.slane %v2108_v18, 5  ;;  %v423_v23 = vrot.slane %v2108_v18, 6  ;;  %v2116_v25 = vmul.f32 0.25, %v193_v20  ;;  %vm239_vm3 = vcmp.ge.s32.totalorder %v237_v30, 0  ;;  %s2409_s28 = sld [smem:[#allocation2 + $0x4a]]  ;;  %s3741_s6 = smov 127  }
  0x57   : > { %v234_v26 = vrot.slane %v2110_v21, 5  ;;  %v424_v27 = vrot.slane %v2110_v21, 6  ;;  %v2120_v28 = vmul.f32 0.25, %v194_v24  ;;  %vm609_vm4 = vcmp.lt.s32.totalorder %v2105_v11, 1  ;;  %s2417_s24 = sld [smem:[#allocation2 + $0x1a]] }
  0x58   : > { %v228_v29 = vrot.slane %v2116_v25, 5  ;;  %v418_v39 = vrot.slane %v2116_v25, 6  ;;  %v607_v44 = vrot.slane %v2116_v25, 7  ;;  %vm618_vm5 = vcmp.ge.s32.totalorder %v616_v46, 0  ;;  %s2423_s29 = sld [smem:[#allocation2 + $0x4b]] }
  0x59   : > { %v2126_v31 = vsel %vm230_vm0, %v233_v22, %v234_v26  ;;  %v426_v32 = vsel %vm420_vm1, %v424_v27, %v423_v23  ;;  %v229_v34 = vrot.slane %v2120_v28, 5  ;;  %v2140_v35 = vsel %vm420_vm1, %v423_v23, %v424_v27  ;;  %s2431_s30 = sld [smem:[#allocation2 + $0x1b]] }
  0x5a   : > { %265 = vrot.lane.b32.xlu1 %v2126_v31, %s1955_s20  ;;  %v2133_v33 = vsel %vm429_vm2, %v426_v32, 0.0  ;;  %v236_v37 = vsel %vm230_vm0, %v234_v26, %v233_v22  ;;  %v419_v40 = vrot.slane %v2120_v28, 6  ;;  %v608_v45 = vrot.slane %v2120_v28, 7  ;;  %s2437_s4 = sld [smem:[#allocation2 + $0x4c]] }
  0x5b   : > { %451 = vrot.lane.b32.xlu0 %v2133_v33, %s1955_s20  ;;  %v2144_v36 = vsel %vm230_vm0, %v228_v29, %v229_v34  ;;  %v232_v38 = vsel %vm230_vm0, %v229_v34, %v228_v29  ;;  %v2156_v41 = vsel %vm239_vm3, %v236_v37, 0.0  ;;  %v612_v50 = vrot.slane %v2108_v18, 7  ;;  %s2455_s16 = sld [smem:[#allocation2 + $0x31]] }
  0x5c   : > { %v2158_v42 = vsel %vm239_vm3, %v232_v38, 0.0  ;;  %v422_v43 = vsel %vm420_vm1, %v419_v40, %v418_v39  ;;  %v2172_v47 = vsel %vm420_vm1, %v418_v39, %v419_v40  ;;  %v611_v49 = vsel %vm609_vm4, %v608_v45, %v607_v44  ;;  %s2461_s17 = sld [smem:[#allocation2 + $0x32]] }
  0x5d   : > { %v2175_v48 = vsel %vm429_vm2, %v422_v43, 0.0  ;;  %v613_v51 = vrot.slane %v2110_v21, 7  ;;  %v2183_v52 = vsel %vm609_vm4, %v607_v44, %v608_v45  ;;  %v2185_v53 = vsel %vm618_vm5, %v611_v49, 0.0  ;;  %s2546_s1 = sld [smem:[#allocation2 + $0x1e]] }
  0x5e   : > { %454 = vrot.lane.b32.xlu1 %v2140_v35, %s1955_s20  ;;  %v201_v57 = vadd.s32 8, %v2105_v11  ;;  %v964_v59 = vrot.slane %v2116_v25, 1  ;;  %v965_v60 = vrot.slane %v2120_v28, 1  ;;  %vm966_vm6 = vcmp.lt.s32.totalorder %v2105_v11, 7  ;;  %s2550_s18 = sld [smem:[#allocation2 + $0x6]] }
  0x5f   : > { %253 = vrot.lane.b32.xlu0 %v2144_v36, %s1955_s20  ;;  %v615_v54 = vsel %vm609_vm4, %v613_v51, %v612_v50  ;;  %v2191_v55 = vsel %vm609_vm4, %v612_v50, %v613_v51  ;;  %v969_v62 = vrot.slane %v2108_v18, 1  ;;  %v970_v63 = vrot.slane %v2110_v21, 1  ;;  %s2561_s11 = sld [smem:[#allocation2 + $0x7]] }
  0x60   : > { %v2193_v56 = vsel %vm618_vm5, %v615_v54, 0.0  ;;  %v974_v58 = vadd.s32 1, %v201_v57  ;;  %v968_v61 = vsel %vm966_vm6, %v965_v60, %v964_v59  ;;  %v2219_v1 = vsel %vm966_vm6, %v964_v59, %v965_v60  ;;  %s2564_s10 = sld [smem:[#allocation2 + $0x20]] }
  0x61   : > { %3721 = vst [vmem:[#allocation21_spill] sm:$0xff] %v2219_v1  ;;  %v972_v2 = vsel %vm966_vm6, %v970_v63, %v969_v62  ;;  %v1163_v4 = vadd.s32 2, %v201_v57  ;;  %v1153_v5 = vrot.slane %v2116_v25, 2  ;;  %v1154_v6 = vrot.slane %v2120_v28, 2  ;;  %s2573_s12 = sld [smem:[#allocation2 + $0x21]] }
  0x62   : > { %262 = vrot.lane.b32.xlu1 %v2156_v41, %s1955_s20  ;;  %vm978_vm7 = vcmp.lt.s32.totalorder %v974_v58, 16  ;;  %vm1155_vm8 = vcmp.lt.s32.totalorder %v2105_v11, 6  ;;  %v2234_v8 = vsel %vm966_vm6, %v969_v62, %v970_v63  ;;  %v1158_v10 = vrot.slane %v2108_v18, 2  ;;  %s2581_s22 = sld [smem:[#allocation2 + $0x22]] }
  0x63   : > { %250 = vrot.lane.b32.xlu0 %v2158_v42, %s1955_s20  ;;  %v2215_v0 = vsel %vm978_vm7, %v968_v61, 0.0  ;;  %v2229_v7 = vsel %vm978_vm7, %v972_v2, 0.0  ;;  %3722 = vst [vmem:[#allocation22_spill] sm:$0xff] %v2234_v8  ;;  %v1157_v9 = vsel %vm1155_vm8, %v1154_v6, %v1153_v5  ;;  %vm1167_vm9 = vcmp.lt.s32.totalorder %v1163_v4, 16  ;;  %3735 = sst [smem:[#allocation34_spill]] %s2546_s1 }
  0x64   : > { %v1159_v12 = vrot.slane %v2110_v21, 2  ;;  %v2244_v13 = vsel %vm1167_vm9, %v1157_v9, 0.0  ;;  %v2248_v14 = vsel %vm1155_vm8, %v1153_v5, %v1154_v6  ;;  %v1352_v16 = vadd.s32 3, %v201_v57  ;;  %s2587_s9 = sld [smem:[#allocation2 + $0x53]] }
  0x65   : > { %3723 = vst [vmem:[#allocation23_spill] sm:$0xff] %v2244_v13  ;;  %3724 = vst [vmem:[#allocation24_spill] sm:$0xff] %v2248_v14  ;;  %v1342_v17 = vrot.slane %v2116_v25, 3  ;;  %v1343_v19 = vrot.slane %v2120_v28, 3  ;;  %vm1344_vm10 = vcmp.lt.s32.totalorder %v2105_v11, 5  ;;  %v1347_v24 = vrot.slane %v2108_v18, 3 }
  0x66   : > { %442 = vrot.lane.b32.xlu1 %v2172_v47, %s1955_s20  ;;  %v1161_v15 = vsel %vm1155_vm8, %v1159_v12, %v1158_v10  ;;  %v2263_v22 = vsel %vm1155_vm8, %v1158_v10, %v1159_v12  ;;  %vm1356_vm11 = vcmp.lt.s32.totalorder %v1352_v16, 16  ;;  %v1348_v26 = vrot.slane %v2110_v21, 3  ;;  %s2604_s21 = sld [smem:[#allocation2 + $0x38]] }
  0x67   : > { %439 = vrot.lane.b32.xlu0 %v2175_v48, %s1955_s20  ;;  %v2258_v20 = vsel %vm1167_vm9, %v1161_v15, 0.0  ;;  %3726 = vst [vmem:[#allocation26_spill] sm:$0xff] %v2263_v22  ;;  %v1346_v23 = vsel %vm1344_vm10, %v1343_v19, %v1342_v17  ;;  %v2273_v29 = vsel %vm1344_vm10, %v1342_v17, %v1343_v19  ;;  %3737 = sst [smem:[#allocation35_spill]] %s2573_s12  ;;  %vm1543_vm9 = vcmask 130048  }
  0x68   : > { %3725 = vst [vmem:[#allocation25_spill] sm:$0xff] %v2258_v20  ;;  %v2271_v27 = vsel %vm1356_vm11, %v1346_v23, 0.0  ;;  %3728 = vst [vmem:[#allocation28_spill] sm:$0xff] %v2273_v29  ;;  %v1350_v30 = vsel %vm1344_vm10, %v1348_v26, %v1347_v24  ;;  %v2281_v32 = vsel %vm1344_vm10, %v1347_v24, %v1348_v26  ;;  %3738 = sst [smem:[#allocation36_spill]] %s2581_s22 }
  0x69   : > { %3727 = vst [vmem:[#allocation27_spill] sm:$0xff] %v2271_v27  ;;  %v2279_v11 = vsel %vm1356_vm11, %v1350_v30, 0.0  ;;  %3730 = vst [vmem:[#allocation30_spill] sm:$0xff] %v2281_v32  ;;  %s2615_s13 = sld [smem:[#allocation2 + $0x8]] }
  0x6a   : > { %631 = vrot.lane.b32.xlu1 %v2183_v52, %s1955_s20  ;;  %3729 = vst [vmem:[#allocation29_spill] sm:$0xff] %v2279_v11  ;;  %3739 = sst [smem:[#allocation37_spill]] %s2587_s9 }
  0x6b   : > { %628 = vrot.lane.b32.xlu0 %v2185_v53, %s1955_s20 }
  0x6e   : > { %643 = vrot.lane.b32.xlu1 %v2191_v55, %s1955_s20 }
  0x6f   : > { %640 = vrot.lane.b32.xlu0 %v2193_v56, %s1955_s20 }
  0x72   : > { %799 = vrot.lane.b32.xlu1 %v2120_v28, %s1955_s20 }
  0x73   : > { %796 = vrot.lane.b32.xlu0 %v2116_v25, %s1955_s20 }
  0x76   : > { %811 = vrot.lane.b32.xlu1 %v2110_v21, %s1955_s20 }
  0x77   : > { %808 = vrot.lane.b32.xlu0 %v2108_v18, %s1955_s20 }
  0x7a   : > { %988 = vrot.lane.b32.xlu1 %v2215_v0, %s1955_s20 }
  0x7b   : > { %985 = vrot.lane.b32.xlu0 %v2219_v1, %s1955_s20 }
  0x7e   : > { %1000 = vrot.lane.b32.xlu1 %v2229_v7, %s1955_s20 }
  0x7f   : > { %997 = vrot.lane.b32.xlu0 %v2234_v8, %s1955_s20 }
  0x82   : > { %1177 = vrot.lane.b32.xlu1 %v2244_v13, %s1955_s20 }
  0x83   : > { %1174 = vrot.lane.b32.xlu0 %v2248_v14, %s1955_s20 }
  0x86   : > { %1189 = vrot.lane.b32.xlu1 %v2258_v20, %s1955_s20 }
  0x87   : > { %1186 = vrot.lane.b32.xlu0 %v2263_v22, %s1955_s20 }
  0x8a   : > { %1366 = vrot.lane.b32.xlu1 %v2271_v27, %s1955_s20 }
  0x8b   : > { %1363 = vrot.lane.b32.xlu0 %v2273_v29, %s1955_s20 }
  0x8e   : > { %1378 = vrot.lane.b32.xlu1 %v2279_v11, %s1955_s20 }
  0x8f   : > { %1375 = vrot.lane.b32.xlu0 %v2281_v32, %s1955_s20 }
  0xcc   : > { %v266_v34 = vpop.permute.xlu1 %265 }
  0xcd   : > { %v452_v37 = vpop.permute.xlu0 %451  ;;  %v267_v9 = vsel %vm249_vm12, %v266_v34, %v2126_v31 }
  0xd0   : > { %v455_v38 = vpop.permute.xlu1 %454 }
  0xd1   : > { %v254_v39 = vpop.permute.xlu0 %253  ;;  %v456_v16 = vsel %vm249_vm12, %v455_v38, %v2140_v35 }
  0xd4   : > { %v263_v40 = vpop.permute.xlu1 %262 }
  0xd5   : > { %v2287_v43 = vpop.permute.xlu0 %250 }
  0xd8   : > { %v443_v44 = vpop.permute.xlu1 %442 }
  0xd9   : > { %v2289_v45 = vpop.permute.xlu0 %439 }
  0xdc   : > { %v632_v46 = vpop.permute.xlu1 %631 }
  0xdd   : > { %v2291_v49 = vpop.permute.xlu0 %628 }
  0xe0   : > { %v644_v50 = vpop.permute.xlu1 %643 }
  0xe1   : > { %v641_v51 = vpop.permute.xlu0 %640  ;;  %v645_v23 = vsel %vm249_vm12, %v644_v50, %v2191_v55 }
  0xe4   : > { %v800_v54 = vpop.permute.xlu1 %799 }
  0xe5   : > { %v797_v57 = vpop.permute.xlu0 %796  ;;  %v801_v62 = vsel %vm249_vm12, %v800_v54, %v2120_v28 }
  0xe6   : > { %v798_v4 = vsel %vm249_vm12, %v797_v57, %v2116_v25 }
  0xe8   : > { %v812_v58 = vpop.permute.xlu1 %811 }
  0xe9   : > { %v809_v59 = vpop.permute.xlu0 %808  ;;  %v813_v60 = vsel %vm249_vm12, %v812_v58, %v2110_v21 }
  0xea   : > { %816 = vrot.lane.b32.xlu1 %v813_v60, %s1955_s20  ;;  %v810_v61 = vsel %vm249_vm12, %v809_v59, %v2108_v18  ;;  %v264_v59 = vsel %vm249_vm12, %v263_v40, %v2156_v41  ;;  %v255_v60 = vsel %vm249_vm12, %v254_v39, %v2144_v36  ;;  %v642_v40 = vsel %vm249_vm12, %v641_v51, %v2193_v56 }
  0xeb   : > { %814 = vrot.lane.b32.xlu0 %v810_v61, %s1955_s20  ;;  %v453_v61 = vsel %vm249_vm12, %v452_v37, %v2133_v33  ;;  %v633_v39 = vsel %vm249_vm12, %v632_v46, %v2183_v52 }
  0xec   : > { %v989_v63 = vpop.permute.xlu1 %988 }
  0xed   : > { %v986_v2 = vpop.permute.xlu0 %985 }
  0xee   : > { %804 = vrot.lane.b32.xlu1 %v801_v62, %s1955_s20  ;;  %v444_v62 = vsel %vm249_vm12, %v443_v44, %v2172_v47  ;;  %v987_v37 = vsel %vm249_vm12, %v986_v2, %v2219_v1  ;;  %v990_v44 = vsel %vm249_vm12, %v989_v63, %v2215_v0 }
  0xef   : > { %802 = vrot.lane.b32.xlu0 %v798_v4, %s1955_s20  ;;  %v252_v4 = vsel %vm249_vm12, %v2287_v43, %v2158_v42 }
  0xf0   : > { %v1001_v5 = vpop.permute.xlu1 %1000 }
  0xf1   : > { %v998_v6 = vpop.permute.xlu0 %997  ;;  %v1002_v26 = vsel %vm249_vm12, %v1001_v5, %v2229_v7  ;;  %v441_v5 = vsel %vm249_vm12, %v2289_v45, %v2175_v48  ;;  %v822_v45 = vstv %s1703_s26  ;;  %s2469_s26 = sld [smem:[#allocation2]] }
  0xf2   : > { %270 = vrot.lane.b32.xlu1 %v267_v9, %s1955_s20  ;;  %v999_v10 = vsel %vm249_vm12, %v998_v6, %v2234_v8  ;;  %v630_v6 = vsel %vm249_vm12, %v2291_v49, %v2185_v53 }
  0xf3   : > { %1003 = vrot.lane.b32.xlu0 %v999_v10, %s1955_s20 }
  0xf4   : > { %v1178_v12 = vpop.permute.xlu1 %1177 }
  0xf5   : > { %v1175_v15 = vpop.permute.xlu0 %1174  ;;  %v1179_v46 = vsel %vm249_vm12, %v1178_v12, %v2244_v13  ;;  %v825_v12 = vstv %s1704_s23  ;;  %s2464_s23 = sld [smem:[#allocation2 + $0x33]] }
  0xf6   : > { %459 = vrot.lane.b32.xlu1 %v456_v16, %s1955_s20  ;;  %v1176_v51 = vsel %vm249_vm12, %v1175_v15, %v2248_v14 }
  0xf8   : > { %v1190_v17 = vpop.permute.xlu1 %1189 }
  0xf9   : > { %v1187_v19 = vpop.permute.xlu0 %1186  ;;  %v1191_v38 = vsel %vm249_vm12, %v1190_v17, %v2258_v20 }
  0xfa   : > { %648 = vrot.lane.b32.xlu1 %v645_v23, %s1955_s20  ;;  %v1188_v24 = vsel %vm249_vm12, %v1187_v19, %v2263_v22  ;;  %v844_v23 = vstv %s1705_s5  ;;  %s2475_s5 = sld [smem:[#allocation2 + $0x4d]] }
  0xfb   : > { %1192 = vrot.lane.b32.xlu0 %v1188_v24, %s1955_s20 }
  0xfc   : > { %v1367_v30 = vpop.permute.xlu1 %1366 }
  0xfd   : > { %v1364_v34 = vpop.permute.xlu0 %1363  ;;  %v1368_v63 = vsel %vm249_vm12, %v1367_v30, %v2271_v27 }
  0xfe   : > { %1005 = vrot.lane.b32.xlu1 %v1002_v26, %s1955_s20  ;;  %v1365_v2 = vsel %vm249_vm12, %v1364_v34, %v2273_v29 }
 0x100   : > { %v1379_v54 = vpop.permute.xlu1 %1378 }
 0x101   : > { %v1376_v57 = vpop.permute.xlu0 %1375  ;;  %v1380_v58 = vsel %vm249_vm12, %v1379_v54, %v2279_v11 }
 0x102   : > { %1194 = vrot.lane.b32.xlu1 %v1191_v38, %s1955_s20  ;;  %v1377_v50 = vsel %vm249_vm12, %v1376_v57, %v2281_v32  ;;  %v847_v38 = vstv %s2380_s7  ;;  %s2480_s7 = sld [smem:[#allocation2 + $0x1]] }
 0x103   : > { %1381 = vrot.lane.b32.xlu0 %v1377_v50, %s1955_s20 }
 0x106   : > { %1383 = vrot.lane.b32.xlu1 %v1380_v58, %s1955_s20 }
 0x107   : > { %268 = vrot.lane.b32.xlu0 %v264_v59, %s1955_s20 }
 0x10a   : > { %258 = vrot.lane.b32.xlu1 %v255_v60, %s1955_s20 }
 0x10b   : > { %457 = vrot.lane.b32.xlu0 %v453_v61, %s1955_s20  ;;  %v866_v61 = vstv %s2386_s8  ;;  %s3619_s8 = smov 126  }
 0x10e   : > { %447 = vrot.lane.b32.xlu1 %v444_v62, %s1955_s20 }
 0x10f   : > { %646 = vrot.lane.b32.xlu0 %v642_v40, %s1955_s20  ;;  %v869_v40 = vstv %s2388_s19  ;;  %s2483_s19 = sld [smem:[#allocation2 + $0x35]] }
 0x112   : > { %636 = vrot.lane.b32.xlu1 %v633_v39, %s1955_s20 }
 0x113   : > { %991 = vrot.lane.b32.xlu0 %v987_v37, %s1955_s20 }
 0x116   : > { %993 = vrot.lane.b32.xlu1 %v990_v44, %s1955_s20 }
 0x117   : > { %1180 = vrot.lane.b32.xlu0 %v1176_v51, %s1955_s20 }
 0x11a   : > { %1182 = vrot.lane.b32.xlu1 %v1179_v46, %s1955_s20 }
 0x11b   : > { %1369 = vrot.lane.b32.xlu0 %v1365_v2, %s1955_s20 }
 0x11e   : > { %1371 = vrot.lane.b32.xlu1 %v1368_v63, %s1955_s20  ;;  %v900_v63 = vstv %s2399_s25  ;;  %s2487_s25 = sld [smem:[#allocation2 + $0x4e]] }
 0x11f   : > { %256 = vrot.lane.b32.xlu0 %v252_v4, %s1955_s20 }
 0x123   : > { %445 = vrot.lane.b32.xlu0 %v441_v5, %s1955_s20  ;;  %v903_v5 = vstv %s2409_s28  ;;  %s2491_s28 = sld [smem:[#allocation2 + $0x36]] }
 0x124   : > { %3731 = sst [smem:[#allocation31_spill]] %s2487_s25 }
 0x127   : > { %634 = vrot.lane.b32.xlu0 %v630_v6, %s1955_s20  ;;  %s3621_s20 = smov 127  }
 0x15c   : > { %v817_v43 = vpop.permute.xlu1 %816 }
 0x15d   : > { %v2384_v9 = vsel %vm249_vm12, %v817_v43, %v2110_v21  ;;  %v815_v10 = vpop.permute.xlu0 %814 }
 0x15e   : > { %v2392_v49 = vsel %vm249_vm12, %v815_v10, %v2108_v18  ;;  %v827_v16 = vmul.f32 %v825_v12, %v2384_v9  ;;  %v849_v58 = vmul.f32 %v847_v38, %v2384_v9  ;;  %v871_v51 = vmul.f32 %v869_v40, %v2384_v9 }
 0x15f   : > { %v826_v34 = vmul.f32 %v825_v12, %v2392_v49  ;;  %v848_v62 = vmul.f32 %v847_v38, %v2392_v49  ;;  %v870_v4 = vmul.f32 %v869_v40, %v2392_v49 }
 0x160   : > { %v805_v15 = vpop.permute.xlu1 %804 }
 0x161   : > { %v2397_v17 = vsel %vm249_vm12, %v805_v15, %v2120_v28  ;;  %v803_v19 = vpop.permute.xlu0 %802 }
 0x162   : > { %v2403_v24 = vsel %vm249_vm12, %v803_v19, %v2116_v25  ;;  %v824_v26 = vmul.f32 %v822_v45, %v2397_v17  ;;  %v846_v50 = vmul.f32 %v844_v23, %v2397_v17  ;;  %v868_v44 = vmul.f32 %v866_v61, %v2397_v17 }
 0x163   : > { %v823_v30 = vmul.f32 %v822_v45, %v2403_v24  ;;  %v845_v60 = vmul.f32 %v844_v23, %v2403_v24  ;;  %v867_v2 = vmul.f32 %v866_v61, %v2403_v24  ;;  %v902_v10 = vmul.f32 %v900_v63, %v2397_v17 }
 0x164   : > { %v2411_v54 = vpop.permute.xlu1 %270  ;;  %v829_v57 = vadd.f32 %v827_v16, %v824_v26  ;;  %v851_v37 = vadd.f32 %v849_v58, %v846_v50  ;;  %v873_v43 = vadd.f32 %v871_v51, %v868_v44  ;;  %v905_v45 = vmul.f32 %v903_v5, %v2384_v9 }
 0x165   : > { %v828_v59 = vadd.f32 %v826_v34, %v823_v30  ;;  %v850_v46 = vadd.f32 %v848_v62, %v845_v60  ;;  %v2443_v12 = vpop.permute.xlu0 %1003  ;;  %v872_v15 = vadd.f32 %v870_v4, %v867_v2  ;;  %v901_v16 = vmul.f32 %v900_v63, %v2403_v24 }
 0x166   : > { %834 = vrot.lane.b32.xlu1 %v829_v57, %s3629_s27  ;;  %v922_v19 = vstv %s2417_s24  ;;  %v904_v23 = vmul.f32 %v903_v5, %v2392_v49  ;;  %v925_v26 = vstv %s2423_s29  ;;  %v907_v34 = vadd.f32 %v905_v45, %v902_v10  ;;  %s2495_s24 = sld [smem:[#allocation2 + $0x2]]  ;;  %s3623_s29 = smov 125  }
 0x167   : > { %832 = vrot.lane.b32.xlu0 %v828_v59, %s3629_s27  ;;  %v924_v38 = vmul.f32 %v922_v19, %v2397_v17  ;;  %v927_v57 = vmul.f32 %v925_v26, %v2384_v9  ;;  %v923_v59 = vmul.f32 %v922_v19, %v2403_v24  ;;  %v944_v60 = vstv %s2431_s30  ;;  %s2498_s30 = sld [smem:[#allocation2 + $0x4f]] }
 0x168   : > { %v2425_v39 = vpop.permute.xlu1 %459  ;;  %v906_v58 = vadd.f32 %v904_v23, %v901_v16  ;;  %v926_v61 = vmul.f32 %v925_v26, %v2392_v49  ;;  %v947_v62 = vstv %s2437_s4  ;;  %v946_v44 = vmul.f32 %v944_v60, %v2397_v17  ;;  %s2508_s4 = sld [smem:[#allocation2 + $0x37]] }
 0x169   : > { %v949_v51 = vmul.f32 %v947_v62, %v2384_v9  ;;  %v945_v63 = vmul.f32 %v944_v60, %v2403_v24  ;;  %v948_v9 = vmul.f32 %v947_v62, %v2392_v49  ;;  %v2503_v49 = vsel %vm249_vm12, %v2411_v54, %v2126_v31  ;;  %s2540_s27 = sld [smem:[#allocation2 + $0x5]] }
 0x16a   : > { %856 = vrot.lane.b32.xlu1 %v851_v37, %s3627_s3  ;;  %v929_v37 = vadd.f32 %v927_v57, %v924_v38  ;;  %v928_v2 = vadd.f32 %v926_v61, %v923_v59  ;;  %v3660_v10 = vstv %s2455_s16  ;;  %v3658_v54 = vstv %s2480_s7 }
 0x16b   : > { %854 = vrot.lane.b32.xlu0 %v850_v46, %s3627_s3  ;;  %v951_v4 = vadd.f32 %v949_v51, %v946_v44  ;;  %v950_v5 = vadd.f32 %v948_v9, %v945_v63  ;;  %v281_v23 = vmul.f32 %v3660_v10, %v2503_v49  ;;  %v3657_v26 = vstv %s2461_s17  ;;  %s2535_s3 = sld [smem:[#allocation2 + $0x52]] }
 0x16c   : > { %v2439_v6 = vpop.permute.xlu1 %648  ;;  %v303_v59 = vmul.f32 %v3657_v26, %v2503_v49  ;;  %v3652_v60 = vstv %s2464_s23  ;;  %v3640_v61 = vstv %s2475_s5  ;;  %v2555_v62 = vsel %vm249_vm12, %v2443_v12, %v2234_v8 }
 0x16d   : > { %v2457_v50 = vpop.permute.xlu0 %1192  ;;  %3732 = sst [smem:[#allocation32_spill]] %s2498_s30  ;;  %v325_v12 = vmul.f32 %v3652_v60, %v2503_v49  ;;  %v3667_v60 = vstv %s2573_s12  ;;  %v465_v26 = vstv %s2561_s11 }
 0x16e   : > { %878 = vrot.lane.b32.xlu1 %v873_v43, %s3625_s14  ;;  %v3661_v43 = vstv %s2469_s26  ;;  %s2671_s12 = sld [smem:[#allocation2 + $0x3a]] }
 0x16f   : > { %876 = vrot.lane.b32.xlu0 %v872_v15, %s3625_s14  ;;  %s2530_s14 = sld [smem:[#allocation2 + $0x51]]  ;;  %v3651_v3 = vstv %s2540_s27 }
 0x170   : > { %v2451_v30 = vpop.permute.xlu1 %1005  ;;  %s2841_s11 = sld [smem:[#allocation2 + $0x43]] }
 0x171   : > { %3733 = sst [smem:[#allocation33_spill]] %s2535_s3 }
 0x172   : > { %912 = vrot.lane.b32.xlu1 %v907_v34, %s3621_s20 }
 0x173   : > { %910 = vrot.lane.b32.xlu0 %v906_v58, %s3621_s20  ;;  %s2519_s20 = sld [smem:[#allocation2 + $0x4]]  ;;  %v3655_v58 = vstv %s2495_s24 }
 0x174   : > { %v2471_v40 = vpop.permute.xlu1 %1194 }
 0x175   : > { %v2477_v46 = vpop.permute.xlu0 %1381 }
 0x176   : > { %934 = vrot.lane.b32.xlu1 %v929_v37, %s3619_s8 }
 0x177   : > { %932 = vrot.lane.b32.xlu0 %v928_v2, %s3619_s8  ;;  %s2510_s8 = sld [smem:[#allocation2 + $0x1c]] }
 0x178   : > { %v2489_v17 = vpop.permute.xlu1 %1383 }
 0x179   : > { %v2493_v24 = vpop.permute.xlu0 %268  ;;  %v3648_v63 = vstv %s2519_s20 }
 0x17a   : > { %956 = vrot.lane.b32.xlu1 %v951_v4, %s3623_s29 }
 0x17b   : > { %954 = vrot.lane.b32.xlu0 %v950_v5, %s3623_s29  ;;  %s2527_s29 = sld [smem:[#allocation2 + $0x1d]] }
 0x17c   : > { %v259_v45 = vpop.permute.xlu1 %258 }
 0x17d   : > { %v2514_v15 = vsel %vm249_vm12, %v259_v45, %v2144_v36  ;;  %v2516_v16 = vpop.permute.xlu0 %457  ;;  %v3644_v51 = vstv %s2510_s8  ;;  %v1015_v45 = vmul.f32 %v3640_v61, %v2555_v62 }
 0x17e   : > { %v278_v19 = vmul.f32 %v3661_v43, %v2514_v15  ;;  %v300_v38 = vmul.f32 %v3658_v54, %v2514_v15  ;;  %v322_v44 = vmul.f32 %v3655_v58, %v2514_v15  ;;  %v3673_v54 = vstv %s2587_s9  ;;  %s2690_s9 = sld [smem:[#allocation2 + $0xb]] }
 0x180   : > { %v283_v34 = vadd.f32 %v281_v23, %v278_v19  ;;  %v305_v37 = vadd.f32 %v303_v59, %v300_v38  ;;  %v3645_v19 = vstv %s2483_s19  ;;  %v327_v23 = vadd.f32 %v325_v12, %v322_v44 }
 0x181   : > { %v2537_v57 = vpop.permute.xlu0 %646  ;;  %v3643_v4 = vstv %s2527_s29  ;;  %v3646_v38 = vstv %s2487_s25  ;;  %v359_v44 = vmul.f32 %v3645_v19, %v2503_v49  ;;  %v3654_v12 = vstv %s2546_s1  ;;  %s2629_s1 = sld [smem:[#allocation2 + $0x39]]  ;;  %s3742_s25 = smov 126  }
 0x182   : > { %288 = vrot.lane.b32.xlu1 %v283_v34, %s3734_s0  ;;  %v356_v34 = vmul.f32 %v3648_v63, %v2514_v15  ;;  %v1037_v61 = vmul.f32 %v3646_v38, %v2555_v62  ;;  %v398_v38 = vstv %s2550_s18  ;;  %v448_v63 = vpop.permute.xlu1 %447  ;;  %s2816_s18 = sld [smem:[#allocation2 + $0x41]] }
 0x185   : > { %v992_v2 = vpop.permute.xlu0 %991 }
 0x186   : > { %v995_v9 = vsel %vm249_vm12, %v992_v2, %v2219_v1  ;;  %310 = vrot.lane.b32.xlu1 %v305_v37, %s3736_s15 }
 0x187   : > { %v1012_v5 = vmul.f32 %v3644_v51, %v995_v9  ;;  %v1034_v2 = vmul.f32 %v3643_v4, %v995_v9  ;;  %v3659_v4 = vstv %s2498_s30  ;;  %v1056_v19 = vmul.f32 %v3654_v12, %v995_v9  ;;  %s2644_s30 = sld [smem:[#allocation2 + $0x9]] }
 0x188   : > { %v3666_v12 = vstv %s2535_s3  ;;  %s2712_s3 = sld [smem:[#allocation2 + $0xc]] }
 0x189   : > { %v2589_v59 = vpop.permute.xlu0 %1180  ;;  %v1017_v37 = vadd.f32 %v1015_v45, %v1012_v5  ;;  %v3656_v5 = vstv %s2491_s28  ;;  %v361_v45 = vadd.f32 %v359_v44, %v356_v34  ;;  %v401_v44 = vstv %s2508_s4  ;;  %s2850_s4 = sld [smem:[#allocation2 + $0x13]] }
 0x18a   : > { %332 = vrot.lane.b32.xlu1 %v327_v23, %s3740_s2  ;;  %v378_v23 = vmul.f32 %v3651_v3, %v2514_v15  ;;  %v381_v34 = vmul.f32 %v3656_v5, %v2503_v49  ;;  %v3669_v3 = vstv %s2564_s10  ;;  %v400_v5 = vmul.f32 %v398_v38, %v2514_v15 }
 0x18b   : > { %1021 = vrot.lane.b32.xlu0 %v1017_v37, %s3734_s0  ;;  %v1039_v37 = vadd.f32 %v1037_v61, %v1034_v2  ;;  %v1059_v61 = vmul.f32 %v3659_v4, %v2555_v62  ;;  %v3668_v2 = vstv %s2530_s14  ;;  %v1090_v43 = vmul.f32 %v3669_v3, %v995_v9 }
 0x18c   : > { %v383_v58 = vadd.f32 %v381_v34, %v378_v23  ;;  %v1112_v23 = vmul.f32 %v3667_v60, %v995_v9  ;;  %v3743_v60 = vstv %s2469_s26  ;;  %v487_v3 = vstv %s2615_s13  ;;  %s2703_s26 = sld [smem:[#allocation2 + $0x3c]] }
 0x18d   : > { %v2610_v51 = vpop.permute.xlu0 %1369  ;;  %v1061_v10 = vadd.f32 %v1059_v61, %v1056_v19  ;;  %v1115_v19 = vmul.f32 %v3666_v12, %v2555_v62  ;;  %v2664_v61 = vsel %vm249_vm12, %v2425_v39, %v2140_v35  ;;  %s2861_s13 = sld [smem:[#allocation2 + $0x44]] }
 0x18e   : > { %366 = vrot.lane.b32.xlu1 %v361_v45, %s3741_s6  ;;  %v3665_v45 = vstv %s2581_s22  ;;  %s3744_s22 = smov 125  }
 0x18f   : > { %1043 = vrot.lane.b32.xlu0 %v1039_v37, %s3736_s15  ;;  %v2640_v37 = vsel %vm249_vm12, %v448_v63, %v2172_v47  ;;  %v403_v63 = vmul.f32 %v401_v44, %v2503_v49  ;;  %v1134_v34 = vmul.f32 %v3665_v45, %v995_v9  ;;  %v1137_v49 = vmul.f32 %v3673_v54, %v2555_v62 }
 0x190   : > { %v2679_v9 = vsel %vm249_vm12, %v2493_v24, %v2156_v41  ;;  %v2684_v45 = vadd.f32 %v1115_v19, %v1112_v23  ;;  %v3677_v54 = vstv %s2690_s9 }
 0x191   : > { %v257_v4 = vpop.permute.xlu0 %256  ;;  %v405_v39 = vadd.f32 %v403_v63, %v400_v5  ;;  %v489_v63 = vmul.f32 %v487_v3, %v2640_v37 }
 0x192   : > { %v2650_v15 = vsel %vm249_vm12, %v257_v4, %v2158_v42  ;;  %388 = vrot.lane.b32.xlu1 %v383_v58, %s3742_s25  ;;  %v1093_v58 = vmul.f32 %v3668_v2, %v2555_v62  ;;  %v468_v4 = vstv %s2604_s21  ;;  %v2696_v62 = vadd.f32 %v1137_v49, %v1134_v34  ;;  %s2870_s21 = sld [smem:[#allocation2 + $0x14]] }
 0x193   : > { %1065 = vrot.lane.b32.xlu0 %v1061_v10, %s3740_s2  ;;  %v467_v10 = vmul.f32 %v465_v26, %v2640_v37  ;;  %v277_v2 = vmul.f32 %v3743_v60, %v2650_v15  ;;  %v470_v24 = vmul.f32 %v468_v4, %v2664_v61  ;;  %v490_v60 = vstv %s2629_s1  ;;  %s2881_s1 = sld [smem:[#allocation2 + $0x45]] }
 0x194   : > { %v1095_v12 = vadd.f32 %v1093_v58, %v1090_v43  ;;  %v3745_v43 = vstv %s2455_s16  ;;  %v3746_v58 = vstv %s2480_s7  ;;  %v3674_v49 = vstv %s2644_s30  ;;  %s2723_s16 = sld [smem:[#allocation2 + $0x3d]] }
 0x195   : > { %v280_v5 = vmul.f32 %v3745_v43, %v2679_v9  ;;  %v472_v23 = vadd.f32 %v470_v24, %v467_v10  ;;  %v299_v34 = vmul.f32 %v3746_v58, %v2650_v15  ;;  %v511_v43 = vmul.f32 %v3674_v49, %v2640_v37  ;;  %s2732_s7 = sld [smem:[#allocation2 + $0xd]] }
 0x196   : > { %410 = vrot.lane.b32.xlu1 %v405_v39, %s3744_s22  ;;  %v3747_v39 = vstv %s2461_s17  ;;  %s2743_s17 = sld [smem:[#allocation2 + $0x3e]] }
 0x197   : > { %1099 = vrot.lane.b32.xlu0 %v1095_v12, %s3741_s6  ;;  %v282_v19 = vadd.f32 %v280_v5, %v277_v2  ;;  %v492_v12 = vmul.f32 %v490_v60, %v2664_v61  ;;  %v302_v10 = vmul.f32 %v3747_v39, %v2679_v9  ;;  %v3675_v2 = vstv %s2671_s12 }
 0x199   : > { %v494_v24 = vadd.f32 %v492_v12, %v489_v63  ;;  %v304_v5 = vadd.f32 %v302_v10, %v299_v34  ;;  %v3749_v63 = vstv %s2464_s23  ;;  %v3676_v34 = vstv %s2703_s26  ;;  %s2763_s23 = sld [smem:[#allocation2 + $0x3f]] }
 0x19a   : > { %477 = vrot.lane.b32.xlu1 %v472_v23, %s3734_s0  ;;  %v3748_v23 = vstv %s2495_s24  ;;  %v324_v12 = vmul.f32 %v3749_v63, %v2679_v9  ;;  %v545_v10 = vmul.f32 %v3677_v54, %v2640_v37  ;;  %s2752_s24 = sld [smem:[#allocation2 + $0xe]] }
 0x19b   : > { %286 = vrot.lane.b32.xlu0 %v282_v19, %s3734_s0  ;;  %v321_v58 = vmul.f32 %v3748_v23, %v2650_v15  ;;  %v514_v19 = vmul.f32 %v3675_v2, %v2664_v61  ;;  %v3750_v23 = vstv %s2519_s20  ;;  %v3678_v2 = vstv %s2712_s3  ;;  %s2772_s20 = sld [smem:[#allocation2 + $0xf]] }
 0x19c   : > { %v355_v49 = vmul.f32 %v3750_v23, %v2650_v15  ;;  %v587_v54 = vstv %s2732_s7  ;;  %s3023_s7 = sld [smem:[#allocation2 + $0x25]] }
 0x19d   : > { %v516_v39 = vadd.f32 %v514_v19, %v511_v43  ;;  %v3751_v43 = vstv %s2483_s19  ;;  %s2796_s19 = sld [smem:[#allocation2 + $0x10]] }
 0x19e   : > { %499 = vrot.lane.b32.xlu1 %v494_v24, %s3736_s15  ;;  %v326_v24 = vadd.f32 %v324_v12, %v321_v58  ;;  %v358_v19 = vmul.f32 %v3751_v43, %v2679_v9  ;;  %v3679_v58 = vstv %s2723_s16  ;;  %v567_v12 = vmul.f32 %v3678_v2, %v2640_v37 }
 0x19f   : > { %308 = vrot.lane.b32.xlu0 %v304_v5, %s3736_s15  ;;  %v548_v5 = vmul.f32 %v3676_v34, %v2664_v61  ;;  %v570_v43 = vmul.f32 %v3679_v58, %v2664_v61  ;;  %v589_v2 = vmul.f32 %v587_v54, %v2640_v37 }
 0x1a0   : > { %v360_v23 = vadd.f32 %v358_v19, %v355_v49  ;;  %v3753_v49 = vstv %s2491_s28  ;;  %v590_v19 = vstv %s2743_s17  ;;  %s2830_s28 = sld [smem:[#allocation2 + $0x12]] }
 0x1a1   : > { %v550_v63 = vadd.f32 %v548_v5, %v545_v10  ;;  %v446_v10 = vpop.permute.xlu0 %445  ;;  %v380_v5 = vmul.f32 %v3753_v49, %v2679_v9  ;;  %v654_v49 = vstv %s2752_s24  ;;  %v592_v37 = vmul.f32 %v590_v19, %v2664_v61  ;;  %s3029_s17 = sld [smem:[#allocation2 + $0x56]] }
 0x1a2   : > { %521 = vrot.lane.b32.xlu1 %v516_v39, %s3740_s2  ;;  %v3752_v39 = vstv %s2540_s27  ;;  %s2783_s27 = sld [smem:[#allocation2 + $0x40]]  ;;  %v2821_v61 = vsel %vm249_vm12, %v2516_v16, %v2133_v33 }
 0x1a3   : > { %330 = vrot.lane.b32.xlu0 %v326_v24, %s3740_s2  ;;  %v377_v34 = vmul.f32 %v3752_v39, %v2650_v15  ;;  %v637_v24 = vpop.permute.xlu1 %636  ;;  %v572_v39 = vadd.f32 %v570_v43, %v567_v12  ;;  %v2800_v12 = vsel %vm249_vm12, %v446_v10, %v2175_v48  ;;  %s3035_s24 = sld [smem:[#allocation2 + $0x27]] }
 0x1a5   : > { %v382_v58 = vadd.f32 %v380_v5, %v377_v34  ;;  %v2809_v34 = vsel %vm249_vm12, %v2439_v6, %v2191_v55 }
 0x1a6   : > { %555 = vrot.lane.b32.xlu1 %v550_v63, %s3741_s6  ;;  %v2790_v63 = vsel %vm249_vm12, %v637_v24, %v2183_v52  ;;  %v594_v24 = vadd.f32 %v592_v37, %v589_v2  ;;  %v491_v37 = vmul.f32 %v490_v60, %v2821_v61 }
 0x1a7   : > { %364 = vrot.lane.b32.xlu0 %v360_v23, %s3741_s6  ;;  %v399_v23 = vmul.f32 %v398_v38, %v2650_v15  ;;  %v402_v38 = vmul.f32 %v401_v44, %v2679_v9  ;;  %v657_v15 = vstv %s2763_s23  ;;  %v656_v6 = vmul.f32 %v654_v49, %v2790_v63  ;;  %s3043_s23 = sld [smem:[#allocation2 + $0x58]] }
 0x1a8   : > { %v676_v44 = vstv %s2772_s20  ;;  %v659_v16 = vmul.f32 %v657_v15, %v2809_v34  ;;  %v469_v9 = vmul.f32 %v468_v4, %v2821_v61  ;;  %v679_v2 = vstv %s2783_s27  ;;  %s3055_s20 = sld [smem:[#allocation2 + $0x28]] }
 0x1a9   : > { %v404_v43 = vadd.f32 %v402_v38, %v399_v23  ;;  %v678_v10 = vmul.f32 %v676_v44, %v2790_v63  ;;  %v3682_v23 = vstv %s2796_s19  ;;  %v681_v4 = vmul.f32 %v679_v2, %v2809_v34  ;;  %s3067_s27 = sld [smem:[#allocation2 + $0x59]] }
 0x1aa   : > { %577 = vrot.lane.b32.xlu1 %v572_v39, %s3742_s25  ;;  %v488_v39 = vmul.f32 %v487_v3, %v2800_v12  ;;  %v3681_v38 = vstv %s2816_s18 }
 0x1ab   : > { %386 = vrot.lane.b32.xlu0 %v382_v58, %s3742_s25  ;;  %v466_v58 = vmul.f32 %v465_v26, %v2800_v12  ;;  %v661_v26 = vadd.f32 %v659_v16, %v656_v6  ;;  %v683_v3 = vadd.f32 %v681_v4, %v678_v10  ;;  %v3680_v16 = vstv %s2830_s28 }
 0x1ac   : > { %v493_v6 = vadd.f32 %v491_v37, %v488_v39  ;;  %v703_v60 = vmul.f32 %v3681_v38, %v2809_v34  ;;  %v735_v10 = vstv %s2841_s11  ;;  %v734_v39 = vmul.f32 %v3680_v16, %v2790_v63  ;;  %s3098_s11 = sld [smem:[#allocation2 + $0x5b]] }
 0x1ad   : > { %v471_v5 = vadd.f32 %v469_v9, %v466_v58  ;;  %v3755_v9 = vstv %s2671_s12  ;;  %v3756_v37 = vstv %s2690_s9  ;;  %v3758_v16 = vstv %s2712_s3  ;;  %s3760_s9 = sld [smem:[#allocation31_spill]] }
 0x1ae   : > { %599 = vrot.lane.b32.xlu1 %v594_v24, %s3744_s22  ;;  %v700_v24 = vmul.f32 %v3682_v23, %v2790_v63  ;;  %v776_v38 = vstv %s2870_s21  ;;  %v994_v23 = vpop.permute.xlu1 %993  ;;  %s3762_s12 = sld [smem:[#allocation34_spill]] }
 0x1af   : > { %408 = vrot.lane.b32.xlu0 %v404_v43, %s3744_s22  ;;  %v3754_v43 = vstv %s2644_s30  ;;  %s3764_s3 = sld [smem:[#allocation32_spill]] }
 0x1b0   : > { %v510_v58 = vmul.f32 %v3754_v43, %v2800_v12  ;;  %v3684_v43 = vstv %s2850_s4  ;;  %s2979_s30 = sld [smem:[#allocation2 + $0x23]] }
 0x1b1   : > { %s3131_s21 = sld [smem:[#allocation2 + $0x2c]] }
 0x1b2   : > { %666 = vrot.lane.b32.xlu1 %v661_v26, %s3734_s0  ;;  %v513_v26 = vmul.f32 %v3755_v9, %v2821_v61  ;;  %v3683_v9 = vstv %s2861_s13 }
 0x1b3   : > { %475 = vrot.lane.b32.xlu0 %v471_v5, %s3734_s0  ;;  %v705_v5 = vadd.f32 %v703_v60, %v700_v24  ;;  %v3757_v24 = vstv %s2703_s26  ;;  %s2995_s26 = sld [smem:[#allocation2 + $0x24]] }
 0x1b4   : > { %v515_v4 = vadd.f32 %v513_v26, %v510_v58  ;;  %v547_v60 = vmul.f32 %v3757_v24, %v2821_v61  ;;  %v756_v26 = vmul.f32 %v3684_v43, %v2790_v63  ;;  %v635_v24 = vpop.permute.xlu0 %634 }
 0x1b6   : > { %688 = vrot.lane.b32.xlu1 %v683_v3, %s3736_s15  ;;  %v544_v3 = vmul.f32 %v3756_v37, %v2800_v12 }
 0x1b7   : > { %497 = vrot.lane.b32.xlu0 %v493_v6, %s3736_s15  ;;  %v737_v6 = vmul.f32 %v735_v10, %v2809_v34 }
 0x1b8   : > { %v549_v37 = vadd.f32 %v547_v60, %v544_v3  ;;  %v779_v3 = vstv %s2881_s1  ;;  %s3138_s1 = sld [smem:[#allocation2 + $0x5d]] }
 0x1b9   : > { %v739_v58 = vadd.f32 %v737_v6, %v734_v39  ;;  %v3759_v39 = vstv %s2723_s16  ;;  %s3007_s16 = sld [smem:[#allocation2 + $0x55]] }
 0x1ba   : > { %710 = vrot.lane.b32.xlu1 %v705_v5, %s3740_s2  ;;  %v566_v5 = vmul.f32 %v3758_v16, %v2800_v12  ;;  %v569_v6 = vmul.f32 %v3759_v39, %v2821_v61  ;;  %v778_v16 = vmul.f32 %v776_v38, %v2790_v63  ;;  %v1008_v63 = vsel %vm249_vm12, %v2451_v30, %v2229_v7 }
 0x1bb   : > { %519 = vrot.lane.b32.xlu0 %v515_v4, %s3740_s2  ;;  %v759_v4 = vmul.f32 %v3683_v9, %v2809_v34  ;;  %v588_v9 = vmul.f32 %v587_v54, %v2800_v12  ;;  %v650_v54 = vsel %vm249_vm12, %v2537_v57, %v2193_v56  ;;  %v3761_v12 = vstv %s2510_s8  ;;  %s3773_s8 = sld [smem:[#allocation33_spill]] }
 0x1bc   : > { %v571_v43 = vadd.f32 %v569_v6, %v566_v5  ;;  %v3763_v30 = vstv %s2475_s5  ;;  %s3770_s5 = sld [smem:[#allocation35_spill]] }
 0x1bd   : > { %v761_v60 = vadd.f32 %v759_v4, %v756_v26  ;;  %v781_v26 = vmul.f32 %v779_v3, %v2809_v34  ;;  %v1016_v39 = vmul.f32 %v3763_v30, %v1008_v63  ;;  %v3771_v30 = vstv %s2816_s18  ;;  %s3082_s18 = sld [smem:[#allocation2 + $0x5a]] }
 0x1be   : > { %744 = vrot.lane.b32.xlu1 %v739_v58, %s3741_s6  ;;  %v996_v58 = vsel %vm249_vm12, %v994_v23, %v2215_v0  ;;  %v591_v23 = vmul.f32 %v590_v19, %v2821_v61  ;;  %v658_v19 = vmul.f32 %v657_v15, %v650_v54  ;;  %v3765_v61 = vstv %s2527_s29  ;;  %s3776_s29 = sld [smem:[#allocation36_spill]] }
 0x1bf   : > { %553 = vrot.lane.b32.xlu0 %v549_v37, %s3741_s6  ;;  %v638_v37 = vsel %vm249_vm12, %v635_v24, %v2185_v53  ;;  %v1013_v5 = vmul.f32 %v3761_v12, %v996_v58  ;;  %v783_v4 = vadd.f32 %v781_v26, %v778_v16  ;;  %v1035_v57 = vmul.f32 %v3765_v61, %v996_v58 }
 0x1c0   : > { %v655_v34 = vmul.f32 %v654_v49, %v638_v37  ;;  %v593_v24 = vadd.f32 %v591_v23, %v588_v9  ;;  %v677_v6 = vmul.f32 %v676_v44, %v638_v37  ;;  %v3766_v49 = vstv %s3760_s9  ;;  %s3142_s9 = sld [smem:[#allocation2 + $0x2e]] }
 0x1c1   : > { %v1038_v16 = vmul.f32 %v3766_v49, %v1008_v63  ;;  %v680_v9 = vmul.f32 %v679_v2, %v650_v54  ;;  %v3767_v15 = vstv %s3762_s12  ;;  %v3768_v12 = vstv %s2796_s19  ;;  %s3077_s19 = sld [smem:[#allocation2 + $0x29]] }
 0x1c2   : > { %766 = vrot.lane.b32.xlu1 %v761_v60, %s3742_s25  ;;  %v660_v60 = vadd.f32 %v658_v19, %v655_v34  ;;  %v1057_v26 = vmul.f32 %v3767_v15, %v996_v58  ;;  %v3769_v44 = vstv %s3764_s3  ;;  %v3772_v2 = vstv %s2564_s10  ;;  %s3779_s10 = sld [smem:[#allocation37_spill]] }
 0x1c3   : > { %575 = vrot.lane.b32.xlu0 %v571_v43, %s3742_s25  ;;  %v1018_v43 = vadd.f32 %v1016_v39, %v1013_v5  ;;  %v1040_v23 = vadd.f32 %v1038_v16, %v1035_v57  ;;  %v699_v5 = vmul.f32 %v3768_v12, %v638_v37  ;;  %v1060_v34 = vmul.f32 %v3769_v44, %v1008_v63  ;;  %s3147_s12 = sld [smem:[#allocation2 + $0x5f]] }
 0x1c4   : > { %v702_v39 = vmul.f32 %v3771_v30, %v650_v54  ;;  %v1091_v19 = vmul.f32 %v3772_v2, %v996_v58  ;;  %v3774_v57 = vstv %s2830_s28  ;;  %v736_v16 = vmul.f32 %v735_v10, %v650_v54  ;;  %s3091_s28 = sld [smem:[#allocation2 + $0x2a]] }
 0x1c5   : > { %v1062_v61 = vadd.f32 %v1060_v34, %v1057_v26  ;;  %v3777_v26 = vstv %s3770_s5  ;;  %v3780_v44 = vstv %s3773_s8  ;;  %v3781_v10 = vstv %s2861_s13  ;;  %s3117_s13 = sld [smem:[#allocation2 + $0x5c]] }
 0x1c6   : > { %788 = vrot.lane.b32.xlu1 %v783_v4, %s3744_s22  ;;  %v682_v4 = vadd.f32 %v680_v9, %v677_v6  ;;  %v3775_v6 = vstv %s2530_s14  ;;  %s2987_s14 = sld [smem:[#allocation2 + $0x54]]  ;;  %v1116_v34 = vmul.f32 %v3780_v44, %v1008_v63  ;;  %v758_v30 = vmul.f32 %v3781_v10, %v650_v54 }
 0x1c7   : > { %597 = vrot.lane.b32.xlu0 %v593_v24, %s3744_s22  ;;  %v1183_v24 = vpop.permute.xlu1 %1182  ;;  %v1094_v49 = vmul.f32 %v3775_v6, %v1008_v63  ;;  %v1225_v44 = vstv %s3007_s16  ;;  %s3152_s3 = sld [smem:[#allocation2 + $0x2f]] }
 0x1c8   : > { %v3783_v6 = vstv %s3779_s10  ;;  %s3167_s5 = sld [smem:[#allocation2 + $0x3]] }
 0x1c9   : > { %v1096_v15 = vadd.f32 %v1094_v49, %v1091_v19  ;;  %v3782_v19 = vstv %s3776_s29  ;;  %v1138_v49 = vmul.f32 %v3783_v6, %v1008_v63  ;;  %s3171_s8 = sld [smem:[#allocation2 + $0x34]] }
 0x1ca   : > { %1023 = vrot.lane.b32.xlu1 %v1018_v43, %s3734_s0  ;;  %v704_v43 = vadd.f32 %v702_v39, %v699_v5  ;;  %v3778_v5 = vstv %s2850_s4  ;;  %s3105_s4 = sld [smem:[#allocation2 + $0x2b]] }
 0x1cb   : > { %664 = vrot.lane.b32.xlu0 %v660_v60, %s3734_s0  ;;  %v733_v60 = vmul.f32 %v3774_v57, %v638_v37  ;;  %v2981_v9 = vpop.permute.xlu1 %1371  ;;  %s3188_s29 = sld [smem:[#allocation2 + $0x60]] }
 0x1cc   : > { %s3207_s10 = sld [smem:[#allocation2 + $0x61]] }
 0x1cd   : > { %v738_v12 = vadd.f32 %v736_v16, %v733_v60  ;;  %v777_v60 = vmul.f32 %v776_v38, %v638_v37  ;;  %v3015_v16 = vsel %vm249_vm12, %v2471_v40, %v2258_v20  ;;  %s3453_s16 = sld [smem:[#allocation2 + $0x26]] }
 0x1ce   : > { %1045 = vrot.lane.b32.xlu1 %v1040_v23, %s3736_s15  ;;  %v1113_v23 = vmul.f32 %v3777_v26, %v996_v58  ;;  %v1227_v10 = vmul.f32 %v1225_v44, %v3015_v16  ;;  %v3796_v8 = vstv %s3167_s5 }
 0x1cf   : > { %686 = vrot.lane.b32.xlu0 %v682_v4, %s3736_s15  ;;  %v755_v4 = vmul.f32 %v3778_v5, %v638_v37  ;;  %v344_v1 = vmul.f32 %v3796_v8, %v2144_v36 }
 0x1d0   : > { %v1118_v2 = vadd.f32 %v1116_v34, %v1113_v23  ;;  %v1203_v23 = vstv %s2987_s14  ;;  %v3048_v34 = vsel %vm249_vm12, %v2589_v59, %v2248_v14  ;;  %s3387_s14 = sld [smem:[#allocation2 + $0x1f]] }
 0x1d1   : > { %v760_v57 = vadd.f32 %v758_v30, %v755_v4  ;;  %v1205_v40 = vmul.f32 %v1203_v23, %v3015_v16  ;;  %v1244_v30 = vstv %s3023_s7  ;;  %s3457_s7 = sld [smem:[#allocation2 + $0x57]] }
 0x1d2   : > { %1067 = vrot.lane.b32.xlu1 %v1062_v61, %s3740_s2  ;;  %v1135_v61 = vmul.f32 %v3782_v19, %v996_v58  ;;  %v1514_v20 = vstv %s3207_s10 }
 0x1d3   : > { %708 = vrot.lane.b32.xlu0 %v704_v43, %s3740_s2  ;;  %v3003_v43 = vsel %vm249_vm12, %v1183_v24, %v2244_v13  ;;  %v780_v24 = vmul.f32 %v779_v3, %v650_v54  ;;  %v1222_v3 = vstv %s2995_s26  ;;  %s3391_s26 = sld [smem:[#allocation2 + $0x50]] }
 0x1d4   : > { %v1140_v37 = vadd.f32 %v1138_v49, %v1135_v61  ;;  %v1224_v5 = vmul.f32 %v1222_v3, %v3003_v43  ;;  %v1246_v61 = vmul.f32 %v1244_v30, %v3003_v43  ;;  %v1278_v49 = vstv %s3035_s24  ;;  %s3503_s24 = sld [smem:[#allocation2 + $0x5e]] }
 0x1d5   : > { %v782_v26 = vadd.f32 %v780_v24, %v777_v60 }
 0x1d6   : > { %1101 = vrot.lane.b32.xlu1 %v1096_v15, %s3741_s6  ;;  %v1200_v15 = vstv %s2979_s30  ;;  %v1229_v59 = vadd.f32 %v1227_v10, %v1224_v5  ;;  %s3197_s30 = sld [smem:[#allocation2 + $0x30]] }
 0x1d7   : > { %742 = vrot.lane.b32.xlu0 %v738_v12, %s3741_s6  ;;  %v1202_v63 = vmul.f32 %v1200_v15, %v3003_v43  ;;  %v1201_v60 = vmul.f32 %v1200_v15, %v3048_v34  ;;  %v1280_v15 = vmul.f32 %v1278_v49, %v3003_v43 }
 0x1d8   : > { %v2997_v39 = vpop.permute.xlu1 %834 }
 0x1d9   : > { %v3017_v58 = vpop.permute.xlu0 %832  ;;  %v1207_v12 = vadd.f32 %v1205_v40, %v1202_v63  ;;  %v1281_v63 = vstv %s3043_s23  ;;  %s3813_s23 = sld [smem:[#allocation20_spill]] }
 0x1da   : > { %1123 = vrot.lane.b32.xlu1 %v1118_v2, %s3742_s25  ;;  %v3060_v2 = vsel %vm249_vm12, %v2457_v50, %v2263_v22  ;;  %v1489_v22 = vstv %s3152_s3  ;;  %s1962_s3 = smov [#allocation7]  }
 0x1db   : > { %764 = vrot.lane.b32.xlu0 %v760_v57, %s3742_s25  ;;  %v1247_v57 = vstv %s3029_s17  ;;  %v1204_v50 = vmul.f32 %v1203_v23, %v3060_v2  ;;  %v1226_v23 = vmul.f32 %v1225_v44, %v3060_v2  ;;  %s3501_s17 = sld [smem:[#allocation2 + $0x2d]] }
 0x1dc   : > { %v3025_v38 = vpop.permute.xlu1 %856  ;;  %v1248_v44 = vmul.f32 %v1247_v57, %v3060_v2 }
 0x1dd   : > { %v3040_v4 = vpop.permute.xlu0 %854 }
 0x1de   : > { %1145 = vrot.lane.b32.xlu1 %v1140_v37, %s3744_s22  ;;  %v1206_v37 = vadd.f32 %v1204_v50, %v1201_v60  ;;  %v1245_v60 = vmul.f32 %v1244_v30, %v3048_v34  ;;  %v1322_v50 = vstv %s3077_s19  ;;  %v3113_v30 = vsel %vm249_vm12, %v2981_v9, %v2271_v27 }
 0x1df   : > { %786 = vrot.lane.b32.xlu0 %v782_v26, %s3744_s22  ;;  %v1223_v26 = vmul.f32 %v1222_v3, %v3048_v34  ;;  %v1282_v9 = vmul.f32 %v1281_v63, %v3060_v2  ;;  %v1470_v27 = vstv %s3147_s12  ;;  %s1655_s19 = sshll.u32 %s3813_s23, 4 }
 0x1e0   : > { %v3037_v54 = vpop.permute.xlu1 %878 }
 0x1e1   : > { %v3071_v6 = vpop.permute.xlu0 %876 }
 0x1e2   : > { %1212 = vrot.lane.b32.xlu1 %v1207_v12, %s3734_s0  ;;  %v1300_v12 = vstv %s3055_s20  ;;  %s3814_s20 = sld [smem:[#allocation15_spill]] }
 0x1e3   : > { %1121 = vrot.lane.b32.xlu0 %v2684_v45, %s3742_s25  ;;  %v1249_v45 = vmul.f32 %v1247_v57, %v3015_v16  ;;  %v1302_v10 = vmul.f32 %v1300_v12, %v3003_v43 }
 0x1e4   : > { %v3062_v19 = vpop.permute.xlu1 %912 }
 0x1e5   : > { %v1251_v24 = vadd.f32 %v1249_v45, %v1246_v61  ;;  %v3094_v3 = vpop.permute.xlu0 %910  ;;  %v1303_v61 = vstv %s3067_s27  ;;  %s3815_s27 = sld [smem:[#allocation18_spill]] }
 0x1e6   : > { %1234 = vrot.lane.b32.xlu1 %v1229_v59, %s3736_s15  ;;  %v1228_v59 = vadd.f32 %v1226_v23, %v1223_v26  ;;  %v1305_v45 = vmul.f32 %v1303_v61, %v3015_v16  ;;  %v1250_v26 = vadd.f32 %v1248_v44, %v1245_v60  ;;  %v1279_v23 = vmul.f32 %v1278_v49, %v3048_v34 }
 0x1e7   : > { %1143 = vrot.lane.b32.xlu0 %v2696_v62, %s3744_s22  ;;  %v1283_v62 = vmul.f32 %v1281_v63, %v3015_v16  ;;  %v1304_v63 = vmul.f32 %v1303_v61, %v3060_v2  ;;  %v3164_v61 = vsel %vm249_vm12, %v2610_v51, %v2273_v29  ;;  %v1467_v29 = vstv %s3142_s9  ;;  %s1547_s9 = scalar_lea.sflag [#allocation4], %s3813_s23 }
 0x1e8   : > { %v3084_v40 = vpop.permute.xlu1 %934  ;;  %v1284_v60 = vadd.f32 %v1282_v9, %v1279_v23  ;;  %v1414_v9 = vstv %s3117_s13 }
 0x1e9   : > { %v1285_v5 = vadd.f32 %v1283_v62, %v1280_v15  ;;  %v1307_v15 = vadd.f32 %v1305_v45, %v1302_v10  ;;  %v1325_v62 = vstv %s3082_s18  ;;  %v1389_v10 = vstv %s3091_s28  ;;  %s173_s18 = scalar_lea.vmem [#allocation7], %s1655_s19  ;;  %s1765_s28 = sshll.u32 %s3814_s20, 8 }
 0x1ea   : > { %1256 = vrot.lane.b32.xlu1 %v1251_v24, %s3740_s2  ;;  %v1327_v57 = vmul.f32 %v1325_v62, %v3015_v16  ;;  %v1391_v16 = vmul.f32 %v1389_v10, %v3113_v30  ;;  %v1392_v45 = vstv %s3098_s11  ;;  %s1560_s11 = sshll.u32 %s173_s18, 4  ;;  %s3569_s11 = int_to_ptr.vmem [resolvable:$true] %s1560_s11 }
 0x1eb   : > { %1210 = vrot.lane.b32.xlu0 %v1206_v37, %s3734_s0  ;;  %v1324_v37 = vmul.f32 %v1322_v50, %v3003_v43  ;;  %v3124_v43 = vsel %vm249_vm12, %v2489_v17, %v2279_v11  ;;  %v1301_v17 = vmul.f32 %v1300_v12, %v3048_v34  ;;  %s1881_s12 = scalar_lea.vmem %s3569_s11, 256  ;;  %p3817_p13 = scmp.ne.s32.totalorder %s3815_s27, 0 }
 0x1ec   : > { %v3107_v24 = vpop.permute.xlu1 %956  ;;  %v1394_v44 = vmul.f32 %v1392_v45, %v3124_v43  ;;  %p1882_p12 = scmp.ne.s32.totalorder %s3569_s11, %s1881_s12 }
 0x1ee   : > { %1290 = vrot.lane.b32.xlu1 %v1285_v5, %s3741_s6  ;;  %v3126_v5 = vpop.permute.xlu0 %932  ;;  %p1883_p7 = pnand %p1882_p12, %p3817_p13 }
 0x1ef   : > { %1232 = vrot.lane.b32.xlu0 %v1228_v59, %s3736_s15  ;;  %v1329_v59 = vadd.f32 %v1327_v57, %v1324_v37  ;;  %v1306_v57 = vadd.f32 %v1304_v63, %v1301_v17  ;;  %v3178_v17 = vsel %vm249_vm12, %v2477_v46, %v2281_v32 }
 0x1f0   : > { %p1884_p8 = pneg %p1883_p7 }
 0x1f2   : > { %1312 = vrot.lane.b32.xlu1 %v1307_v15, %s3742_s25  ;;  %v1411_v15 = vstv %s3105_s4  ;;  %v3154_v23 = vpop.permute.xlu0 %954 }
 0x1f3   : > { %1254 = vrot.lane.b32.xlu0 %v1250_v26, %s3740_s2  ;;  %v1396_v26 = vadd.f32 %v1394_v44, %v1391_v16  ;;  %v1413_v12 = vmul.f32 %v1411_v15, %v3113_v30  ;;  %3784 = vst [vmem:[#allocation38_spill] sm:$0xff] %v3154_v23  ;;  %v1416_v16 = vmul.f32 %v1414_v9, %v3124_v43 }
 0x1f4   : > { %v3133_v49 = vpop.permute.xlu1 %288 }
 0x1f5   : > { %v1418_v44 = vadd.f32 %v1416_v16, %v1413_v12  ;;  %v1393_v16 = vmul.f32 %v1392_v45, %v3178_v17  ;;  %v1472_v45 = vmul.f32 %v1470_v27, %v3124_v43 }
 0x1f6   : > { %1334 = vrot.lane.b32.xlu1 %v1329_v59, %s3744_s22  ;;  %v1323_v59 = vmul.f32 %v1322_v50, %v3048_v34  ;;  %v1326_v34 = vmul.f32 %v1325_v62, %v3060_v2  ;;  %v1433_v50 = vstv %s3131_s21  ;;  %v1436_v2 = vstv %s3138_s1  ;;  %s3816_s21 = sld [smem:[#allocation44_spill]] }
 0x1f7   : > { %1288 = vrot.lane.b32.xlu0 %v1284_v60, %s3741_s6  ;;  %v3785_v60 = vlaneseq  ;;  %v1435_v63 = vmul.f32 %v1433_v50, %v3113_v30  ;;  %v1390_v62 = vmul.f32 %v1389_v10, %v3164_v61  ;;  %v1438_v12 = vmul.f32 %v1436_v2, %v3124_v43 }
 0x1f8   : > { %v3149_v37 = vpop.permute.xlu1 %310 }
 0x1f9   : > { %v3159_v11 = vand.u32 127, %v3785_v60  ;;  %v1440_v10 = vadd.f32 %v1438_v12, %v1435_v63  ;;  %v1395_v14 = vadd.f32 %v1393_v16, %v1390_v62  ;;  %v1415_v62 = vmul.f32 %v1414_v9, %v3178_v17 }
 0x1fa   : > { %1401 = vrot.lane.b32.xlu1 %v1396_v26, %s3734_s0  ;;  %v1492_v63 = vstv %s3188_s29  ;;  %v1434_v12 = vmul.f32 %v1433_v50, %v3164_v61 }
 0x1fb   : > { %1310 = vrot.lane.b32.xlu0 %v1306_v57, %s3742_s25  ;;  %v208_v26 = vadd.s32 4294967294, %v3159_v11  ;;  %v1328_v57 = vadd.f32 %v1326_v34, %v1323_v59  ;;  %v204_v46 = vadd.s32 4294967293, %v3159_v11  ;;  %v212_v32 = vadd.s32 4294967295, %v3159_v11 }
 0x1fc   : > { %v3180_v51 = vpop.permute.xlu1 %332  ;;  %v1469_v34 = vmul.f32 %v1467_v29, %v3113_v30  ;;  %v3262_v13 = vadd.s32 1, %v3159_v11  ;;  %s3567_s1 = scalar_lea.hbm %s3816_s21, %s1765_s28 }
 0x1fd   : > { %v3184_v60 = vpop.permute.xlu0 %1021  ;;  %vm209_vm13 = vcmp.ge.s32.totalorder %v208_v26, 0  ;;  %vm210_vm14 = vcmp.lt.s32.totalorder %v208_v26, 16  ;;  %vm205_vm15 = vcmp.ge.s32.totalorder %v204_v46, 0  ;;  %vm206_vm0 = vcmp.lt.s32.totalorder %v204_v46, 16 }
 0x1fe   : > { %3786 = vst [vmem:[#allocation39_spill] sm:$0xff] %v3184_v60  ;;  %1423 = vrot.lane.b32.xlu1 %v1418_v44, %s3736_s15  ;;  %vm213_vm1 = vcmp.ge.s32.totalorder %v212_v32, 0  ;;  %vm214_vm2 = vcmp.lt.s32.totalorder %v212_v32, 16  ;;  %vm3217_vm3 = vmand %vm209_vm13, %vm210_vm14  ;;  %v1474_v16 = vadd.f32 %v1472_v45, %v1469_v34  ;;  %v3795_v45 = vstv %s3171_s8 }
 0x1ff   : > { %1332 = vrot.lane.b32.xlu0 %v1328_v57, %s3744_s22  ;;  %v1412_v57 = vmul.f32 %v1411_v15, %v3164_v61  ;;  %vm3222_vm4 = vmand %vm205_vm15, %vm206_vm0  ;;  %v347_v60 = vmul.f32 %v3795_v45, %v2126_v31  ;;  %v1511_v31 = vstv %s3197_s30  ;;  %vm218_vm6 = vcmp.lt.s32.totalorder %v3262_v13, 16 }
 0x200   : > { %v3199_v59 = vpop.permute.xlu1 %366  ;;  %vm3235_vm5 = vmand %vm213_vm1, %vm214_vm2  ;;  %v293_v50 = vsel %vm3222_vm4, %v3133_v49, 0.0  ;;  %v1513_v8 = vmul.f32 %v1511_v31, %v3113_v30  ;;  %v1468_v49 = vmul.f32 %v1467_v29, %v3164_v61 }
 0x201   : > { %v3204_v44 = vpop.permute.xlu0 %1043  ;;  %v1417_v26 = vadd.f32 %v1415_v62, %v1412_v57  ;;  %v337_v32 = vsel %vm3235_vm5, %v3180_v51, 0.0  ;;  %v1437_v57 = vmul.f32 %v1436_v2, %v3178_v17  ;;  %v349_v23 = vadd.f32 %v347_v60, %v344_v1 }
 0x202   : > { %3787 = vst [vmem:[#allocation40_spill] sm:$0xff] %v3204_v44  ;;  %1445 = vrot.lane.b32.xlu1 %v1440_v10, %s3740_s2  ;;  %v1491_v10 = vmul.f32 %v1489_v22, %v3113_v30  ;;  %v1516_v2 = vmul.f32 %v1514_v20, %v3124_v43  ;;  %v3269_v30 = vadd.s32 2, %v3159_v11  ;;  %v3278_v1 = vadd.s32 3, %v3159_v11 }
 0x203   : > { %1399 = vrot.lane.b32.xlu0 %v1395_v14, %s3734_s0  ;;  %v315_v14 = vsel %vm3217_vm3, %v3149_v37, 0.0  ;;  %v1494_v37 = vmul.f32 %v1492_v63, %v3124_v43  ;;  %s3271_s0 = sld [smem:[#allocation2 + $0xa]]  ;;  %v1493_v60 = vmul.f32 %v1492_v63, %v3178_v17 }
 0x204   : > { %v389_v46 = vpop.permute.xlu1 %388  ;;  %v317_v62 = vadd.f32 %v315_v14, %v293_v50  ;;  %v1518_v14 = vadd.f32 %v1516_v2, %v1513_v8  ;;  %vm222_vm7 = vcmp.lt.s32.totalorder %v3269_v30, 16  ;;  %v1512_v50 = vmul.f32 %v1511_v31, %v3164_v61 }
 0x205   : > { %v3229_v9 = vpop.permute.xlu0 %1065  ;;  %v1496_v36 = vadd.f32 %v1494_v37, %v1491_v10  ;;  %v1471_v10 = vmul.f32 %v1470_v27, %v3178_v17  ;;  %v1490_v37 = vmul.f32 %v1489_v22, %v3164_v61  ;;  %v371_v27 = vsel %vm218_vm6, %v3199_v59, 0.0 }
 0x206   : > { %3792 = vst [vmem:[#allocation41_spill] sm:$0xff] %v3229_v9  ;;  %1479 = vrot.lane.b32.xlu1 %v1474_v16, %s3741_s6  ;;  %v1439_v9 = vadd.f32 %v1437_v57, %v1434_v12  ;;  %v339_v51 = vadd.f32 %v337_v32, %v317_v62  ;;  %v393_v11 = vsel %vm222_vm7, %v389_v46, 0.0  ;;  %vm226_vm8 = vcmp.lt.s32.totalorder %v3278_v1, 16 }
 0x207   : > { %1421 = vrot.lane.b32.xlu0 %v1417_v26, %s3736_s15  ;;  %v1473_v26 = vadd.f32 %v1471_v10, %v1468_v49  ;;  %s3274_s15 = sld [smem:[#allocation2 + $0x3b]]  ;;  %v1515_v32 = vmul.f32 %v1514_v20, %v3178_v17 }
 0x208   : > { %v411_v45 = vpop.permute.xlu1 %410  ;;  %v351_v43 = vadd.f32 %v349_v23, %v339_v51  ;;  %v1495_v23 = vadd.f32 %v1493_v60, %v1490_v37 }
 0x209   : > { %v3257_v16 = vpop.permute.xlu0 %1099  ;;  %v415_v63 = vsel %vm226_vm8, %v411_v45, 0.0  ;;  %v1517_v8 = vadd.f32 %v1515_v32, %v1512_v50  ;;  %v531_v61 = vstv %s3271_s0 }
 0x20a   : > { %1501 = vrot.lane.b32.xlu1 %v1496_v36, %s3742_s25  ;;  %v373_v59 = vadd.f32 %v371_v27, %v351_v43  ;;  %v533_v20 = vmul.f32 %v531_v61, %v2172_v47  ;;  %v3797_v47 = vstv %s3167_s5  ;;  %s1885_s5 = sshll.u32 %s1962_s3, 4  ;;  %s1886_s5 = int_to_ptr.vmem [resolvable:$false] %s1885_s5 }
 0x20b   : > { %1443 = vrot.lane.b32.xlu0 %v1439_v9, %s3740_s2  ;;  %s3312_s2 = sld [smem:[#allocation2 + $0x11]]  ;;  %p1888_p9 = scmp.lt.s32.totalorder %s3569_s11, %s1886_s5 }
 0x20c   : > { %v478_v12 = vpop.permute.xlu1 %477  ;;  %v395_v57 = vadd.f32 %v393_v11, %v373_v59 }
 0x20d   : > { %v287_v29 = vpop.permute.xlu0 %286  ;;  %v482_v46 = vsel %vm3222_vm4, %v478_v12, 0.0  ;;  %v534_v31 = vstv %s3274_s15 }
 0x20e   : > { %1523 = vrot.lane.b32.xlu1 %v1518_v14, %s3744_s22  ;;  %v417_v49 = vadd.f32 %v415_v63, %v395_v57  ;;  %v536_v17 = vmul.f32 %v534_v31, %v2140_v35  ;;  %v3798_v35 = vstv %s3171_s8  ;;  %s1887_s8 = scalar_lea.vmem %s1886_s5, 512 }
 0x20f   : > { %1477 = vrot.lane.b32.xlu0 %v1473_v26, %s3741_s6  ;;  %v346_v11 = vmul.f32 %v3798_v35, %v2156_v41  ;;  %s3354_s6 = sld [smem:[#allocation2 + $0x18]]  ;;  %p1889_p10 = scmp.lt.s32.totalorder %s1887_s8, %s1881_s12 }
 0x210   : > { %v500_v22 = vpop.permute.xlu1 %499  ;;  %v484_v45 = vadd.f32 %v482_v46, %v417_v49  ;;  %v538_v37 = vadd.f32 %v536_v17, %v533_v20 }
 0x211   : > { %v309_v9 = vpop.permute.xlu0 %308  ;;  %v504_v51 = vsel %vm3217_vm3, %v500_v22, 0.0  ;;  %v343_v22 = vmul.f32 %v3797_v47, %v2158_v42  ;;  %v720_v20 = vstv %s3312_s2  ;;  %p1890_p2 = por %p1889_p10, %p1888_p9 }
 0x212   : > { %v506_v14 = vadd.f32 %v504_v51, %v484_v45  ;;  %v314_v60 = vsel %vm3217_vm3, %v309_v9, 0.0  ;;  %v722_v47 = vmul.f32 %v720_v20, %v2183_v52 }
 0x213   : > { %1499 = vrot.lane.b32.xlu0 %v1495_v23, %s3742_s25  ;;  %v292_v23 = vsel %vm3222_vm4, %v287_v29, 0.0  ;;  %s3356_s25 = sld [smem:[#allocation2 + $0x49]]  ;;  %p1891_p0 = pnand %p1890_p2, %p1884_p8 }
 0x214   : > { %v522_v62 = vpop.permute.xlu1 %521  ;;  %v316_v63 = vadd.f32 %v314_v60, %v292_v23 }
 0x215   : > { %v331_v36 = vpop.permute.xlu0 %330  ;;  %v526_v10 = vsel %vm3235_vm5, %v522_v62, 0.0  ;;  %v348_v62 = vadd.f32 %v346_v11, %v343_v22 }
 0x216   : > { %v528_v26 = vadd.f32 %v526_v10, %v506_v14  ;;  %v336_v50 = vsel %vm3235_vm5, %v331_v36, 0.0 }
 0x217   : > { %1521 = vrot.lane.b32.xlu0 %v1517_v8, %s3744_s22  ;;  %s3320_s22 = sld [smem:[#allocation2 + $0x42]]  ;;  %v338_v57 = vadd.f32 %v336_v50, %v316_v63 }
 0x218   : > { %v556_v2 = vpop.permute.xlu1 %555  ;;  %v540_v59 = vadd.f32 %v538_v37, %v528_v26 }
 0x219   : > { %v365_v12 = vpop.permute.xlu0 %364  ;;  %v560_v32 = vsel %vm218_vm6, %v556_v2, 0.0  ;;  %v350_v51 = vadd.f32 %v348_v62, %v338_v57  ;;  %v532_v62 = vmul.f32 %v531_v61, %v2175_v48 }
 0x21a   : > { %v562_v46 = vadd.f32 %v560_v32, %v540_v59  ;;  %v370_v2 = vsel %vm218_vm6, %v365_v12, 0.0 }
 0x21b   : > { %v372_v35 = vadd.f32 %v370_v2, %v350_v51 }
 0x21c   : > { %v578_v43 = vpop.permute.xlu1 %577 }
 0x21d   : > { %v387_v27 = vpop.permute.xlu0 %386  ;;  %v582_v41 = vsel %vm222_vm7, %v578_v43, 0.0  ;;  %v723_v17 = vstv %s3320_s22 }
 0x21e   : > { %v584_v49 = vadd.f32 %v582_v41, %v562_v46  ;;  %v392_v43 = vsel %vm222_vm7, %v387_v27, 0.0  ;;  %v725_v22 = vmul.f32 %v723_v17, %v2191_v55  ;;  %v535_v41 = vmul.f32 %v534_v31, %v2133_v33 }
 0x21f   : > { %v394_v50 = vadd.f32 %v392_v43, %v372_v35  ;;  %v888_v33 = vstv %s3354_s6  ;;  %v891_v31 = vstv %s3356_s25 }
 0x220   : > { %v600_v9 = vpop.permute.xlu1 %599  ;;  %v727_v63 = vadd.f32 %v725_v22, %v722_v47  ;;  %v537_v2 = vadd.f32 %v535_v41, %v532_v62  ;;  %v890_v35 = vmul.f32 %v888_v33, %v2120_v28  ;;  %v861_v28 = vsel %vm3217_vm3, %v3025_v38, 0.0 }
 0x221   : > { %v409_v42 = vpop.permute.xlu0 %408  ;;  %v604_v36 = vsel %vm226_vm8, %v600_v9, 0.0 }
 0x222   : > { %v606_v10 = vadd.f32 %v604_v36, %v584_v49  ;;  %v414_v12 = vsel %vm226_vm8, %v409_v42, 0.0 }
 0x223   : > { %v416_v55 = vadd.f32 %v414_v12, %v394_v50  ;;  %v893_v12 = vmul.f32 %v891_v31, %v2110_v21 }
 0x224   : > { %v667_v29 = vpop.permute.xlu1 %666 }
 0x225   : > { %v476_v8 = vpop.permute.xlu0 %475  ;;  %v671_v45 = vsel %vm3222_vm4, %v667_v29, 0.0 }
 0x226   : > { %v673_v60 = vadd.f32 %v671_v45, %v606_v10  ;;  %v481_v9 = vsel %vm3222_vm4, %v476_v8, 0.0 }
 0x227   : > { %v483_v57 = vadd.f32 %v481_v9, %v416_v55 }
 0x228   : > { %v689_v14 = vpop.permute.xlu1 %688 }
 0x229   : > { %v693_v26 = vsel %vm3217_vm3, %v689_v14, 0.0  ;;  %v498_v37 = vpop.permute.xlu0 %497 }
 0x22a   : > { %v695_v11 = vadd.f32 %v693_v26, %v673_v60  ;;  %v503_v32 = vsel %vm3217_vm3, %v498_v37, 0.0 }
 0x22b   : > { %v505_v8 = vadd.f32 %v503_v32, %v483_v57 }
 0x22c   : > { %v711_v23 = vpop.permute.xlu1 %710 }
 0x22d   : > { %v715_v59 = vsel %vm3235_vm5, %v711_v23, 0.0  ;;  %v520_v27 = vpop.permute.xlu0 %519 }
 0x22e   : > { %v717_v52 = vadd.f32 %v715_v59, %v695_v11  ;;  %v525_v29 = vsel %vm3235_vm5, %v520_v27, 0.0  ;;  %v839_v11 = vsel %vm3222_vm4, %v2997_v39, 0.0 }
 0x22f   : > { %v527_v45 = vadd.f32 %v525_v29, %v505_v8  ;;  %v917_v29 = vsel %vm218_vm6, %v3062_v19, 0.0  ;;  %v724_v8 = vmul.f32 %v723_v17, %v2193_v56 }
 0x230   : > { %v745_v42 = vpop.permute.xlu1 %744  ;;  %v729_v36 = vadd.f32 %v727_v63, %v717_v52  ;;  %v895_v52 = vadd.f32 %v893_v12, %v890_v35  ;;  %v883_v63 = vsel %vm3235_vm5, %v3037_v54, 0.0  ;;  %v721_v54 = vmul.f32 %v720_v20, %v2185_v53 }
 0x231   : > { %v554_v46 = vpop.permute.xlu0 %553  ;;  %v749_v49 = vsel %vm218_vm6, %v745_v42, 0.0  ;;  %v539_v37 = vadd.f32 %v537_v2, %v527_v45  ;;  %v1077_v45 = vstv %s3387_s14  ;;  %v1080_v2 = vstv %s3391_s26 }
 0x232   : > { %v751_v10 = vadd.f32 %v749_v49, %v729_v36  ;;  %v559_v47 = vsel %vm218_vm6, %v554_v46, 0.0  ;;  %v961_v53 = vsel %vm226_vm8, %v3107_v24, 0.0  ;;  %v726_v56 = vadd.f32 %v724_v8, %v721_v54 }
 0x233   : > { %v561_v27 = vadd.f32 %v559_v47, %v539_v37  ;;  %v1082_v37 = vmul.f32 %v1080_v2, %v2229_v7 }
 0x234   : > { %v767_v51 = vpop.permute.xlu1 %766 }
 0x235   : > { %v771_v48 = vsel %vm222_vm7, %v767_v51, 0.0  ;;  %v576_v61 = vpop.permute.xlu0 %575 }
 0x236   : > { %v773_v14 = vadd.f32 %v771_v48, %v751_v10  ;;  %v581_v23 = vsel %vm222_vm7, %v576_v61, 0.0  ;;  %v939_v48 = vsel %vm222_vm7, %v3084_v40, 0.0 }
 0x237   : > { %v583_v55 = vadd.f32 %v581_v23, %v561_v27 }
 0x238   : > { %v789_v26 = vpop.permute.xlu1 %788 }
 0x239   : > { %v793_v43 = vsel %vm226_vm8, %v789_v26, 0.0  ;;  %v598_v60 = vpop.permute.xlu0 %597  ;;  %v1079_v26 = vmul.f32 %v1077_v45, %v2215_v0 }
 0x23a   : > { %v795_v22 = vadd.f32 %v793_v43, %v773_v14  ;;  %v603_v39 = vsel %vm226_vm8, %v598_v60, 0.0 }
 0x23b   : > { %v605_v57 = vadd.f32 %v603_v39, %v583_v55  ;;  %v1084_v12 = vadd.f32 %v1082_v37, %v1079_v26  ;;  %v3799_v37 = vld [vmem:[#allocation38_spill] sm:$0xff] }
 0x23c   : > { %v841_v50 = vadd.f32 %v839_v11, %v795_v22  ;;  %v1024_v59 = vpop.permute.xlu1 %1023 }
 0x23d   : > { %v665_v21 = vpop.permute.xlu0 %664  ;;  %v1028_v43 = vsel %vm3222_vm4, %v1024_v59, 0.0 }
 0x23e   : > { %v863_v9 = vadd.f32 %v861_v28, %v841_v50  ;;  %v670_v38 = vsel %vm3222_vm4, %v665_v21, 0.0 }
 0x23f   : > { %v672_v36 = vadd.f32 %v670_v38, %v605_v57  ;;  %v892_v38 = vmul.f32 %v891_v31, %v2108_v18  ;;  %v838_v57 = vsel %vm3222_vm4, %v3017_v58, 0.0  ;;  %v882_v58 = vsel %vm3235_vm5, %v3071_v6, 0.0 }
 0x240   : > { %v885_v32 = vadd.f32 %v883_v63, %v863_v9  ;;  %v1046_v42 = vpop.permute.xlu1 %1045 }
 0x241   : > { %v687_v62 = vpop.permute.xlu0 %686  ;;  %v1050_v22 = vsel %vm3217_vm3, %v1046_v42, 0.0 }
 0x242   : > { %v897_v41 = vadd.f32 %v895_v52, %v885_v32  ;;  %v692_v46 = vsel %vm3217_vm3, %v687_v62, 0.0  ;;  %v889_v32 = vmul.f32 %v888_v33, %v2116_v25  ;;  %v860_v25 = vsel %vm3217_vm3, %v3040_v4, 0.0 }
 0x243   : > { %v694_v61 = vadd.f32 %v692_v46, %v672_v36  ;;  %v916_v4 = vsel %vm218_vm6, %v3094_v3, 0.0  ;;  %v960_v3 = vsel %vm226_vm8, %v3799_v37, 0.0 }
 0x244   : > { %v919_v49 = vadd.f32 %v917_v29, %v897_v41  ;;  %v1068_v51 = vpop.permute.xlu1 %1067  ;;  %v894_v33 = vadd.f32 %v892_v38, %v889_v32 }
 0x245   : > { %v709_v10 = vpop.permute.xlu0 %708  ;;  %v1072_v7 = vsel %vm3235_vm5, %v1068_v51, 0.0 }
 0x246   : > { %v941_v19 = vadd.f32 %v939_v48, %v919_v49  ;;  %v714_v14 = vsel %vm3235_vm5, %v709_v10, 0.0 }
 0x247   : > { %v716_v20 = vadd.f32 %v714_v14, %v694_v61  ;;  %v1266_v14 = vstv %s3453_s16 }
 0x248   : > { %v963_v17 = vadd.f32 %v961_v53, %v941_v19  ;;  %v1102_v40 = vpop.permute.xlu1 %1101  ;;  %v1269_v53 = vstv %s3457_s7 }
 0x249   : > { %v743_v60 = vpop.permute.xlu0 %742  ;;  %v728_v35 = vadd.f32 %v726_v56, %v716_v20  ;;  %v1106_v9 = vsel %vm218_vm6, %v1102_v40, 0.0  ;;  %v938_v20 = vsel %vm222_vm7, %v3126_v5, 0.0  ;;  %v3800_v40 = vld [vmem:[#allocation23_spill] sm:$0xff] }
 0x24a   : > { %v1030_v47 = vadd.f32 %v1028_v43, %v963_v17  ;;  %v748_v0 = vsel %vm218_vm6, %v743_v60, 0.0  ;;  %v1268_v43 = vmul.f32 %v1266_v14, %v3800_v40  ;;  %v3801_v60 = vld [vmem:[#allocation25_spill] sm:$0xff] }
 0x24b   : > { %v750_v28 = vadd.f32 %v748_v0, %v728_v35  ;;  %v3802_v35 = vld [vmem:[#allocation21_spill] sm:$0xff] }
 0x24c   : > { %v1052_v24 = vadd.f32 %v1050_v22, %v1030_v47  ;;  %v1124_v11 = vpop.permute.xlu1 %1123  ;;  %v1271_v47 = vmul.f32 %v1269_v53, %v3801_v60  ;;  %v3809_v60 = vld [vmem:[#allocation27_spill] sm:$0xff] }
 0x24d   : > { %v765_v23 = vpop.permute.xlu0 %764  ;;  %v1128_v41 = vsel %vm222_vm7, %v1124_v11, 0.0 }
 0x24e   : > { %v1074_v50 = vadd.f32 %v1072_v7, %v1052_v24  ;;  %v770_v59 = vsel %vm222_vm7, %v765_v23, 0.0  ;;  %v1078_v24 = vmul.f32 %v1077_v45, %v3802_v35  ;;  %v3804_v23 = vld [vmem:[#allocation39_spill] sm:$0xff]  ;;  %v1273_v45 = vadd.f32 %v1271_v47, %v1268_v43 }
 0x24f   : > { %v772_v39 = vadd.f32 %v770_v59, %v750_v28 }
 0x250   : > { %v1086_v27 = vadd.f32 %v1084_v12, %v1074_v50  ;;  %v1146_v21 = vpop.permute.xlu1 %1145  ;;  %v3803_v12 = vld [vmem:[#allocation22_spill] sm:$0xff]  ;;  %v1027_v50 = vsel %vm3222_vm4, %v3804_v23, 0.0 }
 0x251   : > { %v787_v52 = vpop.permute.xlu0 %786  ;;  %v1150_v54 = vsel %vm226_vm8, %v1146_v21, 0.0  ;;  %v1081_v5 = vmul.f32 %v1080_v2, %v3803_v12 }
 0x252   : > { %v1108_v63 = vadd.f32 %v1106_v9, %v1086_v27  ;;  %v792_v55 = vsel %vm226_vm8, %v787_v52, 0.0  ;;  %v3805_v27 = vld [vmem:[#allocation40_spill] sm:$0xff] }
 0x253   : > { %v794_v42 = vadd.f32 %v792_v55, %v772_v39  ;;  %v1049_v21 = vsel %vm3217_vm3, %v3805_v27, 0.0  ;;  %v1083_v2 = vadd.f32 %v1081_v5, %v1078_v24  ;;  %v3806_v55 = vld [vmem:[#allocation41_spill] sm:$0xff] }
 0x254   : > { %v1213_v62 = vpop.permute.xlu1 %1212  ;;  %v1130_v18 = vadd.f32 %v1128_v41, %v1108_v63  ;;  %v1071_v32 = vsel %vm3235_vm5, %v3806_v55, 0.0 }
 0x255   : > { %v840_v46 = vadd.f32 %v838_v57, %v794_v42  ;;  %v1122_v29 = vpop.permute.xlu0 %1121  ;;  %v1217_v19 = vsel %vm3222_vm4, %v1213_v62, 0.0 }
 0x256   : > { %v1152_v51 = vadd.f32 %v1150_v54, %v1130_v18 }
 0x257   : > { %v862_v31 = vadd.f32 %v860_v25, %v840_v46  ;;  %v1105_v25 = vsel %vm218_vm6, %v3257_v16, 0.0  ;;  %v3807_v16 = vld [vmem:[#allocation24_spill] sm:$0xff] }
 0x258   : > { %v1235_v36 = vpop.permute.xlu1 %1234  ;;  %v1219_v56 = vadd.f32 %v1217_v19, %v1152_v51 }
 0x259   : > { %v884_v8 = vadd.f32 %v882_v58, %v862_v31  ;;  %v1144_v49 = vpop.permute.xlu0 %1143  ;;  %v1239_v26 = vsel %vm3217_vm3, %v1235_v36, 0.0  ;;  %v1127_v31 = vsel %vm222_vm7, %v1122_v29, 0.0  ;;  %v1455_v29 = vstv %s3501_s17 }
 0x25a   : > { %v1241_v59 = vadd.f32 %v1239_v26, %v1219_v56  ;;  %v1457_v47 = vmul.f32 %v1455_v29, %v3809_v60 }
 0x25b   : > { %v896_v48 = vadd.f32 %v894_v33, %v884_v8 }
 0x25c   : > { %v1257_v61 = vpop.permute.xlu1 %1256 }
 0x25d   : > { %v918_v10 = vadd.f32 %v916_v4, %v896_v48  ;;  %v1211_v6 = vpop.permute.xlu0 %1210  ;;  %v1261_v11 = vsel %vm3235_vm5, %v1257_v61, 0.0  ;;  %v1149_v48 = vsel %vm226_vm8, %v1144_v49, 0.0  ;;  %v1267_v61 = vmul.f32 %v1266_v14, %v3807_v16 }
 0x25e   : > { %v1263_v9 = vadd.f32 %v1261_v11, %v1241_v59  ;;  %v1216_v26 = vsel %vm3222_vm4, %v1211_v6, 0.0 }
 0x25f   : > { %v940_v17 = vadd.f32 %v938_v20, %v918_v10  ;;  %v3808_v10 = vld [vmem:[#allocation26_spill] sm:$0xff] }
 0x260   : > { %v1291_v22 = vpop.permute.xlu1 %1290  ;;  %v1275_v42 = vadd.f32 %v1273_v45, %v1263_v9  ;;  %v1270_v19 = vmul.f32 %v1269_v53, %v3808_v10 }
 0x261   : > { %v962_v0 = vadd.f32 %v960_v3, %v940_v17  ;;  %v1233_v7 = vpop.permute.xlu0 %1232  ;;  %v1295_v41 = vsel %vm218_vm6, %v1291_v22, 0.0  ;;  %v1458_v17 = vstv %s3503_s24  ;;  %v3810_v22 = vld [vmem:[#allocation29_spill] sm:$0xff] }
 0x262   : > { %v1297_v58 = vadd.f32 %v1295_v41, %v1275_v42  ;;  %v1238_v14 = vsel %vm3217_vm3, %v1233_v7, 0.0  ;;  %v1460_v35 = vmul.f32 %v1458_v17, %v3810_v22  ;;  %v1272_v12 = vadd.f32 %v1270_v19, %v1267_v61 }
 0x263   : > { %v1029_v28 = vadd.f32 %v1027_v50, %v962_v0 }
 0x264   : > { %v1313_v39 = vpop.permute.xlu1 %1312 }
 0x265   : > { %v1051_v52 = vadd.f32 %v1049_v21, %v1029_v28  ;;  %v1255_v63 = vpop.permute.xlu0 %1254  ;;  %v1317_v33 = vsel %vm222_vm7, %v1313_v39, 0.0  ;;  %v1462_v28 = vadd.f32 %v1460_v35, %v1457_v47 }
 0x266   : > { %v1319_v4 = vadd.f32 %v1317_v33, %v1297_v58  ;;  %v1260_v6 = vsel %vm3235_vm5, %v1255_v63, 0.0 }
 0x267   : > { %v1073_v38 = vadd.f32 %v1071_v32, %v1051_v52 }
 0x268   : > { %v1335_v57 = vpop.permute.xlu1 %1334 }
 0x269   : > { %v1085_v62 = vadd.f32 %v1083_v2, %v1073_v38  ;;  %v1289_v46 = vpop.permute.xlu0 %1288  ;;  %v1339_v8 = vsel %vm226_vm8, %v1335_v57, 0.0 }
 0x26a   : > { %v1341_v37 = vadd.f32 %v1339_v8, %v1319_v4  ;;  %v1294_v27 = vsel %vm218_vm6, %v1289_v46, 0.0  ;;  %v3812_v46 = vld [vmem:[#allocation30_spill] sm:$0xff] }
 0x26b   : > { %v1107_v18 = vadd.f32 %v1105_v25, %v1085_v62  ;;  %v3811_v62 = vld [vmem:[#allocation28_spill] sm:$0xff]  ;;  %v1459_v25 = vmul.f32 %v1458_v17, %v3812_v46 }
 0x26c   : > { %v1402_v36 = vpop.permute.xlu1 %1401  ;;  %v1456_v41 = vmul.f32 %v1455_v29, %v3811_v62 }
 0x26d   : > { %v1129_v54 = vadd.f32 %v1127_v31, %v1107_v18  ;;  %v1311_v51 = vpop.permute.xlu0 %1310  ;;  %v1406_v56 = vsel %vm3222_vm4, %v1402_v36, 0.0 }
 0x26e   : > { %v1408_v53 = vadd.f32 %v1406_v56, %v1341_v37  ;;  %v1316_v39 = vsel %vm222_vm7, %v1311_v51, 0.0 }
 0x26f   : > { %v1151_v20 = vadd.f32 %v1149_v48, %v1129_v54  ;;  %v1461_v48 = vadd.f32 %v1459_v25, %v1456_v41 }
 0x270   : > { %v1424_v3 = vpop.permute.xlu1 %1423 }
 0x271   : > { %v1218_v40 = vadd.f32 %v1216_v26, %v1151_v20  ;;  %v1428_v49 = vsel %vm3217_vm3, %v1424_v3, 0.0  ;;  %v1333_v43 = vpop.permute.xlu0 %1332 }
 0x272   : > { %v1430_v5 = vadd.f32 %v1428_v49, %v1408_v53  ;;  %v1338_v55 = vsel %vm226_vm8, %v1333_v43, 0.0 }
 0x273   : > { %v1240_v24 = vadd.f32 %v1238_v14, %v1218_v40 }
 0x274   : > { %v1446_v0 = vpop.permute.xlu1 %1445 }
 0x275   : > { %v1262_v11 = vadd.f32 %v1260_v6, %v1240_v24  ;;  %v1450_v23 = vsel %vm3235_vm5, %v1446_v0, 0.0  ;;  %v1400_v50 = vpop.permute.xlu0 %1399 }
 0x276   : > { %v1452_v59 = vadd.f32 %v1450_v23, %v1430_v5  ;;  %v1405_v18 = vsel %vm3222_vm4, %v1400_v50, 0.0 }
 0x277   : > { %v1274_v7 = vadd.f32 %v1272_v12, %v1262_v11 }
 0x278   : > { %v1480_v21 = vpop.permute.xlu1 %1479  ;;  %v1464_v52 = vadd.f32 %v1462_v28, %v1452_v59 }
 0x279   : > { %v1296_v9 = vadd.f32 %v1294_v27, %v1274_v7  ;;  %v1422_v45 = vpop.permute.xlu0 %1421  ;;  %v1484_v63 = vsel %vm218_vm6, %v1480_v21, 0.0 }
 0x27a   : > { %v1486_v33 = vadd.f32 %v1484_v63, %v1464_v52  ;;  %v1427_v58 = vsel %vm3217_vm3, %v1422_v45, 0.0 }
 0x27b   : > { %v1318_v2 = vadd.f32 %v1316_v39, %v1296_v9 }
 0x27c   : > { %v1502_v32 = vpop.permute.xlu1 %1501 }
 0x27d   : > { %v1340_v38 = vadd.f32 %v1338_v55, %v1318_v2  ;;  %v1506_v42 = vsel %vm222_vm7, %v1502_v32, 0.0  ;;  %v1444_v57 = vpop.permute.xlu0 %1443 }
 0x27e   : > { %v1508_v36 = vadd.f32 %v1506_v42, %v1486_v33  ;;  %v1449_v16 = vsel %vm3235_vm5, %v1444_v57, 0.0 }
 0x27f   : > { %v1407_v31 = vadd.f32 %v1405_v18, %v1340_v38 }
 0x280   : > { %v1524_v54 = vpop.permute.xlu1 %1523 }
 0x281   : > { %v1429_v8 = vadd.f32 %v1427_v58, %v1407_v31  ;;  %v1528_v51 = vsel %vm226_vm8, %v1524_v54, 0.0  ;;  %v1478_v4 = vpop.permute.xlu0 %1477 }
 0x282   : > { %v1530_v61 = vadd.f32 %v1528_v51, %v1508_v36  ;;  %v1483_v15 = vsel %vm218_vm6, %v1478_v4, 0.0 }
 0x283   : > { %v1451_v10 = vadd.f32 %v1449_v16, %v1429_v8 }
 0x284   : > { %v1532_v44 = vsub.f32 0.0, %v1530_v61 }
 0x285   : > { %v1463_v19 = vadd.f32 %v1461_v48, %v1451_v10  ;;  %v1500_v20 = vpop.permute.xlu0 %1499 }
 0x286   : > { %v1535_v56 = vmul.f32 1.442695, %v1532_v44  ;;  %v1505_v17 = vsel %vm222_vm7, %v1500_v20, 0.0 }
 0x287   : > { %v1485_v29 = vadd.f32 %v1483_v15, %v1463_v19 }
 0x288   : > { %1834 = vpow2.f32 %v1535_v56 }
 0x289   : > { %v1507_v26 = vadd.f32 %v1505_v17, %v1485_v29  ;;  %v1522_v37 = vpop.permute.xlu0 %1521 }
 0x28a   : > { %v1527_v34 = vsel %vm226_vm8, %v1522_v37, 0.0 }
 0x28b   : > { %v1529_v3 = vadd.f32 %v1527_v34, %v1507_v26 }
 0x28d   : > { %v1531_v40 = vsub.f32 0.0, %v1529_v3 }
 0x28f   : > { %v1533_v49 = vmul.f32 1.442695, %v1531_v40 }
 0x291   : > { %1836 = vpow2.f32 %v1533_v49 }
 0x295   : > { %v1835_v43 = vpop.eup %1834 }
 0x296   : > { %v1538_v14 = vadd.f32 1.0, %v1835_v43 }
 0x298   : > { %1838 = vrcp.f32 %v1538_v14 }
 0x29e   : > { %v1837_v13 = vpop.eup %1836 }
 0x29f   : > { %v1537_v53 = vadd.f32 1.0, %v1837_v13 }
 0x2a1   : > { %1840 = vrcp.f32 %v1537_v53 }
 0x2a5   : > { %v1839_v30 = vpop.eup %1838 }
 0x2a6   : > { %1545 = vst.msk [vmem:[%s173_s18 + $0x8] sm:$0xff] %vm1543_vm9, %v1839_v30 }
 0x2ae   : > { %v1841_v1 = vpop.eup %1840 }
 0x2af   : > { %1544 = vst.msk [vmem:[%s173_s18] sm:$0xff] %vm1543_vm9, %v1841_v1 }
 0x2b0   : > { %1894 = shalt.err (!%p1891_p0)
}
 0x2b1   : > { %s1895_s29 = scalar_lea.hbm %s3567_s1, 256  ;;  %s1899_s0 = scalar_lea.hbm %s3816_s21, 512 }
 0x2b2   : > { %p1896_p3 = scmp.ne.s32.totalorder %s3567_s1, %s1895_s29  ;;  %p1900_p1 = scmp.lt.s32.totalorder %s3567_s1, %s3816_s21 }
 0x2b3   : > { %p1901_p6 = scmp.lt.s32.totalorder %s1899_s0, %s1895_s29 }
 0x2b4   : > { %p1897_p5 = pnand %p1896_p3, %p3817_p13 }
 0x2b5   : > { %p1902_p11 = por %p1901_p6, %p1900_p1 }
 0x2b6   : > { %p1898_p4 = pneg %p1897_p5 }
 0x2b8   : > { %p1903_p12 = pnand %p1902_p11, %p1898_p4 }
 0x2ba   : > { %1906 = shalt.err (!%p1903_p12)
}
 0x2bb   : > { %s1963_s22 = smov 128   ;;  %s1964_s6 = smov 8  }
 0x2bc   : > { %1772 = dma.vmem_to_hbm [thread:$0]  (%p3817_p13), %s3569_s11, 256, %s3567_s1, %s1547_s9, %s1963_s22, %s1963_s22, %s1964_s6  }
 0x2bd PF: > { %s3818_s25 = sld [smem:[#allocation11_spill]] }
 0x2be   : > { %s3819_s14 = sld [smem:[#allocation19_spill]] }
 0x2bf   : > { %s3820_s26 = sld [smem:[#allocation14_spill]] }
 0x2c3   : > { %s1575_s16 = sand.u32 1, %s3818_s25  }
 0x2c4   : > { %p3821_p7 = scmp.ne.s32.totalorder %s3819_s14, 0  ;;  %s1576_s7 = scalar_lea.sflag [#allocation4], %s1575_s16 }
 0x2c5   : > { %p3822_p8 = scmp.ge.s32.totalorder %s3820_s26, 2 }
 0x2c7   : > { %p1783_p9 = pnand %p3822_p8, %p3821_p7 }
 0x2c9   : > { %p1784_p10 = pneg %p1783_p9 }
 0x2cb   : > { %1932 = dma.done.wait (%p1784_p10), %s1576_s7, 256  }
 0x2cc   : > { %1934 = vsyncadd (%p1784_p10), %s1576_s7, 4294967040  ;;  %s3823_s12 = sld [smem:[#allocation16_spill]] }
 0x2cd   : > { %s3824_s9 = sld [smem:[#allocation12_spill]] }
 0x2ce   : > { %s3825_s10 = sld [smem:[#allocation13_spill]] }
 0x2cf   : > { %s3826_s11 = sld [smem:[#allocation17_spill]] }
 0x2d2   : > { %p16_p2 = scmp.ge.s32.totalorder %s3823_s12, 4  }
 0x2d4   :  { %18 = sbr.rel (!%p16_p2) target bundleno = 10 (0xa), region = 81 }
 0x2d9   :  { %1581 = vsyncpa [#allocation3], 1 }
 0x2da   :  { %1583 = vsyncpa [#allocation3 + $0x1], 1 }
 0x2db   :  { %1584 = vsyncpa [#allocation4], 1 }
 0x2dc   :  { %1586 = vsyncpa [#allocation4 + $0x1], 1 }
 0x2dd   :  { %1587 = vsyncpa [#allocation5], 1 }
 0x2de   :  { %1589 = vsyncpa [#allocation5 + $0x1], 1 }

</bundles_post_ra>
